<compile_context>
chip_gen: v7x
topology: tpu7x:2x2x1
jax: 0.10.0
libtpu: 0.0.40
codegen_flags: <defaults>
</compile_context>

<pallas_src>
import functools

import jax
import jax.numpy as jnp
from jax.experimental import pallas as pl
from jax.experimental.pallas import tpu as pltpu


SH = (64, 8, 8)  # fc output (C, H, W), as in the PyTorch module


def _round_up(a, b):
    return (a + b - 1) // b * b


# ----------------------------------------------------------------------------
# Pallas kernel: single-K-block matmul, optional fused bias + LeakyReLU.
# ----------------------------------------------------------------------------
def _epilogue(acc, b, apply_act, neg_slope):
    if b is not None:
        acc = acc + b
    if apply_act:
        acc = jnp.where(acc >= 0.0, acc * 1.0, acc * neg_slope)
    return acc


def _matmul_bias_kernel(x_ref, w_ref, b_ref, o_ref, *, apply_act, neg_slope):
    acc = jnp.dot(x_ref[...], w_ref[...], preferred_element_type=jnp.float32)
    o_ref[...] = _epilogue(acc, b_ref[...], apply_act, neg_slope).astype(o_ref.dtype)


def _matmul_kernel(x_ref, w_ref, o_ref, *, apply_act, neg_slope):
    acc = jnp.dot(x_ref[...], w_ref[...], preferred_element_type=jnp.float32)
    o_ref[...] = _epilogue(acc, None, apply_act, neg_slope).astype(o_ref.dtype)


def pallas_matmul(x, w, b=None, *, apply_act=False, neg_slope=0.01,
                  tm=256, tn=1024):
    """y = act(x @ w + b) on the MXU (bf16 operands, f32 accumulate).

    x: (M, K) any float dtype.  w: (Kw, N) with Kw >= K; rows K..Kw must be
    zero (prep-time K padding).  b: (N,) f32 or None.  Output: (M, N) f32.
    K is small for every layer of this model, so it is kept as a single
    full-K block: no reduction grid axis, no accumulator scratch.
    """
    M, K = x.shape
    Kw, N = w.shape
    assert Kw >= K, (Kw, K)

    Kp = _round_up(Kw, 128)
    tm = min(tm, _round_up(M, 16))
    tn = min(tn, _round_up(N, 128))
    Mp = _round_up(M, tm)
    Np = _round_up(N, tn)

    xp = x.astype(jnp.bfloat16)
    if (Mp, Kp) != (M, K):
        xp = jnp.pad(xp, ((0, Mp - M), (0, Kp - K)))
    wp = w.astype(jnp.bfloat16)
    if (Kp, Np) != (Kw, N):
        wp = jnp.pad(wp, ((0, Kp - Kw), (0, Np - N)))

    args = [xp, wp]
    in_specs = [
        pl.BlockSpec((tm, Kp), lambda i, j: (i, 0)),
        pl.BlockSpec((Kp, tn), lambda i, j: (0, j)),
    ]
    if b is not None:
        bp = b.astype(jnp.float32).reshape(1, N)
        if Np != N:
            bp = jnp.pad(bp, ((0, 0), (0, Np - N)))
        args.append(bp)
        in_specs.append(pl.BlockSpec((1, tn), lambda i, j: (0, j)))
        kernel = functools.partial(_matmul_bias_kernel,
                                   apply_act=apply_act, neg_slope=neg_slope)
    else:
        kernel = functools.partial(_matmul_kernel,
                                   apply_act=apply_act, neg_slope=neg_slope)

    out = pl.pallas_call(
        kernel,
        out_shape=jax.ShapeDtypeStruct((Mp, Np), jnp.float32),
        grid_spec=pltpu.PrefetchScalarGridSpec(
            num_scalar_prefetch=0,
            grid=(Mp // tm, Np // tn),
            in_specs=in_specs,
            out_specs=pl.BlockSpec((tm, tn), lambda i, j: (i, j)),
        ),
        compiler_params=pltpu.CompilerParams(
            dimension_semantics=("parallel", "parallel"),
            vmem_limit_bytes=32 * 1024 * 1024),
    )(*args)

    if (Mp, Np) != (M, N):
        out = out[:M, :N]
    return out


# ----------------------------------------------------------------------------
# ConvTranspose2d = Pallas GEMM (no structural zeros) + col2im overlap-add.
# ----------------------------------------------------------------------------
def conv_transpose2d_col2im(x_nhwc, w_gemm, b, *, kh, kw, stride, padding,
                            apply_act, neg_slope=0.01):
    """x_nhwc: (B, H, W, Cin).  w_gemm: (Kp, Np) prepared GEMM weight whose
    true columns are ordered (ky, kx, cout).  b: (cout,) conv bias."""
    B, H, W, _ = x_nhwc.shape
    sh, sw = stride
    ph, pw = padding
    cout = b.shape[0]
    n_true = kh * kw * cout

    y = pallas_matmul(x_nhwc.reshape(B * H * W, -1), w_gemm)   # (B*H*W, Np) f32
    if y.shape[1] != n_true:
        y = y[:, :n_true]
    y = y.reshape(B, H, W, kh, kw, cout)

    # col2im overlap-add: buf[b, iy*sh+ky, ix*sw+kx, co] += y[b, iy, ix, ky, kx, co]
    # TODO(synk): overlap-add kept as (small) XLA glue; could be fused into a
    # Pallas scatter kernel if it ever dominates.
    hfull = (H - 1) * sh + kh
    wfull = (W - 1) * sw + kw
    buf = jnp.zeros((B, hfull, wfull, cout), jnp.float32)
    for ky in range(kh):
        for kx in range(kw):
            buf = buf.at[:, ky:ky + (H - 1) * sh + 1:sh,
                            kx:kx + (W - 1) * sw + 1:sw, :].add(y[:, :, :, ky, kx, :])

    hout = (H - 1) * sh - 2 * ph + kh
    wout = (W - 1) * sw - 2 * pw + kw
    out = buf[:, ph:ph + hout, pw:pw + wout, :] + b.reshape(1, 1, 1, cout)
    if apply_act:
        out = jnp.where(out >= 0.0, out, neg_slope * out)
    return out


# ----------------------------------------------------------------------------
# One-time parameter preparation (hoisted out of the per-forward path).
# ----------------------------------------------------------------------------
def prepare_params(params):
    c, h, w = SH

    def prep_fc(fw, fb):
        feat, n = fw.shape
        # permute columns (c,h,w) -> (h,w,c) so fc output reshapes directly to NHWC
        fw = fw.reshape(feat, c, h, w).transpose(0, 2, 3, 1).reshape(feat, n)
        fb = fb.reshape(c, h, w).transpose(1, 2, 0).reshape(n)
        kp = _round_up(feat, 128)
        fw = jnp.pad(fw, ((0, kp - feat), (0, 0)))
        return fw.astype(jnp.bfloat16), fb.astype(jnp.float32)

    def prep_deconv(wt):
        cin, cout, kh, kw = wt.shape
        n = kh * kw * cout
        wm = wt.transpose(0, 2, 3, 1).reshape(cin, n)        # columns = (ky, kx, co)
        wm = jnp.pad(wm, ((0, _round_up(cin, 128) - cin),
                          (0, _round_up(n, 128) - n)))
        return wm.astype(jnp.bfloat16)

    fc_w, fc_b = prep_fc(params["fc_w"], params["fc_b"])
    return {
        "fc_w": fc_w, "fc_b": fc_b,
        "d0_w": prep_deconv(params["d0_w"]), "d0_b": params["d0_b"].astype(jnp.float32),
        "d1_w": prep_deconv(params["d1_w"]), "d1_b": params["d1_b"].astype(jnp.float32),
        "d2_w": prep_deconv(params["d2_w"]), "d2_b": params["d2_b"].astype(jnp.float32),
        "pos_bias": params["pos_bias"].transpose(1, 2, 0).astype(jnp.float32),  # (H,W,ch)
    }


# ----------------------------------------------------------------------------
# small_deconvnet forward (NHWC internally, NCHW returned to match PyTorch)
# ----------------------------------------------------------------------------
def small_deconvnet_forward(features, prep, *, positional_bias=True,
                            neg_slope=0.01):
    B = features.shape[0]
    # fc: Linear(feat_dim, 64*8*8) + LeakyReLU fused into the Pallas GEMM.
    x = pallas_matmul(features, prep["fc_w"], prep["fc_b"],
                      apply_act=True, neg_slope=neg_slope)
    x = x.reshape(B, SH[1], SH[2], SH[0])                         # (B, 8, 8, 64)

    # deconv_0: ConvTranspose2d(64, 128, 4, stride 2, pad 1) + LeakyReLU
    x = conv_transpose2d_col2im(x, prep["d0_w"], prep["d0_b"], kh=4, kw=4,
                                stride=(2, 2), padding=(1, 1),
                                apply_act=True, neg_slope=neg_slope)  # (B,16,16,128)
    # deconv_1: ConvTranspose2d(128, 64, 8, stride 2, pad 3) + LeakyReLU
    x = conv_transpose2d_col2im(x, prep["d1_w"], prep["d1_b"], kh=8, kw=8,
                                stride=(2, 2), padding=(3, 3),
                                apply_act=True, neg_slope=neg_slope)  # (B,32,32,64)
    # deconv_2: ConvTranspose2d(64, ch, 7, stride 3, pad 2), no nonlinearity
    x = conv_transpose2d_col2im(x, prep["d2_w"], prep["d2_b"], kh=7, kw=7,
                                stride=(3, 3), padding=(2, 2),
                                apply_act=False)                      # (B,96,96,ch)

    x = x[:, 6:-6, 6:-6, :]
    assert x.shape[1:3] == (84, 84)
    if positional_bias:
        x = x + prep["pos_bias"][None]                               # NHWC bias
    return x.transpose(0, 3, 1, 2)                                   # NCHW


# ----------------------------------------------------------------------------
# deterministic parameter init (PyTorch layouts; xavier-ish weights, zero bias)
# ----------------------------------------------------------------------------
def _xavier(key, shape, fan_in, fan_out):
    limit = (6.0 / (fan_in + fan_out)) ** 0.5
    return jax.random.uniform(key, shape, jnp.float32, -limit, limit)


def init_params(key, feat_dim, ch, H, W):
    ks = jax.random.split(key, 4)
    prod_sh = SH[0] * SH[1] * SH[2]
    return {
        # fc weight stored as (feat_dim, 4096) == torch weight.T
        "fc_w": _xavier(ks[0], (feat_dim, prod_sh), feat_dim, prod_sh),
        "fc_b": jnp.zeros((prod_sh,), jnp.float32),
        # ConvTranspose2d weights in PyTorch layout (Cin, Cout, KH, KW)
        "d0_w": _xavier(ks[1], (64, 128, 4, 4), 128 * 16, 64 * 16),
        "d0_b": jnp.zeros((128,), jnp.float32),
        "d1_w": _xavier(ks[2], (128, 64, 8, 8), 64 * 64, 128 * 64),
        "d1_b": jnp.zeros((64,), jnp.float32),
        "d2_w": _xavier(ks[3], (64, ch, 7, 7), ch * 49, 64 * 49),
        "d2_b": jnp.zeros((ch,), jnp.float32),
        # positional bias parameter (ch, H, W), zero-initialized as in the module
        "pos_bias": jnp.zeros((ch, H, W), jnp.float32),
    }


if __name__ == "__main__":
    # ob_space.shape == (84, 84, ch): the forward asserts an 84x84 spatial output
    B, feat_dim, ch, H, W = 2, 32, 4, 84, 84

    key = jax.random.PRNGKey(0)
    k_feat, k_params = jax.random.split(key)
    features = jax.random.normal(k_feat, (B, feat_dim), jnp.float32)
    params = init_params(k_params, feat_dim, ch, H, W)

    prep = prepare_params(params)                 # hoisted, runs once
    fwd = jax.jit(small_deconvnet_forward)        # positional_bias=True default

    out = jax.block_until_ready(fwd(features, prep))
    assert out.shape == (B, ch, 84, 84), out.shape
    assert bool(jnp.all(jnp.isfinite(out)))
    print("KERNEL_OK")
</pallas_src>

<mosaic_0001>
module attributes {stable_mosaic.version = 11 : i64} {
  func.func @_matmul_bias_kernel(%arg0: i32, %arg1: i32, %arg2: memref<16x128xbf16, #tpu.memory_space<vmem>>, %arg3: memref<128x1024xbf16, #tpu.memory_space<vmem>>, %arg4: memref<1x1024xf32, #tpu.memory_space<vmem>>, %arg5: memref<16x1024xf32, #tpu.memory_space<vmem>>) attributes {dimension_semantics = [#tpu.dimension_semantics<parallel>, #tpu.dimension_semantics<parallel>], iteration_bounds = array<i64: 1, 4>, scalar_prefetch = 0 : i64, scratch_operands = 0 : i64, tpu.core_type = #tpu.core_type<tc>, window_params = [{transform_indices = @transform_0, window_bounds = array<i64: 16, 128>}, {transform_indices = @transform_1, window_bounds = array<i64: 128, 1024>}, {transform_indices = @transform_2, window_bounds = array<i64: 1, 1024>}, {transform_indices = @transform_3, window_bounds = array<i64: 16, 1024>}]} {
    %c0 = arith.constant 0 : index
    %c0_0 = arith.constant 0 : index
    %0 = vector.load %arg2[%c0, %c0_0] : memref<16x128xbf16, #tpu.memory_space<vmem>>, vector<16x128xbf16>
    %c0_1 = arith.constant 0 : index
    %c0_2 = arith.constant 0 : index
    %1 = vector.load %arg3[%c0_1, %c0_2] : memref<128x1024xbf16, #tpu.memory_space<vmem>>, vector<128x1024xbf16>
    %cst = arith.constant dense<0.000000e+00> : vector<16x1024xf32>
    %2 = tpu.matmul %0, %1, %cst {dimension_numbers = #tpu.dot_dimension_numbers<[1], [0], [0], [1], [0, 0, 1, 1], [], []>} : vector<16x128xbf16>, vector<128x1024xbf16>, vector<16x1024xf32> -> vector<16x1024xf32>
    %c0_3 = arith.constant 0 : index
    %c0_4 = arith.constant 0 : index
    %3 = vector.load %arg4[%c0_3, %c0_4] : memref<1x1024xf32, #tpu.memory_space<vmem>>, vector<1x1024xf32>
    %4 = vector.broadcast %3 : vector<1x1024xf32> to vector<16x1024xf32>
    %5 = arith.addf %2, %4 : vector<16x1024xf32>
    %cst_5 = arith.constant 0.000000e+00 : f32
    %6 = vector.broadcast %cst_5 : f32 to vector<16x1024xf32>
    %7 = arith.cmpf oge, %5, %6 : vector<16x1024xf32>
    %cst_6 = arith.constant 1.000000e+00 : f32
    %8 = vector.broadcast %cst_6 : f32 to vector<16x1024xf32>
    %9 = arith.mulf %5, %8 : vector<16x1024xf32>
    %cst_7 = arith.constant 0.00999999977 : f32
    %10 = vector.broadcast %cst_7 : f32 to vector<16x1024xf32>
    %11 = arith.mulf %5, %10 : vector<16x1024xf32>
    %12 = arith.select %7, %9, %11 : vector<16x1024xi1>, vector<16x1024xf32>
    %c0_8 = arith.constant 0 : index
    %c0_9 = arith.constant 0 : index
    %13 = vector.load %arg5[%c0_8, %c0_9] : memref<16x1024xf32, #tpu.memory_space<vmem>>, vector<16x1024xf32>
    tpu.vector_store %arg5[%c0_8, %c0_9], %12 {strides = array<i32>} : memref<16x1024xf32, #tpu.memory_space<vmem>>, vector<16x1024xf32>,
    return
  }
  func.func @transform_0(%arg0: i32, %arg1: i32) -> (i32, i32) {
    %c0_i32 = arith.constant 0 : i32
    %c0_i32_0 = arith.constant 0 : i32
    return %arg0, %c0_i32 : i32, i32
  }
  func.func @transform_1(%arg0: i32, %arg1: i32) -> (i32, i32) {
    %c0_i32 = arith.constant 0 : i32
    %c0_i32_0 = arith.constant 0 : i32
    return %c0_i32, %arg1 : i32, i32
  }
  func.func @transform_2(%arg0: i32, %arg1: i32) -> (i32, i32) {
    %c0_i32 = arith.constant 0 : i32
    %c0_i32_0 = arith.constant 0 : i32
    return %c0_i32, %arg1 : i32, i32
  }
  func.func @transform_3(%arg0: i32, %arg1: i32) -> (i32, i32) {
    %c0_i32 = arith.constant 0 : i32
    return %arg0, %arg1 : i32, i32
  }
}

module attributes {stable_mosaic.version = 11 : i64} {
  func.func @_matmul_kernel(%arg0: i32, %arg1: i32, %arg2: memref<128x128xbf16, #tpu.memory_space<vmem>>, %arg3: memref<128x1024xbf16, #tpu.memory_space<vmem>>, %arg4: memref<128x1024xf32, #tpu.memory_space<vmem>>) attributes {dimension_semantics = [#tpu.dimension_semantics<parallel>, #tpu.dimension_semantics<parallel>], iteration_bounds = array<i64: 1, 2>, scalar_prefetch = 0 : i64, scratch_operands = 0 : i64, tpu.core_type = #tpu.core_type<tc>, window_params = [{transform_indices = @transform_0, window_bounds = array<i64: 128, 128>}, {transform_indices = @transform_1, window_bounds = array<i64: 128, 1024>}, {transform_indices = @transform_2, window_bounds = array<i64: 128, 1024>}]} {
    %c0 = arith.constant 0 : index
    %c0_0 = arith.constant 0 : index
    %0 = vector.load %arg2[%c0, %c0_0] : memref<128x128xbf16, #tpu.memory_space<vmem>>, vector<128x128xbf16>
    %c0_1 = arith.constant 0 : index
    %c0_2 = arith.constant 0 : index
    %1 = vector.load %arg3[%c0_1, %c0_2] : memref<128x1024xbf16, #tpu.memory_space<vmem>>, vector<128x1024xbf16>
    %cst = arith.constant dense<0.000000e+00> : vector<128x1024xf32>
    %2 = tpu.matmul %0, %1, %cst {dimension_numbers = #tpu.dot_dimension_numbers<[1], [0], [0], [1], [0, 0, 1, 1], [], []>} : vector<128x128xbf16>, vector<128x1024xbf16>, vector<128x1024xf32> -> vector<128x1024xf32>
    %c0_3 = arith.constant 0 : index
    %c0_4 = arith.constant 0 : index
    %3 = vector.load %arg4[%c0_3, %c0_4] : memref<128x1024xf32, #tpu.memory_space<vmem>>, vector<128x1024xf32>
    tpu.vector_store %arg4[%c0_3, %c0_4], %2 {strides = array<i32>} : memref<128x1024xf32, #tpu.memory_space<vmem>>, vector<128x1024xf32>,
    return
  }
  func.func @transform_0(%arg0: i32, %arg1: i32) -> (i32, i32) {
    %c0_i32 = arith.constant 0 : i32
    %c0_i32_0 = arith.constant 0 : i32
    return %arg0, %c0_i32 : i32, i32
  }
  func.func @transform_1(%arg0: i32, %arg1: i32) -> (i32, i32) {
    %c0_i32 = arith.constant 0 : i32
    %c0_i32_0 = arith.constant 0 : i32
    return %c0_i32, %arg1 : i32, i32
  }
  func.func @transform_2(%arg0: i32, %arg1: i32) -> (i32, i32) {
    %c0_i32 = arith.constant 0 : i32
    return %arg0, %arg1 : i32, i32
  }
}

module attributes {stable_mosaic.version = 11 : i64} {
  func.func @_matmul_kernel(%arg0: i32, %arg1: i32, %arg2: memref<256x128xbf16, #tpu.memory_space<vmem>>, %arg3: memref<128x1024xbf16, #tpu.memory_space<vmem>>, %arg4: memref<256x1024xf32, #tpu.memory_space<vmem>>) attributes {dimension_semantics = [#tpu.dimension_semantics<parallel>, #tpu.dimension_semantics<parallel>], iteration_bounds = array<i64: 2, 4>, scalar_prefetch = 0 : i64, scratch_operands = 0 : i64, tpu.core_type = #tpu.core_type<tc>, window_params = [{transform_indices = @transform_0, window_bounds = array<i64: 256, 128>}, {transform_indices = @transform_1, window_bounds = array<i64: 128, 1024>}, {transform_indices = @transform_2, window_bounds = array<i64: 256, 1024>}]} {
    %c0 = arith.constant 0 : index
    %c0_0 = arith.constant 0 : index
    %0 = vector.load %arg2[%c0, %c0_0] : memref<256x128xbf16, #tpu.memory_space<vmem>>, vector<256x128xbf16>
    %c0_1 = arith.constant 0 : index
    %c0_2 = arith.constant 0 : index
    %1 = vector.load %arg3[%c0_1, %c0_2] : memref<128x1024xbf16, #tpu.memory_space<vmem>>, vector<128x1024xbf16>
    %cst = arith.constant dense<0.000000e+00> : vector<256x1024xf32>
    %2 = tpu.matmul %0, %1, %cst {dimension_numbers = #tpu.dot_dimension_numbers<[1], [0], [0], [1], [0, 0, 1, 1], [], []>} : vector<256x128xbf16>, vector<128x1024xbf16>, vector<256x1024xf32> -> vector<256x1024xf32>
    %c0_3 = arith.constant 0 : index
    %c0_4 = arith.constant 0 : index
    %3 = vector.load %arg4[%c0_3, %c0_4] : memref<256x1024xf32, #tpu.memory_space<vmem>>, vector<256x1024xf32>
    tpu.vector_store %arg4[%c0_3, %c0_4], %2 {strides = array<i32>} : memref<256x1024xf32, #tpu.memory_space<vmem>>, vector<256x1024xf32>,
    return
  }
  func.func @transform_0(%arg0: i32, %arg1: i32) -> (i32, i32) {
    %c0_i32 = arith.constant 0 : i32
    %c0_i32_0 = arith.constant 0 : i32
    return %arg0, %c0_i32 : i32, i32
  }
  func.func @transform_1(%arg0: i32, %arg1: i32) -> (i32, i32) {
    %c0_i32 = arith.constant 0 : i32
    %c0_i32_0 = arith.constant 0 : i32
    return %c0_i32, %arg1 : i32, i32
  }
  func.func @transform_2(%arg0: i32, %arg1: i32) -> (i32, i32) {
    %c0_i32 = arith.constant 0 : i32
    return %arg0, %arg1 : i32, i32
  }
}

module attributes {stable_mosaic.version = 11 : i64} {
  func.func @_matmul_kernel(%arg0: i32, %arg1: i32, %arg2: memref<256x128xbf16, #tpu.memory_space<vmem>>, %arg3: memref<128x256xbf16, #tpu.memory_space<vmem>>, %arg4: memref<256x256xf32, #tpu.memory_space<vmem>>) attributes {dimension_semantics = [#tpu.dimension_semantics<parallel>, #tpu.dimension_semantics<parallel>], iteration_bounds = array<i64: 8, 1>, scalar_prefetch = 0 : i64, scratch_operands = 0 : i64, tpu.core_type = #tpu.core_type<tc>, window_params = [{transform_indices = @transform_0, window_bounds = array<i64: 256, 128>}, {transform_indices = @transform_1, window_bounds = array<i64: 128, 256>}, {transform_indices = @transform_2, window_bounds = array<i64: 256, 256>}]} {
    %c0 = arith.constant 0 : index
    %c0_0 = arith.constant 0 : index
    %0 = vector.load %arg2[%c0, %c0_0] : memref<256x128xbf16, #tpu.memory_space<vmem>>, vector<256x128xbf16>
    %c0_1 = arith.constant 0 : index
    %c0_2 = arith.constant 0 : index
    %1 = vector.load %arg3[%c0_1, %c0_2] : memref<128x256xbf16, #tpu.memory_space<vmem>>, vector<128x256xbf16>
    %cst = arith.constant dense<0.000000e+00> : vector<256x256xf32>
    %2 = tpu.matmul %0, %1, %cst {dimension_numbers = #tpu.dot_dimension_numbers<[1], [0], [0], [1], [0, 0, 1, 1], [], []>} : vector<256x128xbf16>, vector<128x256xbf16>, vector<256x256xf32> -> vector<256x256xf32>
    %c0_3 = arith.constant 0 : index
    %c0_4 = arith.constant 0 : index
    %3 = vector.load %arg4[%c0_3, %c0_4] : memref<256x256xf32, #tpu.memory_space<vmem>>, vector<256x256xf32>
    tpu.vector_store %arg4[%c0_3, %c0_4], %2 {strides = array<i32>} : memref<256x256xf32, #tpu.memory_space<vmem>>, vector<256x256xf32>,
    return
  }
  func.func @transform_0(%arg0: i32, %arg1: i32) -> (i32, i32) {
    %c0_i32 = arith.constant 0 : i32
    %c0_i32_0 = arith.constant 0 : i32
    return %arg0, %c0_i32 : i32, i32
  }
  func.func @transform_1(%arg0: i32, %arg1: i32) -> (i32, i32) {
    %c0_i32 = arith.constant 0 : i32
    %c0_i32_0 = arith.constant 0 : i32
    return %c0_i32, %arg1 : i32, i32
  }
  func.func @transform_2(%arg0: i32, %arg1: i32) -> (i32, i32) {
    %c0_i32 = arith.constant 0 : i32
    return %arg0, %arg1 : i32, i32
  }
}

</mosaic_0001>

<bundles_post_ra>
// kernel: small_deconvnet_forward.4
= control target key start
LH: loop header
LB: loop body
LE: loop exit
PB: predicated region body
PF: predicated region fallthrough
CT: control target
= control target key end

     0   :  { %8 = vsyncpa [#allocation3], 0  ;;  %s1714_s0 = inlined_call_operand.vmem [shape: bf16[16,128], index: 0, kind: input, shape index: {}]   ;;  %s1715_s1 = inlined_call_operand.hbm [shape: bf16[128,4096], index: 1, kind: input, shape index: {}]   ;;  %s1716_s2 = inlined_call_operand.hbm [shape: f32[1,4096], index: 2, kind: input, shape index: {}]   ;;  %s1717_s3 = inlined_call_operand.vmem [shape: f32[16,4096], index: 3, kind: output, shape index: {}]  }
   0x1   :  { %10 = vsyncpa [#allocation3 + $0x1], 0 }
   0x2   :  { %11 = vsyncpa [#allocation5], 0 }
   0x3   :  { %13 = vsyncpa [#allocation5 + $0x1], 0  ;;  %s1400_s12 = smov 0   ;;  %s1402_s13 = smov 0  }
   0x4   :  { %s1404_s14 = smov 0   ;;  %s1406_s15 = smov 0  }
   0x5   :  { %s1408_s16 = smov 0   ;;  %s1410_s17 = smov 0  }
   0x6 LB: > { %s1105_s18 = sadd.s32 4294967295, %s1372_s17   ;;  %s28_s19 = sadd.s32 1, %s1368_s16  ;;  %s1372_s17 = sphi %s1410_s17, %s19_s17   ;;  %s1368_s16 = sphi %s1408_s16, %s1732_s16   ;;  %s1364_s15 = sphi %s1406_s15, %s1731_s15   ;;  %s1360_s14 = sphi %s1404_s14, %s1730_s14   ;;  %s1356_s13 = sphi %s1402_s13, %s1729_s13   ;;  %s1352_s12 = sphi %s1400_s12, %s1728_s12  }
   0x7   : > { %p29_p0 = scmp.ge.s32.totalorder %s28_s19, 4  ;;  %s64_s20 = sadd.s32 1, %s1360_s14 }
   0x8   : > { %p71_p1 = scmp.ne.s32.totalorder %s1360_s14, %s1356_s13  ;;  %p72_p2 = scmp.eq.s32.totalorder %s1372_s17, 0 }
   0x9   : > { %s1734_s19 = smov (%p29_p0, %s28_s19), 0  ;;  %p77_p4 = scmp.ne.s32.totalorder %s1356_s13, %s1352_s12 }
   0xa   : > { %p1436_p3 = por %p72_p2, %p71_p1  ;;  %s61_s22 = ssub.s32 %s1368_s16, %s1734_s19 }
   0xb   : > { %p78_p5 = scmp.eq.s32.totalorder %s1105_s18, 0  ;;  %p62_p6 = scmp.eq.s32.totalorder %s61_s22, 0 }
   0xc   : > { %p129_p7 = scmp.eq.s32.totalorder %s1105_s18, 3  ;;  %p1204_p10 = scmp.lt.s32.totalorder %s1372_s17, 4 }
   0xd   : > { %p1443_p8 = por %p78_p5, %p77_p4  ;;  %s1456_s26 = sand.u32 1, %s1360_s14  }
   0xe   : > { %s1448_s24 = scalar_select %p62_p6, %s1360_s14, %s64_s20  }
   0xf   : > { %s1720_s23 = scalar_select %p1443_p8, 1, 0 }
  0x10   : > { %p1450_p9 = por %p129_p7, %p71_p1  ;;  %s1190_s27 = sshll.u32 %s1368_s16, 9 }
  0x11   : > { %s1110_s28 = sshll.u32 %s1456_s26, 9  ;;  %s1463_s4 = scalar_lea.hbm %s1715_s1, %s1190_s27 }
  0x12   : > { %s1721_s25 = scalar_select %p1450_p9, 1, 0 }
  0x13   : > { %s168_s5 = scalar_lea.vmem [#allocation2], %s1110_s28  ;;  %p1467_p11 = pnand %p1204_p10, %p1436_p3 }
  0x14   : > { %s175_s6 = sshll.u32 %s168_s5, 4  ;;  %s165_s8 = scalar_lea.sflag [#allocation3], %s1456_s26  ;;  %s1471_s6 = int_to_ptr.vmem [resolvable:$true] %s175_s6 }
  0x15   : > { %s1258_s9 = scalar_lea.hbm %s1463_s4, 8192  ;;  %p1260_p0 = pneg %p1467_p11 }
  0x16   : > { %p1259_p13 = scmp.ne.s32.totalorder %s1463_s4, %s1258_s9  ;;  %s1263_s12 = scalar_lea.hbm %s1715_s1, 32768 }
  0x17   : > { %p1264_p3 = scmp.lt.u32.totalorder %s1463_s4, %s1715_s1  ;;  %p1265_p4 = scmp.lt.u32.totalorder %s1263_s12, %s1258_s9 }
  0x18   : > { %p1261_p1 = pnand %p1260_p0, %p1259_p13  ;;  %p1267_p6 = scmp.lt.u32.totalorder %s1258_s9, %s1463_s4 }
  0x19   : > { %p1266_p5 = por %p1265_p4, %p1264_p3 }
  0x1a   : > { %p1262_p2 = pneg %p1261_p1 }
  0x1b   : > { %p1268_p7 = por %p1267_p6, %p1266_p5 }
  0x1d   : > { %p1269_p10 = pnand %p1268_p7, %p1262_p2 }
  0x1f   : > { %1272 = shalt.err (!%p1269_p10)
}
  0x20   : > { %s1273_s21 = scalar_lea.vmem %s1471_s6, 8192  ;;  %s1374_s22 = smov [#allocation2]  }
  0x21   : > { %p1274_p13 = scmp.ne.s32.totalorder %s1471_s6, %s1273_s21  ;;  %s1278_s27 = sshll.u32 %s1374_s22, 4  ;;  %s1279_s27 = int_to_ptr.vmem [resolvable:$false] %s1278_s27 }
  0x22   : > { %s1280_s28 = scalar_lea.vmem %s1279_s27, 16384  ;;  %p1281_p9 = scmp.lt.s32.totalorder %s1471_s6, %s1279_s27 }
  0x23   : > { %p1276_p1 = pnand %p1274_p13, %p1260_p0  ;;  %p1282_p3 = scmp.lt.s32.totalorder %s1280_s28, %s1273_s21 }
  0x25   : > { %p1277_p12 = pneg %p1276_p1  ;;  %p1283_p4 = por %p1282_p3, %p1281_p9 }
  0x27   : > { %p1284_p5 = pnand %p1283_p4, %p1277_p12 }
  0x29   : > { %1287 = shalt.err (!%p1284_p5)
}
  0x2a   : > { %s1375_s29 = smov 2048   ;;  %s1376_s30 = smov 512  }
  0x2b   : > { %s1377_s5 = smov 32   ;;  %p202_p2 = scmp.lt.s32.totalorder %s1372_s17, 5 }
  0x2c   : > { %1200 = dma.hbm_to_vmem [thread:$0]  (!%p1467_p11), %s1463_s4, 8192, %s1471_s6, %s165_s8, %s1375_s29, %s1376_s30, %s1377_s5  }
  0x2d   : > { %s1113_s9 = sshll.u32 %s1456_s26, 3  ;;  %s1191_s10 = sshll.u32 %s1368_s16, 7 }
  0x2e   : > { %p1723_p9 = scmp.ge.s32.totalorder %s1372_s17, 1  ;;  %s1514_s20 = scalar_lea.hbm %s1716_s2, %s1191_s10 }
  0x2f   : > { %s189_s21 = scalar_lea.vmem [#allocation4], %s1113_s9  ;;  %s186_s4 = scalar_lea.sflag [#allocation5], %s1456_s26 }
  0x30   : > { %p1507_p12 = pnand %p1723_p9, %p202_p2  ;;  %s197_s22 = sshll.u32 %s189_s21, 4  ;;  %s198_s22 = int_to_ptr.vmem [resolvable:$true] %s197_s22 }
  0x31   : > { %s1288_s6 = scalar_lea.hbm %s1514_s20, 128  ;;  %s1293_s28 = scalar_lea.hbm %s1716_s2, 512 }
  0x32   : > { %s1724_s11 = scalar_select %p1507_p12, 1, 0 }
  0x33   : > { %p1289_p6 = scmp.ne.s32.totalorder %s1514_s20, %s1288_s6  ;;  %p1294_p13 = scmp.lt.u32.totalorder %s1514_s20, %s1716_s2 }
  0x34   : > { %p1295_p1 = scmp.lt.u32.totalorder %s1293_s28, %s1288_s6  ;;  %p1297_p4 = scmp.lt.u32.totalorder %s1288_s6, %s1514_s20 }
  0x35   : > { %p1291_p7 = pnand %p1289_p6, %p1260_p0 }
  0x36   : > { %p1296_p3 = por %p1295_p1, %p1294_p13 }
  0x37   : > { %p1292_p10 = pneg %p1291_p7 }
  0x38   : > { %p1298_p5 = por %p1297_p4, %p1296_p3 }
  0x3a   : > { %p1299_p2 = pnand %p1298_p5, %p1292_p10 }
  0x3c   : > { %1302 = shalt.err (!%p1299_p2)
}
  0x3d   : > { %s1303_s26 = scalar_lea.vmem %s198_s22, 128  ;;  %s1378_s5 = smov [#allocation4]  }
  0x3e   : > { %p1304_p9 = scmp.ne.s32.totalorder %s198_s22, %s1303_s26  ;;  %s1308_s9 = sshll.u32 %s1378_s5, 4  ;;  %s1309_s9 = int_to_ptr.vmem [resolvable:$false] %s1308_s9 }
  0x3f   : > { %s1310_s10 = scalar_lea.vmem %s1309_s9, 256  ;;  %p1311_p8 = scmp.lt.s32.totalorder %s198_s22, %s1309_s9 }
  0x40   : > { %p1306_p6 = pnand %p1304_p9, %p1260_p0  ;;  %p1312_p12 = scmp.lt.s32.totalorder %s1310_s10, %s1303_s26 }
  0x42   : > { %p1307_p7 = pneg %p1306_p6  ;;  %p1313_p1 = por %p1312_p12, %p1311_p8 }
  0x44   : > { %p1314_p13 = pnand %p1313_p1, %p1307_p7 }
  0x46   : > { %1317 = shalt.err (!%p1314_p13)
}
  0x47   : > { %1203 = dma.hbm_to_vmem [thread:$0]  (!%p1467_p11), %s1514_s20, 128, %s198_s22, %s186_s4  }
  0x48   : > { %p1725_p10 = scmp.ne.s32.totalorder %s1724_s11, 0 }
  0x49   : > { %s1539_s12 = sand.u32 (!%p1725_p10), 1, %s1356_s13   ;;  %p1726_p8 = scmp.ne.s32.totalorder (!%p1725_p10), %s1720_s23, 0 }
  0x4a   : > { %206 = sbr.rel (%p1725_p10) target bundleno = 385 (0x181), region = 32  ;;  %s1117_s18 = sshll.u32 (!%p1725_p10), %s1539_s12, 9 }
  0x4b   : > { %s209_s21 = scalar_lea.sflag (!%p1725_p10), [#allocation3], %s1539_s12  ;;  %s1543_s6 = scalar_lea.vmem (!%p1725_p10), [#allocation2], %s1117_s18 }
  0x51   : > { %1343 = dma.done.wait (%p1726_p8), %s209_s21, 8192  }
  0x52   : > { %1345 = vsyncadd (%p1726_p8), %s209_s21, 4294959104  ;;  %s1118_s7 = sshll.u32 %s1539_s12, 3  ;;  %s218_s11 = scalar_lea.sflag [#allocation5], %s1539_s12 }
  0x53   : > { %s1551_s20 = scalar_lea.vmem [#allocation4], %s1118_s7 }
  0x54   : > { %1347 = dma.done.wait (%p1726_p8), %s218_s11, 128  }
  0x55   : > { %1349 = vsyncadd (%p1726_p8), %s218_s11, 4294967168  ;;  %v1379_v0 = vmov 0   ;;  %v266_v1 = vld [vmem:[%s1543_s6] sm:$0xff]  ;;  %v267_v3 = vld [vmem:[%s1543_s6 + $0x8] sm:$0xff]  ;;  %s1119_s4 = sshll.u32 %s1539_s12, 7  ;;  %p1727_p11 = scmp.ne.s32.totalorder %s1721_s25, 0 }
  0x56   : > { %730 = vmatprep.mubr.bf16.mxu0 %v1379_v0  ;;  %773 = vmatprep.mubr.bf16.mxu1 %v1379_v0  ;;  %v270_v2 = vld [vmem:[%s1543_s6 + $0x20] sm:$0xff]  ;;  %v271_v5 = vld [vmem:[%s1543_s6 + $0x28] sm:$0xff]  ;;  %v268_v63 = vld [vmem:[%s1543_s6 + $0x10] sm:$0xff]  ;;  %s1648_s8 = scalar_lea.vmem [#allocation6], %s1119_s4  ;;  %s1192_s27 = sshll.u32 (%p1727_p11), %s1364_s15, 6 }
  0x57   : > { %v1122_v4 = vcombine.high %v266_v1, %v270_v2  ;;  %v1121_v6 = vcombine.low %v266_v1, %v270_v2  ;;  %v274_v7 = vld [vmem:[%s1543_s6 + $0x40] sm:$0xff]  ;;  %v1124_v9 = vcombine.high %v267_v3, %v271_v5  ;;  %v1123_v10 = vcombine.low %v267_v3, %v271_v5  ;;  %v275_v12 = vld [vmem:[%s1543_s6 + $0x48] sm:$0xff]  ;;  %v272_v1 = vld [vmem:[%s1543_s6 + $0x30] sm:$0xff]  ;;  %s946_s30 = scalar_lea.vmem (%p1727_p11), %s1717_s3, %s1192_s27 }
  0x58   : > { %v278_v8 = vld [vmem:[%s1543_s6 + $0x60] sm:$0xff]  ;;  %v279_v13 = vld [vmem:[%s1543_s6 + $0x68] sm:$0xff]  ;;  %v269_v2 = vld [vmem:[%s1543_s6 + $0x18] sm:$0xff] }
  0x59   : > { %v1130_v11 = vcombine.high %v274_v7, %v278_v8  ;;  %v282_v14 = vld [vmem:[%s1543_s6 + $0x80] sm:$0xff]  ;;  %698 = vmatprep.subr.bf16.mxu0 %v1122_v4  ;;  %v1132_v15 = vcombine.high %v275_v12, %v279_v13  ;;  %v283_v17 = vld [vmem:[%s1543_s6 + $0x88] sm:$0xff]  ;;  %741 = vmatprep.subr.bf16.mxu1 %v1124_v9  ;;  %v1129_v19 = vcombine.low %v274_v7, %v278_v8  ;;  %v273_v3 = vld [vmem:[%s1543_s6 + $0x38] sm:$0xff] }
  0x5a   : > { %v286_v16 = vld [vmem:[%s1543_s6 + $0xa0] sm:$0xff]  ;;  %v287_v18 = vld [vmem:[%s1543_s6 + $0xa8] sm:$0xff]  ;;  %699 = vmatpush1.bf16.msra.mxu0 %v1121_v6  ;;  %742 = vmatpush1.bf16.msra.mxu1 %v1123_v10  ;;  %v1131_v20 = vcombine.low %v275_v12, %v279_v13  ;;  %v1126_v6 = vcombine.high %v268_v63, %v272_v1  ;;  %v1128_v7 = vcombine.high %v269_v2, %v273_v3  ;;  %v276_v8 = vld [vmem:[%s1543_s6 + $0x50] sm:$0xff] }
  0x5b   : > { %700 = vmatprep.subr.bf16.mxu0 %v1130_v11  ;;  %v1138_v21 = vcombine.high %v282_v14, %v286_v16  ;;  %743 = vmatprep.subr.bf16.mxu1 %v1132_v15  ;;  %v1140_v22 = vcombine.high %v283_v17, %v287_v18  ;;  %v290_v23 = vld [vmem:[%s1543_s6 + $0xc0] sm:$0xff]  ;;  %v291_v25 = vld [vmem:[%s1543_s6 + $0xc8] sm:$0xff]  ;;  %v1137_v27 = vcombine.low %v282_v14, %v286_v16  ;;  %v280_v9 = vld [vmem:[%s1543_s6 + $0x70] sm:$0xff] }
  0x5c   : > { %v294_v24 = vld [vmem:[%s1543_s6 + $0xe0] sm:$0xff]  ;;  %v295_v26 = vld [vmem:[%s1543_s6 + $0xe8] sm:$0xff]  ;;  %v1139_v28 = vcombine.low %v283_v17, %v287_v18  ;;  %v277_v11 = vld [vmem:[%s1543_s6 + $0x58] sm:$0xff]  ;;  %v1125_v13 = vcombine.low %v268_v63, %v272_v1  ;;  %v1127_v14 = vcombine.low %v269_v2, %v273_v3  ;;  %v1134_v15 = vcombine.high %v276_v8, %v280_v9 }
  0x5d   : > { %v1146_v29 = vcombine.high %v290_v23, %v294_v24  ;;  %v1148_v30 = vcombine.high %v291_v25, %v295_v26  ;;  %v298_v31 = vld [vmem:[%s1543_s6 + $0x100] sm:$0xff]  ;;  %v299_v33 = vld [vmem:[%s1543_s6 + $0x108] sm:$0xff]  ;;  %v1145_v35 = vcombine.low %v290_v23, %v294_v24  ;;  %v1147_v36 = vcombine.low %v291_v25, %v295_v26  ;;  %v281_v12 = vld [vmem:[%s1543_s6 + $0x78] sm:$0xff] }
  0x5e   : > { %701 = vmatpush1.bf16.msra.mxu0 %v1129_v19  ;;  %744 = vmatpush1.bf16.msra.mxu1 %v1131_v20  ;;  %v302_v32 = vld [vmem:[%s1543_s6 + $0x120] sm:$0xff]  ;;  %v303_v34 = vld [vmem:[%s1543_s6 + $0x128] sm:$0xff]  ;;  %v1136_v16 = vcombine.high %v277_v11, %v281_v12  ;;  %v284_v17 = vld [vmem:[%s1543_s6 + $0x90] sm:$0xff]  ;;  %v332_v3 = vlaneseq }
  0x5f   : > { %702 = vmatprep.subr.bf16.mxu0 %v1138_v21  ;;  %745 = vmatprep.subr.bf16.mxu1 %v1140_v22  ;;  %v1154_v37 = vcombine.high %v298_v31, %v302_v32  ;;  %v1156_v38 = vcombine.high %v299_v33, %v303_v34  ;;  %v306_v39 = vld [vmem:[%s1543_s6 + $0x140] sm:$0xff]  ;;  %v307_v41 = vld [vmem:[%s1543_s6 + $0x148] sm:$0xff]  ;;  %v1153_v43 = vcombine.low %v298_v31, %v302_v32  ;;  %v288_v18 = vld [vmem:[%s1543_s6 + $0xb0] sm:$0xff] }
  0x60   : > { %v310_v40 = vld [vmem:[%s1543_s6 + $0x160] sm:$0xff]  ;;  %v311_v42 = vld [vmem:[%s1543_s6 + $0x168] sm:$0xff]  ;;  %v1155_v44 = vcombine.low %v299_v33, %v303_v34  ;;  %v285_v19 = vld [vmem:[%s1543_s6 + $0x98] sm:$0xff]  ;;  %v1133_v21 = vcombine.low %v276_v8, %v280_v9  ;;  %v1135_v22 = vcombine.low %v277_v11, %v281_v12  ;;  %v1142_v23 = vcombine.high %v284_v17, %v288_v18 }
  0x61   : > { %v1162_v45 = vcombine.high %v306_v39, %v310_v40  ;;  %v1164_v46 = vcombine.high %v307_v41, %v311_v42  ;;  %v314_v47 = vld [vmem:[%s1543_s6 + $0x180] sm:$0xff]  ;;  %v315_v49 = vld [vmem:[%s1543_s6 + $0x188] sm:$0xff]  ;;  %v1161_v51 = vcombine.low %v306_v39, %v310_v40  ;;  %v1163_v52 = vcombine.low %v307_v41, %v311_v42  ;;  %v289_v20 = vld [vmem:[%s1543_s6 + $0xb8] sm:$0xff] }
  0x62   : > { %703 = vmatpush1.bf16.msra.mxu0 %v1137_v27  ;;  %746 = vmatpush1.bf16.msra.mxu1 %v1139_v28  ;;  %v318_v48 = vld [vmem:[%s1543_s6 + $0x1a0] sm:$0xff]  ;;  %v319_v50 = vld [vmem:[%s1543_s6 + $0x1a8] sm:$0xff]  ;;  %v1144_v24 = vcombine.high %v285_v19, %v289_v20  ;;  %v292_v25 = vld [vmem:[%s1543_s6 + $0xd0] sm:$0xff] }
  0x63   : > { %704 = vmatprep.subr.bf16.mxu0 %v1146_v29  ;;  %747 = vmatprep.subr.bf16.mxu1 %v1148_v30  ;;  %v1170_v53 = vcombine.high %v314_v47, %v318_v48  ;;  %v1172_v54 = vcombine.high %v315_v49, %v319_v50  ;;  %v322_v55 = vld [vmem:[%s1543_s6 + $0x1c0] sm:$0xff]  ;;  %v323_v57 = vld [vmem:[%s1543_s6 + $0x1c8] sm:$0xff]  ;;  %v1169_v59 = vcombine.low %v314_v47, %v318_v48  ;;  %v296_v26 = vld [vmem:[%s1543_s6 + $0xf0] sm:$0xff] }
  0x64   : > { %v326_v56 = vld [vmem:[%s1543_s6 + $0x1e0] sm:$0xff]  ;;  %v327_v58 = vld [vmem:[%s1543_s6 + $0x1e8] sm:$0xff]  ;;  %v1171_v60 = vcombine.low %v315_v49, %v319_v50  ;;  %v293_v27 = vld [vmem:[%s1543_s6 + $0xd8] sm:$0xff]  ;;  %v1141_v29 = vcombine.low %v284_v17, %v288_v18  ;;  %v1143_v30 = vcombine.low %v285_v19, %v289_v20  ;;  %v1150_v31 = vcombine.high %v292_v25, %v296_v26 }
  0x65   : > { %v1178_v61 = vcombine.high %v322_v55, %v326_v56  ;;  %v1180_v62 = vcombine.high %v323_v57, %v327_v58  ;;  %v1177_v4 = vcombine.low %v322_v55, %v326_v56  ;;  %v1179_v5 = vcombine.low %v323_v57, %v327_v58  ;;  %v1600_v10 = vld [vmem:[%s1714_s0] sm:$0xff]   ;;  %v297_v28 = vld [vmem:[%s1543_s6 + $0xf8] sm:$0xff]  ;;  %v300_v33 = vld [vmem:[%s1543_s6 + $0x110] sm:$0xff] }
  0x66   : > { %705 = vmatpush1.bf16.msra.mxu0 %v1145_v35  ;;  %748 = vmatpush1.bf16.msra.mxu1 %v1147_v36  ;;  %v1152_v32 = vcombine.high %v293_v27, %v297_v28  ;;  %v304_v34 = vld [vmem:[%s1543_s6 + $0x130] sm:$0xff]  ;;  %v301_v35 = vld [vmem:[%s1543_s6 + $0x118] sm:$0xff] }
  0x67   : > { %706 = vmatprep.subr.bf16.mxu0 %v1154_v37  ;;  %749 = vmatprep.subr.bf16.mxu1 %v1156_v38  ;;  %v305_v36 = vld [vmem:[%s1543_s6 + $0x138] sm:$0xff]  ;;  %v1149_v37 = vcombine.low %v292_v25, %v296_v26  ;;  %v1158_v38 = vcombine.high %v300_v33, %v304_v34  ;;  %v308_v40 = vld [vmem:[%s1543_s6 + $0x150] sm:$0xff] }
  0x68   : > { %v1160_v39 = vcombine.high %v301_v35, %v305_v36  ;;  %v312_v41 = vld [vmem:[%s1543_s6 + $0x170] sm:$0xff]  ;;  %v309_v42 = vld [vmem:[%s1543_s6 + $0x158] sm:$0xff] }
  0x69   : > { %v316_v48 = vld [vmem:[%s1543_s6 + $0x190] sm:$0xff]  ;;  %v317_v50 = vld [vmem:[%s1543_s6 + $0x198] sm:$0xff] }
  0x6a   : > { %707 = vmatpush1.bf16.msra.mxu0 %v1153_v43  ;;  %750 = vmatpush1.bf16.msra.mxu1 %v1155_v44  ;;  %v313_v43 = vld [vmem:[%s1543_s6 + $0x178] sm:$0xff]  ;;  %v1157_v44 = vcombine.low %v300_v33, %v304_v34  ;;  %v320_v49 = vld [vmem:[%s1543_s6 + $0x1b0] sm:$0xff] }
  0x6b   : > { %708 = vmatprep.subr.bf16.mxu0 %v1162_v45  ;;  %751 = vmatprep.subr.bf16.mxu1 %v1164_v46  ;;  %v1159_v45 = vcombine.low %v301_v35, %v305_v36  ;;  %v1166_v46 = vcombine.high %v308_v40, %v312_v41  ;;  %v1168_v47 = vcombine.high %v309_v42, %v313_v43  ;;  %v324_v56 = vld [vmem:[%s1543_s6 + $0x1d0] sm:$0xff]  ;;  %v325_v58 = vld [vmem:[%s1543_s6 + $0x1d8] sm:$0xff] }
  0x6c   : > { %v328_v57 = vld [vmem:[%s1543_s6 + $0x1f0] sm:$0xff] }
  0x6d   : > { %v1181_v1 = vcombine.low %v324_v56, %v328_v57 }
  0x6e   : > { %709 = vmatpush1.bf16.msra.mxu0 %v1161_v51  ;;  %752 = vmatpush1.bf16.msra.mxu1 %v1163_v52  ;;  %v321_v51 = vld [vmem:[%s1543_s6 + $0x1b8] sm:$0xff]  ;;  %v1165_v52 = vcombine.low %v308_v40, %v312_v41 }
  0x6f   : > { %710 = vmatprep.subr.bf16.mxu0 %v1170_v53  ;;  %753 = vmatprep.subr.bf16.mxu1 %v1172_v54  ;;  %v1167_v53 = vcombine.low %v309_v42, %v313_v43  ;;  %v1174_v54 = vcombine.high %v316_v48, %v320_v49  ;;  %v1176_v55 = vcombine.high %v317_v50, %v321_v51 }
  0x72   : > { %711 = vmatpush1.bf16.msra.mxu0 %v1169_v59  ;;  %754 = vmatpush1.bf16.msra.mxu1 %v1171_v60  ;;  %v329_v59 = vld [vmem:[%s1543_s6 + $0x1f8] sm:$0xff]  ;;  %v1173_v60 = vcombine.low %v316_v48, %v320_v49 }
  0x73   : > { %712 = vmatprep.subr.bf16.mxu0 %v1178_v61  ;;  %755 = vmatprep.subr.bf16.mxu1 %v1180_v62  ;;  %v1175_v61 = vcombine.low %v317_v50, %v321_v51  ;;  %v1182_v62 = vcombine.high %v324_v56, %v328_v57  ;;  %v1184_v63 = vcombine.high %v325_v58, %v329_v59 }
  0x74   : > { %v1183_v2 = vcombine.low %v325_v58, %v329_v59 }
  0x76   : > { %713 = vmatpush1.bf16.msra.mxu0 %v1177_v4  ;;  %756 = vmatpush1.bf16.msra.mxu1 %v1179_v5  ;;  %v1634_v4 = vshrl.u32 %v332_v3, 7 }
  0x77   : > { %784 = vmatprep.subr.bf16.mxu0 %v1126_v6  ;;  %827 = vmatprep.subr.bf16.mxu1 %v1128_v7  ;;  %v1638_v6 = vld [vmem:[%s1551_s20] sm:$0xff] }
  0x78   : > { %v334_v5 = vsub.s32 0, %v1634_v4  ;;  %v342_v7 = vsub.s32 2, %v1634_v4  ;;  %v338_v8 = vsub.s32 1, %v1634_v4  ;;  %v346_v9 = vsub.s32 3, %v1634_v4 }
  0x79   : > { %731 = vmatmul.mubr.bf16.vlgmr.msra.gmra.mrb[0].mxu0 %v1600_v10  ;;  %774 = vmatmul.mubr.bf16.vlgmr.msra.gmra.mrb[0].mxu1 %v1600_v10  ;;  %v362_v48 = vsub.s32 7, %v1634_v4 }
  0x7a   : > { %785 = vmatpush1.bf16.msra.mxu0 %v1125_v13  ;;  %828 = vmatpush1.bf16.msra.mxu1 %v1127_v14  ;;  %v335_v11 = vrot.slane %v1638_v6, %v334_v5  ;;  %v343_v12 = vrot.slane %v1638_v6, %v342_v7  ;;  %v339_v13 = vrot.slane %v1638_v6, %v338_v8 }
  0x7b   : > { %786 = vmatprep.subr.bf16.mxu0 %v1134_v15  ;;  %829 = vmatprep.subr.bf16.mxu1 %v1136_v16 }
  0x7c   : > { %816 = vmatprep.mubr.bf16.mxu0 %v1379_v0  ;;  %859 = vmatprep.mubr.bf16.mxu1 %v1379_v0  ;;  %v1151_v0 = vcombine.low %v293_v27, %v297_v28 }
  0x7e   : > { %787 = vmatpush1.bf16.msra.mxu0 %v1133_v21  ;;  %830 = vmatpush1.bf16.msra.mxu1 %v1135_v22 }
  0x7f   : > { %788 = vmatprep.subr.bf16.mxu0 %v1142_v23  ;;  %831 = vmatprep.subr.bf16.mxu1 %v1144_v24 }
  0x82   : > { %789 = vmatpush1.bf16.msra.mxu0 %v1141_v29  ;;  %832 = vmatpush1.bf16.msra.mxu1 %v1143_v30 }
  0x83   : > { %790 = vmatprep.subr.bf16.mxu0 %v1150_v31  ;;  %833 = vmatprep.subr.bf16.mxu1 %v1152_v32 }
  0x86   : > { %791 = vmatpush1.bf16.msra.mxu0 %v1149_v37  ;;  %834 = vmatpush1.bf16.msra.mxu1 %v1151_v0 }
  0x87   : > { %792 = vmatprep.subr.bf16.mxu0 %v1158_v38  ;;  %835 = vmatprep.subr.bf16.mxu1 %v1160_v39 }
  0x8a   : > { %793 = vmatpush1.bf16.msra.mxu0 %v1157_v44  ;;  %836 = vmatpush1.bf16.msra.mxu1 %v1159_v45  ;;  %v350_v45 = vsub.s32 4, %v1634_v4 }
  0x8b   : > { %794 = vmatprep.subr.bf16.mxu0 %v1166_v46  ;;  %837 = vmatprep.subr.bf16.mxu1 %v1168_v47  ;;  %v358_v46 = vsub.s32 6, %v1634_v4  ;;  %v354_v47 = vsub.s32 5, %v1634_v4 }
  0x8c   : > { %v351_v49 = vrot.slane %v1638_v6, %v350_v45 }
  0x8d   : > { %v359_v50 = vrot.slane %v1638_v6, %v358_v46  ;;  %v355_v51 = vrot.slane %v1638_v6, %v354_v47 }
  0x8e   : > { %795 = vmatpush1.bf16.msra.mxu0 %v1165_v52  ;;  %838 = vmatpush1.bf16.msra.mxu1 %v1167_v53  ;;  %v363_v52 = vrot.slane %v1638_v6, %v362_v48 }
  0x8f   : > { %796 = vmatprep.subr.bf16.mxu0 %v1174_v54  ;;  %839 = vmatprep.subr.bf16.mxu1 %v1176_v55 }
  0x92   : > { %797 = vmatpush1.bf16.msra.mxu0 %v1173_v60  ;;  %840 = vmatpush1.bf16.msra.mxu1 %v1175_v61 }
  0x93   : > { %798 = vmatprep.subr.bf16.mxu0 %v1182_v62  ;;  %841 = vmatprep.subr.bf16.mxu1 %v1184_v63 }
  0x96   : > { %799 = vmatpush1.bf16.msra.mxu0 %v1181_v1  ;;  %842 = vmatpush1.bf16.msra.mxu1 %v1183_v2 }
  0x99   : > { %817 = vmatmul.mubr.bf16.vlgmr.msra.gmra.mrb[4].mxu0 %v1600_v10  ;;  %860 = vmatmul.mubr.bf16.vlgmr.msra.gmra.mrb[4].mxu1 %v1600_v10  ;;  %v347_v10 = vrot.slane %v1638_v6, %v346_v9 }
 0x14c   : > { %v732_v14 = vpop.f32.mrb[0].mxu0  ;;  %v775_v16 = vpop.f32.mrb[0].mxu1 }
 0x14d   : > { %v733_v15 = vadd.f32 %v732_v14, %v335_v11  ;;  %v734_v17 = vpop.f32.mrb[1].mxu0  ;;  %v776_v18 = vadd.f32 %v775_v16, %v343_v12  ;;  %v777_v20 = vpop.f32.mrb[1].mxu1 }
 0x14e   : > { %v735_v19 = vadd.f32 %v734_v17, %v339_v13  ;;  %v736_v21 = vpop.f32.mrb[2].mxu0  ;;  %v778_v23 = vadd.f32 %v777_v20, %v347_v10  ;;  %v779_v25 = vpop.f32.mrb[2].mxu1 }
 0x14f   : > { %vm870_vm0 = vcmp.ge.f32.partialorder %v733_v15, 0.0  ;;  %v886_v22 = vmul.f32 0.01, %v733_v15  ;;  %v737_v24 = vadd.f32 %v736_v21, %v335_v11  ;;  %v738_v26 = vpop.f32.mrb[3].mxu0  ;;  %vm872_vm1 = vcmp.ge.f32.partialorder %v776_v18, 0.0  ;;  %v781_v31 = vpop.f32.mrb[3].mxu1 }
 0x150   : > { %v888_v27 = vmul.f32 0.01, %v776_v18  ;;  %vm871_vm2 = vcmp.ge.f32.partialorder %v735_v19, 0.0  ;;  %v887_v28 = vmul.f32 0.01, %v735_v19  ;;  %vm873_vm3 = vcmp.ge.f32.partialorder %v778_v23, 0.0 }
 0x151   : > { %v902_v29 = vsel %vm870_vm0, %v733_v15, %v886_v22  ;;  %v889_v30 = vmul.f32 0.01, %v778_v23  ;;  %vm878_vm4 = vcmp.ge.f32.partialorder %v737_v24, 0.0  ;;  %v894_v34 = vmul.f32 0.01, %v737_v24 }
 0x152   : > { %918 = vst [vmem:[%s1648_s8] sm:$0xff] %v902_v29  ;;  %v904_v32 = vsel %vm872_vm1, %v776_v18, %v888_v27  ;;  %v903_v33 = vsel %vm871_vm2, %v735_v19, %v887_v28  ;;  %v780_v35 = vadd.f32 %v779_v25, %v343_v12  ;;  %v739_v37 = vadd.f32 %v738_v26, %v339_v13 }
 0x153   : > { %920 = vst [vmem:[%s1648_s8 + $0x10] sm:$0xff] %v904_v32  ;;  %919 = vst [vmem:[%s1648_s8 + $0x8] sm:$0xff] %v903_v33  ;;  %v905_v36 = vsel %vm873_vm3, %v778_v23, %v889_v30  ;;  %v782_v0 = vadd.f32 %v781_v31, %v347_v10  ;;  %v910_v38 = vsel %vm878_vm4, %v737_v24, %v894_v34 }
 0x154   : > { %921 = vst [vmem:[%s1648_s8 + $0x18] sm:$0xff] %v905_v36  ;;  %vm880_vm5 = vcmp.ge.f32.partialorder %v780_v35, 0.0  ;;  %v896_v39 = vmul.f32 0.01, %v780_v35  ;;  %926 = vst [vmem:[%s1648_s8 + $0x40] sm:$0xff] %v910_v38  ;;  %vm879_vm6 = vcmp.ge.f32.partialorder %v739_v37, 0.0 }
 0x155   : > { %v895_v40 = vmul.f32 0.01, %v739_v37  ;;  %vm881_vm7 = vcmp.ge.f32.partialorder %v782_v0, 0.0  ;;  %v897_v41 = vmul.f32 0.01, %v782_v0 }
 0x156   : > { %v912_v42 = vsel %vm880_vm5, %v780_v35, %v896_v39 }
 0x157   : > { %928 = vst [vmem:[%s1648_s8 + $0x50] sm:$0xff] %v912_v42  ;;  %v911_v43 = vsel %vm879_vm6, %v739_v37, %v895_v40  ;;  %v913_v44 = vsel %vm881_vm7, %v782_v0, %v897_v41 }
 0x158   : > { %927 = vst [vmem:[%s1648_s8 + $0x48] sm:$0xff] %v911_v43  ;;  %929 = vst [vmem:[%s1648_s8 + $0x58] sm:$0xff] %v913_v44 }
 0x159   : > { %v959_v22 = vld [vmem:[%s1648_s8] sm:$0xff] (%p1727_p11) }
 0x15a   : > { %v961_v23 = vld [vmem:[%s1648_s8 + $0x8] sm:$0xff] (%p1727_p11)  ;;  %v963_v24 = vld [vmem:[%s1648_s8 + $0x10] sm:$0xff] (%p1727_p11)  ;;  %960 = vst [vmem:[%s946_s30] sm:$0xff] (%p1727_p11), %v959_v22 }
 0x15b   : > { %v965_v25 = vld [vmem:[%s1648_s8 + $0x18] sm:$0xff] (%p1727_p11)  ;;  %962 = vst [vmem:[%s946_s30 + $0x8] sm:$0xff] (%p1727_p11), %v961_v23  ;;  %964 = vst [vmem:[%s946_s30 + $0x10] sm:$0xff] (%p1727_p11), %v963_v24  ;;  %v975_v30 = vld [vmem:[%s1648_s8 + $0x40] sm:$0xff] (%p1727_p11) }
 0x15c   : > { %966 = vst [vmem:[%s946_s30 + $0x18] sm:$0xff] (%p1727_p11), %v965_v25  ;;  %976 = vst [vmem:[%s946_s30 + $0x100] sm:$0xff] (%p1727_p11), %v975_v30 }
 0x15e   : > { %v979_v32 = vld [vmem:[%s1648_s8 + $0x50] sm:$0xff] (%p1727_p11) }
 0x15f   : > { %v977_v31 = vld [vmem:[%s1648_s8 + $0x48] sm:$0xff] (%p1727_p11)  ;;  %v981_v33 = vld [vmem:[%s1648_s8 + $0x58] sm:$0xff] (%p1727_p11)  ;;  %980 = vst [vmem:[%s946_s30 + $0x110] sm:$0xff] (%p1727_p11), %v979_v32 }
 0x160   : > { %978 = vst [vmem:[%s946_s30 + $0x108] sm:$0xff] (%p1727_p11), %v977_v31  ;;  %982 = vst [vmem:[%s946_s30 + $0x118] sm:$0xff] (%p1727_p11), %v981_v33 }
 0x16c   : > { %v818_v53 = vpop.f32.mrb[4].mxu0  ;;  %v861_v55 = vpop.f32.mrb[4].mxu1 }
 0x16d   : > { %v819_v54 = vadd.f32 %v818_v53, %v351_v49  ;;  %v820_v56 = vpop.f32.mrb[5].mxu0  ;;  %v862_v57 = vadd.f32 %v861_v55, %v359_v50  ;;  %v863_v59 = vpop.f32.mrb[5].mxu1 }
 0x16e   : > { %v821_v58 = vadd.f32 %v820_v56, %v355_v51  ;;  %v822_v60 = vpop.f32.mrb[6].mxu0  ;;  %v864_v62 = vadd.f32 %v863_v59, %v363_v52  ;;  %v865_v1 = vpop.f32.mrb[6].mxu1 }
 0x16f   : > { %vm874_vm8 = vcmp.ge.f32.partialorder %v819_v54, 0.0  ;;  %v890_v61 = vmul.f32 0.01, %v819_v54  ;;  %v823_v63 = vadd.f32 %v822_v60, %v351_v49  ;;  %v824_v2 = vpop.f32.mrb[7].mxu0  ;;  %vm876_vm9 = vcmp.ge.f32.partialorder %v862_v57, 0.0  ;;  %v867_v7 = vpop.f32.mrb[7].mxu1 }
 0x170   : > { %v892_v3 = vmul.f32 0.01, %v862_v57  ;;  %vm875_vm10 = vcmp.ge.f32.partialorder %v821_v58, 0.0  ;;  %v891_v4 = vmul.f32 0.01, %v821_v58  ;;  %vm877_vm11 = vcmp.ge.f32.partialorder %v864_v62, 0.0 }
 0x171   : > { %v906_v5 = vsel %vm874_vm8, %v819_v54, %v890_v61  ;;  %v893_v6 = vmul.f32 0.01, %v864_v62  ;;  %vm882_vm12 = vcmp.ge.f32.partialorder %v823_v63, 0.0  ;;  %v898_v11 = vmul.f32 0.01, %v823_v63 }
 0x172   : > { %922 = vst [vmem:[%s1648_s8 + $0x20] sm:$0xff] %v906_v5  ;;  %v908_v8 = vsel %vm876_vm9, %v862_v57, %v892_v3  ;;  %v907_v9 = vsel %vm875_vm10, %v821_v58, %v891_v4  ;;  %v866_v12 = vadd.f32 %v865_v1, %v359_v50  ;;  %v825_v10 = vadd.f32 %v824_v2, %v355_v51  ;;  %940 = sbr.rel (!%p1727_p11) target bundleno = 385 (0x181), region = 44 }
 0x173   : > { %924 = vst [vmem:[%s1648_s8 + $0x30] sm:$0xff] %v908_v8  ;;  %923 = vst [vmem:[%s1648_s8 + $0x28] sm:$0xff] %v907_v9  ;;  %v909_v13 = vsel %vm877_vm11, %v864_v62, %v893_v6  ;;  %v868_v14 = vadd.f32 %v867_v7, %v363_v52  ;;  %v914_v15 = vsel %vm882_vm12, %v823_v63, %v898_v11 }
 0x174   : > { %925 = vst [vmem:[%s1648_s8 + $0x38] sm:$0xff] %v909_v13  ;;  %vm884_vm13 = vcmp.ge.f32.partialorder %v866_v12, 0.0  ;;  %v900_v16 = vmul.f32 0.01, %v866_v12  ;;  %930 = vst [vmem:[%s1648_s8 + $0x60] sm:$0xff] %v914_v15  ;;  %vm883_vm14 = vcmp.ge.f32.partialorder %v825_v10, 0.0 }
 0x175   : > { %v899_v17 = vmul.f32 0.01, %v825_v10  ;;  %vm885_vm15 = vcmp.ge.f32.partialorder %v868_v14, 0.0  ;;  %v901_v18 = vmul.f32 0.01, %v868_v14 }
 0x176   : > { %v916_v19 = vsel %vm884_vm13, %v866_v12, %v900_v16 }
 0x177   : > { %932 = vst [vmem:[%s1648_s8 + $0x70] sm:$0xff] %v916_v19  ;;  %v915_v20 = vsel %vm883_vm14, %v825_v10, %v899_v17  ;;  %v917_v21 = vsel %vm885_vm15, %v868_v14, %v901_v18 }
 0x178   : > { %931 = vst [vmem:[%s1648_s8 + $0x68] sm:$0xff] %v915_v20  ;;  %933 = vst [vmem:[%s1648_s8 + $0x78] sm:$0xff] %v917_v21 }
 0x179   : > { %v967_v26 = vld [vmem:[%s1648_s8 + $0x20] sm:$0xff] }
 0x17a   : > { %v969_v27 = vld [vmem:[%s1648_s8 + $0x28] sm:$0xff]  ;;  %968 = vst [vmem:[%s946_s30 + $0x20] sm:$0xff] %v967_v26  ;;  %v971_v28 = vld [vmem:[%s1648_s8 + $0x30] sm:$0xff] }
 0x17b   : > { %970 = vst [vmem:[%s946_s30 + $0x28] sm:$0xff] %v969_v27  ;;  %v973_v29 = vld [vmem:[%s1648_s8 + $0x38] sm:$0xff]  ;;  %972 = vst [vmem:[%s946_s30 + $0x30] sm:$0xff] %v971_v28  ;;  %v983_v34 = vld [vmem:[%s1648_s8 + $0x60] sm:$0xff] }
 0x17c   : > { %974 = vst [vmem:[%s946_s30 + $0x38] sm:$0xff] %v973_v29  ;;  %984 = vst [vmem:[%s946_s30 + $0x120] sm:$0xff] %v983_v34 }
 0x17e   : > { %v987_v36 = vld [vmem:[%s1648_s8 + $0x70] sm:$0xff] }
 0x17f   : > { %v985_v35 = vld [vmem:[%s1648_s8 + $0x68] sm:$0xff]  ;;  %988 = vst [vmem:[%s946_s30 + $0x130] sm:$0xff] %v987_v36  ;;  %v989_v37 = vld [vmem:[%s1648_s8 + $0x78] sm:$0xff] }
 0x180   : > { %986 = vst [vmem:[%s946_s30 + $0x128] sm:$0xff] %v985_v35  ;;  %990 = vst [vmem:[%s946_s30 + $0x138] sm:$0xff] %v989_v37 }
 0x181 PF: > { %s19_s17 = sadd.s32 1, %s1372_s17   ;;  %s1728_s12 = smov %s1356_s13 }
 0x182   : > { %p16_p0 = scmp.ge.s32.totalorder %s19_s17, 6   ;;  %s1729_s13 = smov %s1360_s14 }
 0x183   : > { %s1730_s14 = smov %s1448_s24  ;;  %s1731_s15 = smov %s1368_s16 }
 0x184   : > { %s1732_s16 = smov %s1734_s19  ;;  %18 = sbr.rel (!%p16_p0) target bundleno = 6 (0x6), region = 111 }
 0x18b   :  { %1006 = vsyncpa [#allocation3], 1 }
 0x18c   :  { %1008 = vsyncpa [#allocation3 + $0x1], 1 }
 0x18d   :  { %1009 = vsyncpa [#allocation5], 1 }
 0x18e   :  { %1011 = vsyncpa [#allocation5 + $0x1], 1 }

// kernel: small_deconvnet_forward.5
= control target key start
LH: loop header
LB: loop body
LE: loop exit
PB: predicated region body
PF: predicated region fallthrough
CT: control target
= control target key end

     0   :  { %s1914_s9 = smov 0   ;;  %s1916_s10 = smov 0   ;;  %s2650_s0 = inlined_call_operand.vmem [shape: bf16[128,128], index: 0, kind: input, shape index: {}]   ;;  %s2651_s1 = inlined_call_operand.vmem [shape: bf16[128,2048], index: 1, kind: input, shape index: {}]   ;;  %s2652_s2 = inlined_call_operand.vmem [shape: f32[128,2048], index: 2, kind: output, shape index: {}]  }
   0x1   :  { %s1918_s11 = smov 0   ;;  %s1920_s12 = smov 0  }
   0x2   :  { %s1922_s13 = smov 0  }
   0x3 LB: > { %s21_s14 = sadd.s32 1, %s1892_s12  ;;  %s1719_s15 = sadd.s32 4294967295, %s1896_s13   ;;  %s1896_s13 = sphi %s1922_s13, %s12_s13   ;;  %s1892_s12 = sphi %s1920_s12, %s2657_s12   ;;  %s1888_s11 = sphi %s1918_s11, %s2656_s11   ;;  %s1884_s10 = sphi %s1916_s10, %s2655_s10   ;;  %s1880_s9 = sphi %s1914_s9, %s2654_s9  }
   0x4   : > { %p22_p0 = scmp.ge.s32.totalorder %s21_s14, 2  ;;  %p64_p1 = scmp.ne.s32.totalorder %s1884_s10, %s1880_s9 }
   0x5   : > { %p65_p2 = scmp.eq.s32.totalorder %s1896_s13, 0  ;;  %p96_p4 = scmp.eq.s32.totalorder %s1719_s15, 1 }
   0x6   : > { %s2659_s14 = smov (%p22_p0, %s21_s14), 0  ;;  %s57_s17 = sadd.s32 1, %s1884_s10 }
   0x7   : > { %p66_p3 = por %p65_p2, %p64_p1  ;;  %s54_s16 = ssub.s32 %s1892_s12, %s2659_s14 }
   0x8   : > { %p55_p5 = scmp.eq.s32.totalorder %s54_s16, 0  ;;  %p1949_p6 = por %p96_p4, %p64_p1 }
   0x9   : > { %p1723_p7 = scmp.ge.s32.totalorder %s1896_s13, 2 }
   0xa   : > { %s1954_s19 = scalar_select %p55_p5, %s1884_s10, %s57_s17  }
   0xb   : > { %127 = sbr.rel (%p1723_p7) target bundleno = 54 (0x36), region = 20 }
  0x12   : > { %130 = sbr.rel (!%p66_p3) target bundleno = 54 (0x36), region = 24  ;;  %s132_s20 = sand.u32 (%p66_p3), 1, %s1884_s10  }
  0x13   : > { %s1807_s21 = sshll.u32 (%p66_p3), %s1892_s12, 5  ;;  %s1724_s22 = sshll.u32 (%p66_p3), %s132_s20, 9 }
  0x14   : > { %s1962_s25 = scalar_lea.vmem (%p66_p3), %s2651_s1, %s1807_s21  ;;  %s1967_s26 = scalar_lea.vmem (%p66_p3), [#allocation2], %s1724_s22 }
  0x15   : > { %v150_v0 = vld [vmem:[%s1962_s25] sm:$0xff] (%p66_p3)  ;;  %v152_v1 = vld [vmem:[%s1962_s25 + $0x8] sm:$0xff] (%p66_p3)  ;;  %v154_v2 = vld [vmem:[%s1962_s25 + $0x10] sm:$0xff] (%p66_p3) }
  0x16   : > { %151 = vst [vmem:[%s1967_s26] sm:$0xff] (%p66_p3), %v150_v0  ;;  %153 = vst [vmem:[%s1967_s26 + $0x8] sm:$0xff] (%p66_p3), %v152_v1  ;;  %v156_v3 = vld [vmem:[%s1962_s25 + $0x18] sm:$0xff] (%p66_p3)  ;;  %v158_v4 = vld [vmem:[%s1962_s25 + $0x40] sm:$0xff] (%p66_p3) }
  0x17   : > { %155 = vst [vmem:[%s1967_s26 + $0x10] sm:$0xff] (%p66_p3), %v154_v2  ;;  %v160_v5 = vld [vmem:[%s1962_s25 + $0x48] sm:$0xff] (%p66_p3)  ;;  %157 = vst [vmem:[%s1967_s26 + $0x18] sm:$0xff] (%p66_p3), %v156_v3  ;;  %v162_v6 = vld [vmem:[%s1962_s25 + $0x50] sm:$0xff] (%p66_p3) }
  0x18   : > { %159 = vst [vmem:[%s1967_s26 + $0x20] sm:$0xff] (%p66_p3), %v158_v4  ;;  %161 = vst [vmem:[%s1967_s26 + $0x28] sm:$0xff] (%p66_p3), %v160_v5  ;;  %v164_v7 = vld [vmem:[%s1962_s25 + $0x58] sm:$0xff] (%p66_p3)  ;;  %v166_v8 = vld [vmem:[%s1962_s25 + $0x80] sm:$0xff] (%p66_p3) }
  0x19   : > { %163 = vst [vmem:[%s1967_s26 + $0x30] sm:$0xff] %v162_v6  ;;  %165 = vst [vmem:[%s1967_s26 + $0x38] sm:$0xff] %v164_v7  ;;  %v168_v9 = vld [vmem:[%s1962_s25 + $0x88] sm:$0xff]  ;;  %v170_v10 = vld [vmem:[%s1962_s25 + $0x90] sm:$0xff] }
  0x1a   : > { %167 = vst [vmem:[%s1967_s26 + $0x40] sm:$0xff] %v166_v8  ;;  %v172_v11 = vld [vmem:[%s1962_s25 + $0x98] sm:$0xff]  ;;  %169 = vst [vmem:[%s1967_s26 + $0x48] sm:$0xff] %v168_v9  ;;  %v174_v12 = vld [vmem:[%s1962_s25 + $0xc0] sm:$0xff] }
  0x1b   : > { %171 = vst [vmem:[%s1967_s26 + $0x50] sm:$0xff] %v170_v10  ;;  %173 = vst [vmem:[%s1967_s26 + $0x58] sm:$0xff] %v172_v11  ;;  %v176_v13 = vld [vmem:[%s1962_s25 + $0xc8] sm:$0xff]  ;;  %v178_v14 = vld [vmem:[%s1962_s25 + $0xd0] sm:$0xff] }
  0x1c   : > { %175 = vst [vmem:[%s1967_s26 + $0x60] sm:$0xff] %v174_v12  ;;  %177 = vst [vmem:[%s1967_s26 + $0x68] sm:$0xff] %v176_v13  ;;  %v180_v15 = vld [vmem:[%s1962_s25 + $0xd8] sm:$0xff]  ;;  %v182_v16 = vld [vmem:[%s1962_s25 + $0x100] sm:$0xff] }
  0x1d   : > { %179 = vst [vmem:[%s1967_s26 + $0x70] sm:$0xff] %v178_v14  ;;  %v184_v17 = vld [vmem:[%s1962_s25 + $0x108] sm:$0xff]  ;;  %181 = vst [vmem:[%s1967_s26 + $0x78] sm:$0xff] %v180_v15  ;;  %v186_v18 = vld [vmem:[%s1962_s25 + $0x110] sm:$0xff] }
  0x1e   : > { %183 = vst [vmem:[%s1967_s26 + $0x80] sm:$0xff] %v182_v16  ;;  %185 = vst [vmem:[%s1967_s26 + $0x88] sm:$0xff] %v184_v17  ;;  %v188_v19 = vld [vmem:[%s1962_s25 + $0x118] sm:$0xff]  ;;  %v190_v20 = vld [vmem:[%s1962_s25 + $0x140] sm:$0xff] }
  0x1f   : > { %187 = vst [vmem:[%s1967_s26 + $0x90] sm:$0xff] %v186_v18  ;;  %189 = vst [vmem:[%s1967_s26 + $0x98] sm:$0xff] %v188_v19  ;;  %v192_v21 = vld [vmem:[%s1962_s25 + $0x148] sm:$0xff]  ;;  %v194_v22 = vld [vmem:[%s1962_s25 + $0x150] sm:$0xff] }
  0x20   : > { %191 = vst [vmem:[%s1967_s26 + $0xa0] sm:$0xff] %v190_v20  ;;  %v196_v23 = vld [vmem:[%s1962_s25 + $0x158] sm:$0xff]  ;;  %193 = vst [vmem:[%s1967_s26 + $0xa8] sm:$0xff] %v192_v21  ;;  %v198_v24 = vld [vmem:[%s1962_s25 + $0x180] sm:$0xff] }
  0x21   : > { %195 = vst [vmem:[%s1967_s26 + $0xb0] sm:$0xff] %v194_v22  ;;  %197 = vst [vmem:[%s1967_s26 + $0xb8] sm:$0xff] %v196_v23  ;;  %v200_v25 = vld [vmem:[%s1962_s25 + $0x188] sm:$0xff]  ;;  %v202_v26 = vld [vmem:[%s1962_s25 + $0x190] sm:$0xff] }
  0x22   : > { %199 = vst [vmem:[%s1967_s26 + $0xc0] sm:$0xff] %v198_v24  ;;  %201 = vst [vmem:[%s1967_s26 + $0xc8] sm:$0xff] %v200_v25  ;;  %v204_v27 = vld [vmem:[%s1962_s25 + $0x198] sm:$0xff]  ;;  %v206_v28 = vld [vmem:[%s1962_s25 + $0x1c0] sm:$0xff] }
  0x23   : > { %203 = vst [vmem:[%s1967_s26 + $0xd0] sm:$0xff] %v202_v26  ;;  %v208_v29 = vld [vmem:[%s1962_s25 + $0x1c8] sm:$0xff]  ;;  %205 = vst [vmem:[%s1967_s26 + $0xd8] sm:$0xff] %v204_v27  ;;  %v210_v30 = vld [vmem:[%s1962_s25 + $0x1d0] sm:$0xff] }
  0x24   : > { %207 = vst [vmem:[%s1967_s26 + $0xe0] sm:$0xff] %v206_v28  ;;  %209 = vst [vmem:[%s1967_s26 + $0xe8] sm:$0xff] %v208_v29  ;;  %v212_v31 = vld [vmem:[%s1962_s25 + $0x1d8] sm:$0xff]  ;;  %v214_v32 = vld [vmem:[%s1962_s25 + $0x200] sm:$0xff] }
  0x25   : > { %211 = vst [vmem:[%s1967_s26 + $0xf0] sm:$0xff] %v210_v30  ;;  %213 = vst [vmem:[%s1967_s26 + $0xf8] sm:$0xff] %v212_v31  ;;  %v216_v33 = vld [vmem:[%s1962_s25 + $0x208] sm:$0xff]  ;;  %v218_v34 = vld [vmem:[%s1962_s25 + $0x210] sm:$0xff] }
  0x26   : > { %215 = vst [vmem:[%s1967_s26 + $0x100] sm:$0xff] %v214_v32  ;;  %v220_v35 = vld [vmem:[%s1962_s25 + $0x218] sm:$0xff]  ;;  %217 = vst [vmem:[%s1967_s26 + $0x108] sm:$0xff] %v216_v33  ;;  %v222_v36 = vld [vmem:[%s1962_s25 + $0x240] sm:$0xff] }
  0x27   : > { %219 = vst [vmem:[%s1967_s26 + $0x110] sm:$0xff] %v218_v34  ;;  %221 = vst [vmem:[%s1967_s26 + $0x118] sm:$0xff] %v220_v35  ;;  %v224_v37 = vld [vmem:[%s1962_s25 + $0x248] sm:$0xff]  ;;  %v226_v38 = vld [vmem:[%s1962_s25 + $0x250] sm:$0xff] }
  0x28   : > { %223 = vst [vmem:[%s1967_s26 + $0x120] sm:$0xff] %v222_v36  ;;  %225 = vst [vmem:[%s1967_s26 + $0x128] sm:$0xff] %v224_v37  ;;  %v228_v39 = vld [vmem:[%s1962_s25 + $0x258] sm:$0xff]  ;;  %v230_v40 = vld [vmem:[%s1962_s25 + $0x280] sm:$0xff] }
  0x29   : > { %227 = vst [vmem:[%s1967_s26 + $0x130] sm:$0xff] %v226_v38  ;;  %v232_v41 = vld [vmem:[%s1962_s25 + $0x288] sm:$0xff]  ;;  %229 = vst [vmem:[%s1967_s26 + $0x138] sm:$0xff] %v228_v39  ;;  %v234_v42 = vld [vmem:[%s1962_s25 + $0x290] sm:$0xff] }
  0x2a   : > { %231 = vst [vmem:[%s1967_s26 + $0x140] sm:$0xff] %v230_v40  ;;  %233 = vst [vmem:[%s1967_s26 + $0x148] sm:$0xff] %v232_v41  ;;  %v236_v43 = vld [vmem:[%s1962_s25 + $0x298] sm:$0xff]  ;;  %v238_v44 = vld [vmem:[%s1962_s25 + $0x2c0] sm:$0xff] }
  0x2b   : > { %235 = vst [vmem:[%s1967_s26 + $0x150] sm:$0xff] %v234_v42  ;;  %237 = vst [vmem:[%s1967_s26 + $0x158] sm:$0xff] %v236_v43  ;;  %v240_v45 = vld [vmem:[%s1962_s25 + $0x2c8] sm:$0xff]  ;;  %v242_v46 = vld [vmem:[%s1962_s25 + $0x2d0] sm:$0xff] }
  0x2c   : > { %239 = vst [vmem:[%s1967_s26 + $0x160] sm:$0xff] %v238_v44  ;;  %v244_v47 = vld [vmem:[%s1962_s25 + $0x2d8] sm:$0xff]  ;;  %241 = vst [vmem:[%s1967_s26 + $0x168] sm:$0xff] %v240_v45  ;;  %v246_v48 = vld [vmem:[%s1962_s25 + $0x300] sm:$0xff] }
  0x2d   : > { %243 = vst [vmem:[%s1967_s26 + $0x170] sm:$0xff] %v242_v46  ;;  %245 = vst [vmem:[%s1967_s26 + $0x178] sm:$0xff] %v244_v47  ;;  %v248_v49 = vld [vmem:[%s1962_s25 + $0x308] sm:$0xff]  ;;  %v250_v50 = vld [vmem:[%s1962_s25 + $0x310] sm:$0xff] }
  0x2e   : > { %247 = vst [vmem:[%s1967_s26 + $0x180] sm:$0xff] %v246_v48  ;;  %249 = vst [vmem:[%s1967_s26 + $0x188] sm:$0xff] %v248_v49  ;;  %v252_v51 = vld [vmem:[%s1962_s25 + $0x318] sm:$0xff]  ;;  %v254_v52 = vld [vmem:[%s1962_s25 + $0x340] sm:$0xff] }
  0x2f   : > { %251 = vst [vmem:[%s1967_s26 + $0x190] sm:$0xff] %v250_v50  ;;  %v256_v53 = vld [vmem:[%s1962_s25 + $0x348] sm:$0xff]  ;;  %253 = vst [vmem:[%s1967_s26 + $0x198] sm:$0xff] %v252_v51  ;;  %v258_v54 = vld [vmem:[%s1962_s25 + $0x350] sm:$0xff] }
  0x30   : > { %255 = vst [vmem:[%s1967_s26 + $0x1a0] sm:$0xff] %v254_v52  ;;  %257 = vst [vmem:[%s1967_s26 + $0x1a8] sm:$0xff] %v256_v53  ;;  %v260_v55 = vld [vmem:[%s1962_s25 + $0x358] sm:$0xff]  ;;  %v262_v56 = vld [vmem:[%s1962_s25 + $0x380] sm:$0xff] }
  0x31   : > { %259 = vst [vmem:[%s1967_s26 + $0x1b0] sm:$0xff] %v258_v54  ;;  %261 = vst [vmem:[%s1967_s26 + $0x1b8] sm:$0xff] %v260_v55  ;;  %v264_v57 = vld [vmem:[%s1962_s25 + $0x388] sm:$0xff]  ;;  %v266_v58 = vld [vmem:[%s1962_s25 + $0x390] sm:$0xff] }
  0x32   : > { %263 = vst [vmem:[%s1967_s26 + $0x1c0] sm:$0xff] %v262_v56  ;;  %v268_v59 = vld [vmem:[%s1962_s25 + $0x398] sm:$0xff]  ;;  %265 = vst [vmem:[%s1967_s26 + $0x1c8] sm:$0xff] %v264_v57  ;;  %v270_v60 = vld [vmem:[%s1962_s25 + $0x3c0] sm:$0xff] }
  0x33   : > { %267 = vst [vmem:[%s1967_s26 + $0x1d0] sm:$0xff] %v266_v58  ;;  %269 = vst [vmem:[%s1967_s26 + $0x1d8] sm:$0xff] %v268_v59  ;;  %v272_v61 = vld [vmem:[%s1962_s25 + $0x3c8] sm:$0xff]  ;;  %v274_v62 = vld [vmem:[%s1962_s25 + $0x3d0] sm:$0xff] }
  0x34   : > { %271 = vst [vmem:[%s1967_s26 + $0x1e0] sm:$0xff] %v270_v60  ;;  %273 = vst [vmem:[%s1967_s26 + $0x1e8] sm:$0xff] %v272_v61  ;;  %v276_v63 = vld [vmem:[%s1962_s25 + $0x3d8] sm:$0xff] }
  0x35   : > { %275 = vst [vmem:[%s1967_s26 + $0x1f0] sm:$0xff] %v274_v62  ;;  %277 = vst [vmem:[%s1967_s26 + $0x1f8] sm:$0xff] %v276_v63 }
  0x36 PF: > { %p1727_p8 = scmp.ge.s32.totalorder %s1896_s13, 1  ;;  %p282_p9 = scmp.lt.s32.totalorder %s1896_s13, 3 }
  0x38   : > { %p283_p10 = pnand %p1727_p8, %p282_p9 }
  0x39   : > { %s289_s27 = sand.u32 (!%p283_p10), 1, %s1880_s9   ;;  %v1898_v0 = vmov (!%p283_p10), 0  }
  0x3a   : > { %286 = sbr.rel (%p283_p10) target bundleno = 468 (0x1d4), region = 47  ;;  %s1728_s28 = sshll.u32 (!%p283_p10), %s289_s27, 9  ;;  %804 = vmatprep.mubr.bf16.mxu0 (!%p283_p10), %v1898_v0  ;;  %917 = vmatprep.mubr.bf16.mxu1 (!%p283_p10), %v1898_v0 }
  0x3b   : > { %s2101_s29 = scalar_lea.vmem (!%p283_p10), [#allocation2], %s1728_s28  ;;  %s1729_s26 = sshll.u32 (!%p283_p10), %s289_s27, 10 }
  0x3c   : > { %v340_v1 = vld [vmem:[%s2101_s29] sm:$0xff] (!%p283_p10)  ;;  %v341_v3 = vld [vmem:[%s2101_s29 + $0x8] sm:$0xff] (!%p283_p10)  ;;  %v342_v63 = vld [vmem:[%s2101_s29 + $0x10] sm:$0xff] (!%p283_p10)  ;;  %s2241_s28 = scalar_lea.vmem (!%p283_p10), [#allocation3], %s1729_s26 }
  0x3d   : > { %v344_v2 = vld [vmem:[%s2101_s29 + $0x20] sm:$0xff] (!%p283_p10)  ;;  %v345_v5 = vld [vmem:[%s2101_s29 + $0x28] sm:$0xff] (!%p283_p10) }
  0x3e   : > { %v1739_v4 = vcombine.high (!%p283_p10), %v340_v1, %v344_v2  ;;  %v1738_v6 = vcombine.low (!%p283_p10), %v340_v1, %v344_v2  ;;  %v348_v7 = vld [vmem:[%s2101_s29 + $0x40] sm:$0xff] (!%p283_p10)  ;;  %v1741_v9 = vcombine.high (!%p283_p10), %v341_v3, %v345_v5  ;;  %v1740_v10 = vcombine.low (!%p283_p10), %v341_v3, %v345_v5  ;;  %v349_v12 = vld [vmem:[%s2101_s29 + $0x48] sm:$0xff] (!%p283_p10)  ;;  %v346_v1 = vld [vmem:[%s2101_s29 + $0x30] sm:$0xff] (!%p283_p10) }
  0x3f   : > { %v352_v8 = vld [vmem:[%s2101_s29 + $0x60] sm:$0xff] (!%p283_p10)  ;;  %v353_v13 = vld [vmem:[%s2101_s29 + $0x68] sm:$0xff] (!%p283_p10)  ;;  %v343_v2 = vld [vmem:[%s2101_s29 + $0x18] sm:$0xff] (!%p283_p10) }
  0x40   : > { %v1747_v11 = vcombine.high (!%p283_p10), %v348_v7, %v352_v8  ;;  %v356_v14 = vld [vmem:[%s2101_s29 + $0x80] sm:$0xff] (!%p283_p10)  ;;  %772 = vmatprep.subr.bf16.mxu0 (!%p283_p10), %v1739_v4  ;;  %v1749_v15 = vcombine.high (!%p283_p10), %v349_v12, %v353_v13  ;;  %v357_v17 = vld [vmem:[%s2101_s29 + $0x88] sm:$0xff] (!%p283_p10)  ;;  %885 = vmatprep.subr.bf16.mxu1 (!%p283_p10), %v1741_v9  ;;  %v1746_v19 = vcombine.low (!%p283_p10), %v348_v7, %v352_v8  ;;  %v347_v3 = vld [vmem:[%s2101_s29 + $0x38] sm:$0xff] (!%p283_p10) }
  0x41   : > { %v360_v16 = vld [vmem:[%s2101_s29 + $0xa0] sm:$0xff]  ;;  %v361_v18 = vld [vmem:[%s2101_s29 + $0xa8] sm:$0xff]  ;;  %773 = vmatpush1.bf16.msra.mxu0 %v1738_v6  ;;  %886 = vmatpush1.bf16.msra.mxu1 %v1740_v10  ;;  %v1748_v20 = vcombine.low %v349_v12, %v353_v13  ;;  %v1743_v6 = vcombine.high %v342_v63, %v346_v1  ;;  %v1745_v7 = vcombine.high %v343_v2, %v347_v3  ;;  %v350_v9 = vld [vmem:[%s2101_s29 + $0x50] sm:$0xff]  ;;  %s1808_s9 = sshll.u32 (%p1949_p6), %s1888_s11, 6 }
  0x42   : > { %774 = vmatprep.subr.bf16.mxu0 %v1747_v11  ;;  %v1755_v21 = vcombine.high %v356_v14, %v360_v16  ;;  %887 = vmatprep.subr.bf16.mxu1 %v1749_v15  ;;  %v1757_v22 = vcombine.high %v357_v17, %v361_v18  ;;  %v364_v23 = vld [vmem:[%s2101_s29 + $0xc0] sm:$0xff]  ;;  %v365_v25 = vld [vmem:[%s2101_s29 + $0xc8] sm:$0xff]  ;;  %v1754_v27 = vcombine.low %v356_v14, %v360_v16  ;;  %v354_v10 = vld [vmem:[%s2101_s29 + $0x70] sm:$0xff]  ;;  %s2380_s30 = scalar_lea.vmem (%p1949_p6), %s2652_s2, %s1808_s9 }
  0x43   : > { %v368_v24 = vld [vmem:[%s2101_s29 + $0xe0] sm:$0xff]  ;;  %v369_v26 = vld [vmem:[%s2101_s29 + $0xe8] sm:$0xff]  ;;  %v1756_v28 = vcombine.low %v357_v17, %v361_v18  ;;  %v1742_v11 = vcombine.low %v342_v63, %v346_v1  ;;  %v351_v12 = vld [vmem:[%s2101_s29 + $0x58] sm:$0xff]  ;;  %v1744_v14 = vcombine.low %v343_v2, %v347_v3  ;;  %v1751_v15 = vcombine.high %v350_v9, %v354_v10 }
  0x44   : > { %v1763_v29 = vcombine.high %v364_v23, %v368_v24  ;;  %v1765_v30 = vcombine.high %v365_v25, %v369_v26  ;;  %v372_v31 = vld [vmem:[%s2101_s29 + $0x100] sm:$0xff]  ;;  %v373_v33 = vld [vmem:[%s2101_s29 + $0x108] sm:$0xff]  ;;  %v1762_v35 = vcombine.low %v364_v23, %v368_v24  ;;  %v1764_v36 = vcombine.low %v365_v25, %v369_v26  ;;  %v355_v13 = vld [vmem:[%s2101_s29 + $0x78] sm:$0xff] }
  0x45   : > { %775 = vmatpush1.bf16.msra.mxu0 %v1746_v19  ;;  %888 = vmatpush1.bf16.msra.mxu1 %v1748_v20  ;;  %v376_v32 = vld [vmem:[%s2101_s29 + $0x120] sm:$0xff]  ;;  %v377_v34 = vld [vmem:[%s2101_s29 + $0x128] sm:$0xff]  ;;  %v358_v16 = vld [vmem:[%s2101_s29 + $0x90] sm:$0xff]  ;;  %v1753_v18 = vcombine.high %v351_v12, %v355_v13 }
  0x46   : > { %776 = vmatprep.subr.bf16.mxu0 %v1755_v21  ;;  %889 = vmatprep.subr.bf16.mxu1 %v1757_v22  ;;  %v1771_v37 = vcombine.high %v372_v31, %v376_v32  ;;  %v1773_v38 = vcombine.high %v373_v33, %v377_v34  ;;  %v380_v39 = vld [vmem:[%s2101_s29 + $0x140] sm:$0xff]  ;;  %v381_v41 = vld [vmem:[%s2101_s29 + $0x148] sm:$0xff]  ;;  %v1770_v43 = vcombine.low %v372_v31, %v376_v32  ;;  %v362_v17 = vld [vmem:[%s2101_s29 + $0xb0] sm:$0xff] }
  0x47   : > { %v384_v40 = vld [vmem:[%s2101_s29 + $0x160] sm:$0xff]  ;;  %v385_v42 = vld [vmem:[%s2101_s29 + $0x168] sm:$0xff]  ;;  %v1772_v44 = vcombine.low %v373_v33, %v377_v34  ;;  %v359_v19 = vld [vmem:[%s2101_s29 + $0x98] sm:$0xff]  ;;  %v1750_v21 = vcombine.low %v350_v9, %v354_v10  ;;  %v1752_v22 = vcombine.low %v351_v12, %v355_v13  ;;  %v1759_v23 = vcombine.high %v358_v16, %v362_v17 }
  0x48   : > { %v1779_v45 = vcombine.high %v380_v39, %v384_v40  ;;  %v1781_v46 = vcombine.high %v381_v41, %v385_v42  ;;  %v388_v47 = vld [vmem:[%s2101_s29 + $0x180] sm:$0xff]  ;;  %v389_v49 = vld [vmem:[%s2101_s29 + $0x188] sm:$0xff]  ;;  %v1778_v51 = vcombine.low %v380_v39, %v384_v40  ;;  %v1780_v52 = vcombine.low %v381_v41, %v385_v42  ;;  %v363_v20 = vld [vmem:[%s2101_s29 + $0xb8] sm:$0xff] }
  0x49   : > { %777 = vmatpush1.bf16.msra.mxu0 %v1754_v27  ;;  %890 = vmatpush1.bf16.msra.mxu1 %v1756_v28  ;;  %v392_v48 = vld [vmem:[%s2101_s29 + $0x1a0] sm:$0xff]  ;;  %v393_v50 = vld [vmem:[%s2101_s29 + $0x1a8] sm:$0xff]  ;;  %v1761_v24 = vcombine.high %v359_v19, %v363_v20  ;;  %v366_v26 = vld [vmem:[%s2101_s29 + $0xd0] sm:$0xff]  ;;  %v1760_v31 = vcombine.low %v359_v19, %v363_v20 }
  0x4a   : > { %778 = vmatprep.subr.bf16.mxu0 %v1763_v29  ;;  %891 = vmatprep.subr.bf16.mxu1 %v1765_v30  ;;  %v1787_v53 = vcombine.high %v388_v47, %v392_v48  ;;  %v396_v54 = vld [vmem:[%s2101_s29 + $0x1c0] sm:$0xff]  ;;  %v1789_v55 = vcombine.high %v389_v49, %v393_v50  ;;  %v397_v57 = vld [vmem:[%s2101_s29 + $0x1c8] sm:$0xff]  ;;  %v1786_v59 = vcombine.low %v388_v47, %v392_v48  ;;  %v370_v27 = vld [vmem:[%s2101_s29 + $0xf0] sm:$0xff] }
  0x4b   : > { %v400_v56 = vld [vmem:[%s2101_s29 + $0x1e0] sm:$0xff]  ;;  %v401_v58 = vld [vmem:[%s2101_s29 + $0x1e8] sm:$0xff]  ;;  %v1788_v60 = vcombine.low %v389_v49, %v393_v50  ;;  %v367_v28 = vld [vmem:[%s2101_s29 + $0xd8] sm:$0xff]  ;;  %v1758_v30 = vcombine.low %v358_v16, %v362_v17  ;;  %v1767_v32 = vcombine.high %v366_v26, %v370_v27 }
  0x4c   : > { %v1795_v61 = vcombine.high %v396_v54, %v400_v56  ;;  %v1797_v62 = vcombine.high %v397_v57, %v401_v58  ;;  %v1794_v4 = vcombine.low %v396_v54, %v400_v56  ;;  %v1796_v5 = vcombine.low %v397_v57, %v401_v58  ;;  %v2142_v8 = vld [vmem:[%s2650_s0] sm:$0xff]   ;;  %v2159_v25 = vld [vmem:[%s2650_s0 + $0x8] sm:$0xff]   ;;  %v371_v29 = vld [vmem:[%s2101_s29 + $0xf8] sm:$0xff] }
  0x4d   : > { %779 = vmatpush1.bf16.msra.mxu0 %v1762_v35  ;;  %892 = vmatpush1.bf16.msra.mxu1 %v1764_v36  ;;  %v1769_v33 = vcombine.high %v367_v28, %v371_v29  ;;  %v374_v34 = vld [vmem:[%s2101_s29 + $0x110] sm:$0xff]  ;;  %v375_v36 = vld [vmem:[%s2101_s29 + $0x118] sm:$0xff]  ;;  %v1768_v39 = vcombine.low %v367_v28, %v371_v29  ;;  %v1855_v9 = vld [vmem:[%s2650_s0 + $0x28] sm:$0xff]  }
  0x4e   : > { %780 = vmatprep.subr.bf16.mxu0 %v1771_v37  ;;  %893 = vmatprep.subr.bf16.mxu1 %v1773_v38  ;;  %v378_v35 = vld [vmem:[%s2101_s29 + $0x130] sm:$0xff]  ;;  %v379_v37 = vld [vmem:[%s2101_s29 + $0x138] sm:$0xff]  ;;  %v1766_v38 = vcombine.low %v366_v26, %v370_v27 }
  0x4f   : > { %v1775_v40 = vcombine.high %v374_v34, %v378_v35  ;;  %v2176_v41 = vld [vmem:[%s2650_s0 + $0x10] sm:$0xff]   ;;  %v1777_v42 = vcombine.high %v375_v36, %v379_v37  ;;  %v1774_v47 = vcombine.low %v374_v34, %v378_v35  ;;  %v1776_v48 = vcombine.low %v375_v36, %v379_v37  ;;  %v395_v54 = vld [vmem:[%s2101_s29 + $0x1b8] sm:$0xff] }
  0x50   : > { %v1853_v58 = vld [vmem:[%s2650_s0 + $0x18] sm:$0xff]   ;;  %v1856_v10 = vld [vmem:[%s2650_s0 + $0x30] sm:$0xff]  }
  0x51   : > { %781 = vmatpush1.bf16.msra.mxu0 %v1770_v43  ;;  %894 = vmatpush1.bf16.msra.mxu1 %v1772_v44  ;;  %v382_v43 = vld [vmem:[%s2101_s29 + $0x150] sm:$0xff]  ;;  %v403_v63 = vld [vmem:[%s2101_s29 + $0x1f8] sm:$0xff] }
  0x52   : > { %782 = vmatprep.subr.bf16.mxu0 %v1779_v45  ;;  %895 = vmatprep.subr.bf16.mxu1 %v1781_v46  ;;  %v386_v44 = vld [vmem:[%s2101_s29 + $0x170] sm:$0xff]  ;;  %v383_v45 = vld [vmem:[%s2101_s29 + $0x158] sm:$0xff] }
  0x53   : > { %v387_v46 = vld [vmem:[%s2101_s29 + $0x178] sm:$0xff]  ;;  %v1783_v49 = vcombine.high %v382_v43, %v386_v44 }
  0x54   : > { %v1785_v50 = vcombine.high %v383_v45, %v387_v46  ;;  %v1784_v56 = vcombine.low %v383_v45, %v387_v46 }
  0x55   : > { %783 = vmatpush1.bf16.msra.mxu0 %v1778_v51  ;;  %896 = vmatpush1.bf16.msra.mxu1 %v1780_v52  ;;  %v390_v51 = vld [vmem:[%s2101_s29 + $0x190] sm:$0xff] }
  0x56   : > { %784 = vmatprep.subr.bf16.mxu0 %v1787_v53  ;;  %897 = vmatprep.subr.bf16.mxu1 %v1789_v55  ;;  %v394_v52 = vld [vmem:[%s2101_s29 + $0x1b0] sm:$0xff]  ;;  %v391_v53 = vld [vmem:[%s2101_s29 + $0x198] sm:$0xff]  ;;  %v1782_v55 = vcombine.low %v382_v43, %v386_v44 }
  0x57   : > { %v1791_v57 = vcombine.high %v390_v51, %v394_v52  ;;  %v1790_v1 = vcombine.low %v390_v51, %v394_v52  ;;  %v1792_v2 = vcombine.low %v391_v53, %v395_v54 }
  0x59   : > { %785 = vmatpush1.bf16.msra.mxu0 %v1786_v59  ;;  %898 = vmatpush1.bf16.msra.mxu1 %v1788_v60  ;;  %v1793_v59 = vcombine.high %v391_v53, %v395_v54  ;;  %v398_v60 = vld [vmem:[%s2101_s29 + $0x1d0] sm:$0xff] }
  0x5a   : > { %786 = vmatprep.subr.bf16.mxu0 %v1795_v61  ;;  %899 = vmatprep.subr.bf16.mxu1 %v1797_v62  ;;  %v402_v61 = vld [vmem:[%s2101_s29 + $0x1f0] sm:$0xff]  ;;  %v399_v62 = vld [vmem:[%s2101_s29 + $0x1d8] sm:$0xff] }
  0x5b   : > { %v1799_v3 = vcombine.high %v398_v60, %v402_v61 }
  0x5d   : > { %787 = vmatpush1.bf16.msra.mxu0 %v1794_v4  ;;  %900 = vmatpush1.bf16.msra.mxu1 %v1796_v5  ;;  %v1801_v4 = vcombine.high %v399_v62, %v403_v63  ;;  %v1798_v5 = vcombine.low %v398_v60, %v402_v61 }
  0x5e   : > { %998 = vmatprep.subr.bf16.mxu0 %v1743_v6  ;;  %1111 = vmatprep.subr.bf16.mxu1 %v1745_v7  ;;  %v1800_v6 = vcombine.low %v399_v62, %v403_v63  ;;  %v1854_v7 = vld [vmem:[%s2650_s0 + $0x20] sm:$0xff]  }
  0x60   : > { %805 = vmatmul.mubr.bf16.vlgmr.msra.gmra.mrb[0].mxu0 %v2142_v8  ;;  %918 = vmatmul.mubr.bf16.vlgmr.msra.gmra.mrb[0].mxu1 %v2142_v8 }
  0x61   : > { %999 = vmatpush1.bf16.msra.mxu0 %v1742_v11  ;;  %1112 = vmatpush1.bf16.msra.mxu1 %v1744_v14  ;;  %v1857_v11 = vld [vmem:[%s2650_s0 + $0x38] sm:$0xff]  }
  0x62   : > { %814 = vmatprep.mubr.bf16.mxu0 %v1898_v0  ;;  %927 = vmatprep.mubr.bf16.mxu1 %v1898_v0 }
  0x63   : > { %1000 = vmatprep.subr.bf16.mxu0 %v1751_v15  ;;  %1113 = vmatprep.subr.bf16.mxu1 %v1753_v18 }
  0x65   : > { %1001 = vmatpush1.bf16.msra.mxu0 %v1750_v21  ;;  %1114 = vmatpush1.bf16.msra.mxu1 %v1752_v22 }
  0x66   : > { %1002 = vmatprep.subr.bf16.mxu0 %v1759_v23  ;;  %1115 = vmatprep.subr.bf16.mxu1 %v1761_v24 }
  0x68   : > { %815 = vmatmul.mubr.bf16.gmra.mrb[4].mxu0 %v2159_v25  ;;  %928 = vmatmul.mubr.bf16.gmra.mrb[4].mxu1 %v2159_v25 }
  0x69   : > { %824 = vmatprep.mubr.bf16.mxu0 %v1898_v0  ;;  %937 = vmatprep.mubr.bf16.mxu1 %v1898_v0 }
  0x6a   : > { %1003 = vmatpush1.bf16.msra.mxu0 %v1758_v30  ;;  %1116 = vmatpush1.bf16.msra.mxu1 %v1760_v31 }
  0x6b   : > { %1004 = vmatprep.subr.bf16.mxu0 %v1767_v32  ;;  %1117 = vmatprep.subr.bf16.mxu1 %v1769_v33 }
  0x6e   : > { %1005 = vmatpush1.bf16.msra.mxu0 %v1766_v38  ;;  %1118 = vmatpush1.bf16.msra.mxu1 %v1768_v39 }
  0x6f   : > { %1006 = vmatprep.subr.bf16.mxu0 %v1775_v40  ;;  %1119 = vmatprep.subr.bf16.mxu1 %v1777_v42 }
  0x70   : > { %825 = vmatmul.mubr.bf16.gmra.mrb[8].mxu0 %v2176_v41  ;;  %938 = vmatmul.mubr.bf16.gmra.mrb[8].mxu1 %v2176_v41 }
  0x71   : > { %834 = vmatprep.mubr.bf16.mxu0 %v1898_v0  ;;  %947 = vmatprep.mubr.bf16.mxu1 %v1898_v0 }
  0x72   : > { %1007 = vmatpush1.bf16.msra.mxu0 %v1774_v47  ;;  %1120 = vmatpush1.bf16.msra.mxu1 %v1776_v48 }
  0x73   : > { %1008 = vmatprep.subr.bf16.mxu0 %v1783_v49  ;;  %1121 = vmatprep.subr.bf16.mxu1 %v1785_v50 }
  0x76   : > { %1009 = vmatpush1.bf16.msra.mxu0 %v1782_v55  ;;  %1122 = vmatpush1.bf16.msra.mxu1 %v1784_v56 }
  0x77   : > { %1010 = vmatprep.subr.bf16.mxu0 %v1791_v57  ;;  %1123 = vmatprep.subr.bf16.mxu1 %v1793_v59 }
  0x78   : > { %835 = vmatmul.mubr.bf16.gmra.mrb[12].mxu0 %v1853_v58  ;;  %948 = vmatmul.mubr.bf16.gmra.mrb[12].mxu1 %v1853_v58 }
  0x79   : > { %844 = vmatprep.mubr.bf16.mxu0 %v1898_v0  ;;  %957 = vmatprep.mubr.bf16.mxu1 %v1898_v0 }
  0x7a   : > { %1011 = vmatpush1.bf16.msra.mxu0 %v1790_v1  ;;  %1124 = vmatpush1.bf16.msra.mxu1 %v1792_v2 }
  0x7b   : > { %1012 = vmatprep.subr.bf16.mxu0 %v1799_v3  ;;  %1125 = vmatprep.subr.bf16.mxu1 %v1801_v4 }
  0x7e   : > { %1013 = vmatpush1.bf16.msra.mxu0 %v1798_v5  ;;  %1126 = vmatpush1.bf16.msra.mxu1 %v1800_v6 }
  0x80   : > { %845 = vmatmul.mubr.bf16.gmra.mrb[16].mxu0 %v1854_v7  ;;  %958 = vmatmul.mubr.bf16.gmra.mrb[16].mxu1 %v1854_v7 }
  0x81   : > { %854 = vmatprep.mubr.bf16.mxu0 %v1898_v0  ;;  %967 = vmatprep.mubr.bf16.mxu1 %v1898_v0 }
  0x88   : > { %855 = vmatmul.mubr.bf16.gmra.mrb[20].mxu0 %v1855_v9  ;;  %968 = vmatmul.mubr.bf16.gmra.mrb[20].mxu1 %v1855_v9 }
  0x89   : > { %864 = vmatprep.mubr.bf16.mxu0 %v1898_v0  ;;  %977 = vmatprep.mubr.bf16.mxu1 %v1898_v0 }
  0x90   : > { %865 = vmatmul.mubr.bf16.gmra.mrb[24].mxu0 %v1856_v10  ;;  %978 = vmatmul.mubr.bf16.gmra.mrb[24].mxu1 %v1856_v10 }
  0x91   : > { %874 = vmatprep.mubr.bf16.mxu0 %v1898_v0  ;;  %987 = vmatprep.mubr.bf16.mxu1 %v1898_v0 }
  0x98   : > { %875 = vmatmul.mubr.bf16.gmra.mrb[28].mxu0 %v1857_v11  ;;  %988 = vmatmul.mubr.bf16.gmra.mrb[28].mxu1 %v1857_v11 }
  0x99   : > { %1030 = vmatprep.mubr.bf16.mxu0 %v1898_v0  ;;  %1143 = vmatprep.mubr.bf16.mxu1 %v1898_v0 }
  0xa0   : > { %1031 = vmatmul.mubr.bf16.vlgmr.msra.gmra.mrb[32].mxu0 %v2142_v8  ;;  %1144 = vmatmul.mubr.bf16.vlgmr.msra.gmra.mrb[32].mxu1 %v2142_v8 }
  0xa1   : > { %1040 = vmatprep.mubr.bf16.mxu0 %v1898_v0  ;;  %1153 = vmatprep.mubr.bf16.mxu1 %v1898_v0 }
  0xa8   : > { %1041 = vmatmul.mubr.bf16.gmra.mrb[36].mxu0 %v2159_v25  ;;  %1154 = vmatmul.mubr.bf16.gmra.mrb[36].mxu1 %v2159_v25 }
  0xa9   : > { %1050 = vmatprep.mubr.bf16.mxu0 %v1898_v0  ;;  %1163 = vmatprep.mubr.bf16.mxu1 %v1898_v0 }
  0xb0   : > { %1051 = vmatmul.mubr.bf16.gmra.mrb[40].mxu0 %v2176_v41  ;;  %1164 = vmatmul.mubr.bf16.gmra.mrb[40].mxu1 %v2176_v41 }
  0xb1   : > { %1060 = vmatprep.mubr.bf16.mxu0 %v1898_v0  ;;  %1173 = vmatprep.mubr.bf16.mxu1 %v1898_v0 }
  0xb8   : > { %1061 = vmatmul.mubr.bf16.gmra.mrb[44].mxu0 %v1853_v58  ;;  %1174 = vmatmul.mubr.bf16.gmra.mrb[44].mxu1 %v1853_v58 }
  0xb9   : > { %1070 = vmatprep.mubr.bf16.mxu0 %v1898_v0  ;;  %1183 = vmatprep.mubr.bf16.mxu1 %v1898_v0 }
  0xc0   : > { %1071 = vmatmul.mubr.bf16.gmra.mrb[48].mxu0 %v1854_v7  ;;  %1184 = vmatmul.mubr.bf16.gmra.mrb[48].mxu1 %v1854_v7 }
  0xc1   : > { %1080 = vmatprep.mubr.bf16.mxu0 %v1898_v0  ;;  %1193 = vmatprep.mubr.bf16.mxu1 %v1898_v0 }
  0xc8   : > { %1081 = vmatmul.mubr.bf16.gmra.mrb[52].mxu0 %v1855_v9  ;;  %1194 = vmatmul.mubr.bf16.gmra.mrb[52].mxu1 %v1855_v9 }
  0xc9   : > { %1090 = vmatprep.mubr.bf16.mxu0 %v1898_v0  ;;  %1203 = vmatprep.mubr.bf16.mxu1 %v1898_v0 }
  0xd0   : > { %1091 = vmatmul.mubr.bf16.gmra.mrb[56].mxu0 %v1856_v10  ;;  %1204 = vmatmul.mubr.bf16.gmra.mrb[56].mxu1 %v1856_v10 }
  0xd1   : > { %1100 = vmatprep.mubr.bf16.mxu0 %v1898_v0  ;;  %1213 = vmatprep.mubr.bf16.mxu1 %v1898_v0 }
  0xd8   : > { %1101 = vmatmul.mubr.bf16.gmra.mrb[60].mxu0 %v1857_v11  ;;  %1214 = vmatmul.mubr.bf16.gmra.mrb[60].mxu1 %v1857_v11 }
 0x133   : > { %v806_v8 = vpop.f32.mrb[0].mxu0  ;;  %v919_v12 = vpop.f32.mrb[0].mxu1 }
 0x134   : > { %1224 = vst [vmem:[%s2241_s28] sm:$0xff] %v806_v8  ;;  %v808_v13 = vpop.f32.mrb[1].mxu0  ;;  %1226 = vst [vmem:[%s2241_s28 + $0x10] sm:$0xff] %v919_v12  ;;  %v921_v0 = vpop.f32.mrb[1].mxu1 }
 0x135   : > { %1225 = vst [vmem:[%s2241_s28 + $0x8] sm:$0xff] %v808_v13  ;;  %v810_v14 = vpop.f32.mrb[2].mxu0  ;;  %1227 = vst [vmem:[%s2241_s28 + $0x18] sm:$0xff] %v921_v0  ;;  %v923_v15 = vpop.f32.mrb[2].mxu1 }
 0x136   : > { %1232 = vst [vmem:[%s2241_s28 + $0x40] sm:$0xff] %v810_v14  ;;  %v812_v16 = vpop.f32.mrb[3].mxu0  ;;  %1234 = vst [vmem:[%s2241_s28 + $0x50] sm:$0xff] %v923_v15  ;;  %v925_v17 = vpop.f32.mrb[3].mxu1 }
 0x137   : > { %1233 = vst [vmem:[%s2241_s28 + $0x48] sm:$0xff] %v812_v16  ;;  %1235 = vst [vmem:[%s2241_s28 + $0x58] sm:$0xff] %v925_v17 }
 0x13b   : > { %v816_v18 = vpop.f32.mrb[4].mxu0  ;;  %v929_v19 = vpop.f32.mrb[4].mxu1 }
 0x13c   : > { %1240 = vst [vmem:[%s2241_s28 + $0x80] sm:$0xff] %v816_v18  ;;  %v818_v20 = vpop.f32.mrb[5].mxu0  ;;  %1242 = vst [vmem:[%s2241_s28 + $0x90] sm:$0xff] %v929_v19  ;;  %v931_v21 = vpop.f32.mrb[5].mxu1 }
 0x13d   : > { %1241 = vst [vmem:[%s2241_s28 + $0x88] sm:$0xff] %v818_v20  ;;  %v820_v22 = vpop.f32.mrb[6].mxu0  ;;  %1243 = vst [vmem:[%s2241_s28 + $0x98] sm:$0xff] %v931_v21  ;;  %v933_v23 = vpop.f32.mrb[6].mxu1 }
 0x13e   : > { %1248 = vst [vmem:[%s2241_s28 + $0xc0] sm:$0xff] %v820_v22  ;;  %v822_v24 = vpop.f32.mrb[7].mxu0  ;;  %1250 = vst [vmem:[%s2241_s28 + $0xd0] sm:$0xff] %v933_v23  ;;  %v935_v25 = vpop.f32.mrb[7].mxu1 }
 0x13f   : > { %1249 = vst [vmem:[%s2241_s28 + $0xc8] sm:$0xff] %v822_v24  ;;  %1251 = vst [vmem:[%s2241_s28 + $0xd8] sm:$0xff] %v935_v25 }
 0x143   : > { %v826_v26 = vpop.f32.mrb[8].mxu0  ;;  %v939_v27 = vpop.f32.mrb[8].mxu1 }
 0x144   : > { %1256 = vst [vmem:[%s2241_s28 + $0x100] sm:$0xff] %v826_v26  ;;  %v828_v28 = vpop.f32.mrb[9].mxu0  ;;  %1258 = vst [vmem:[%s2241_s28 + $0x110] sm:$0xff] %v939_v27  ;;  %v941_v29 = vpop.f32.mrb[9].mxu1 }
 0x145   : > { %1257 = vst [vmem:[%s2241_s28 + $0x108] sm:$0xff] %v828_v28  ;;  %v830_v30 = vpop.f32.mrb[10].mxu0  ;;  %1259 = vst [vmem:[%s2241_s28 + $0x118] sm:$0xff] %v941_v29  ;;  %v943_v31 = vpop.f32.mrb[10].mxu1 }
 0x146   : > { %1264 = vst [vmem:[%s2241_s28 + $0x140] sm:$0xff] %v830_v30  ;;  %v832_v32 = vpop.f32.mrb[11].mxu0  ;;  %1266 = vst [vmem:[%s2241_s28 + $0x150] sm:$0xff] %v943_v31  ;;  %v945_v33 = vpop.f32.mrb[11].mxu1 }
 0x147   : > { %1265 = vst [vmem:[%s2241_s28 + $0x148] sm:$0xff] %v832_v32  ;;  %1267 = vst [vmem:[%s2241_s28 + $0x158] sm:$0xff] %v945_v33 }
 0x14b   : > { %v836_v34 = vpop.f32.mrb[12].mxu0  ;;  %v949_v35 = vpop.f32.mrb[12].mxu1 }
 0x14c   : > { %1272 = vst [vmem:[%s2241_s28 + $0x180] sm:$0xff] %v836_v34  ;;  %v838_v36 = vpop.f32.mrb[13].mxu0  ;;  %1274 = vst [vmem:[%s2241_s28 + $0x190] sm:$0xff] %v949_v35  ;;  %v951_v37 = vpop.f32.mrb[13].mxu1 }
 0x14d   : > { %1273 = vst [vmem:[%s2241_s28 + $0x188] sm:$0xff] %v838_v36  ;;  %v840_v38 = vpop.f32.mrb[14].mxu0  ;;  %1275 = vst [vmem:[%s2241_s28 + $0x198] sm:$0xff] %v951_v37  ;;  %v953_v39 = vpop.f32.mrb[14].mxu1 }
 0x14e   : > { %1280 = vst [vmem:[%s2241_s28 + $0x1c0] sm:$0xff] %v840_v38  ;;  %v842_v40 = vpop.f32.mrb[15].mxu0  ;;  %1282 = vst [vmem:[%s2241_s28 + $0x1d0] sm:$0xff] %v953_v39  ;;  %v955_v41 = vpop.f32.mrb[15].mxu1 }
 0x14f   : > { %1281 = vst [vmem:[%s2241_s28 + $0x1c8] sm:$0xff] %v842_v40  ;;  %1283 = vst [vmem:[%s2241_s28 + $0x1d8] sm:$0xff] %v955_v41 }
 0x153   : > { %v846_v42 = vpop.f32.mrb[16].mxu0  ;;  %v959_v43 = vpop.f32.mrb[16].mxu1 }
 0x154   : > { %1288 = vst [vmem:[%s2241_s28 + $0x200] sm:$0xff] %v846_v42  ;;  %v848_v44 = vpop.f32.mrb[17].mxu0  ;;  %1290 = vst [vmem:[%s2241_s28 + $0x210] sm:$0xff] %v959_v43  ;;  %v961_v45 = vpop.f32.mrb[17].mxu1 }
 0x155   : > { %1289 = vst [vmem:[%s2241_s28 + $0x208] sm:$0xff] %v848_v44  ;;  %v850_v46 = vpop.f32.mrb[18].mxu0  ;;  %1291 = vst [vmem:[%s2241_s28 + $0x218] sm:$0xff] %v961_v45  ;;  %v963_v47 = vpop.f32.mrb[18].mxu1 }
 0x156   : > { %1296 = vst [vmem:[%s2241_s28 + $0x240] sm:$0xff] %v850_v46  ;;  %v852_v48 = vpop.f32.mrb[19].mxu0  ;;  %1298 = vst [vmem:[%s2241_s28 + $0x250] sm:$0xff] %v963_v47  ;;  %v965_v49 = vpop.f32.mrb[19].mxu1 }
 0x157   : > { %1297 = vst [vmem:[%s2241_s28 + $0x248] sm:$0xff] %v852_v48  ;;  %1299 = vst [vmem:[%s2241_s28 + $0x258] sm:$0xff] %v965_v49 }
 0x15b   : > { %v856_v50 = vpop.f32.mrb[20].mxu0  ;;  %v969_v51 = vpop.f32.mrb[20].mxu1 }
 0x15c   : > { %1304 = vst [vmem:[%s2241_s28 + $0x280] sm:$0xff] %v856_v50  ;;  %v858_v52 = vpop.f32.mrb[21].mxu0  ;;  %1306 = vst [vmem:[%s2241_s28 + $0x290] sm:$0xff] %v969_v51  ;;  %v971_v53 = vpop.f32.mrb[21].mxu1 }
 0x15d   : > { %1305 = vst [vmem:[%s2241_s28 + $0x288] sm:$0xff] %v858_v52  ;;  %v860_v54 = vpop.f32.mrb[22].mxu0  ;;  %1307 = vst [vmem:[%s2241_s28 + $0x298] sm:$0xff] %v971_v53  ;;  %v973_v55 = vpop.f32.mrb[22].mxu1 }
 0x15e   : > { %1312 = vst [vmem:[%s2241_s28 + $0x2c0] sm:$0xff] %v860_v54  ;;  %v862_v56 = vpop.f32.mrb[23].mxu0  ;;  %1314 = vst [vmem:[%s2241_s28 + $0x2d0] sm:$0xff] %v973_v55  ;;  %v975_v57 = vpop.f32.mrb[23].mxu1 }
 0x15f   : > { %1313 = vst [vmem:[%s2241_s28 + $0x2c8] sm:$0xff] %v862_v56  ;;  %1315 = vst [vmem:[%s2241_s28 + $0x2d8] sm:$0xff] %v975_v57 }
 0x163   : > { %v866_v58 = vpop.f32.mrb[24].mxu0  ;;  %v979_v59 = vpop.f32.mrb[24].mxu1 }
 0x164   : > { %1320 = vst [vmem:[%s2241_s28 + $0x300] sm:$0xff] %v866_v58  ;;  %v868_v60 = vpop.f32.mrb[25].mxu0  ;;  %1322 = vst [vmem:[%s2241_s28 + $0x310] sm:$0xff] %v979_v59  ;;  %v981_v61 = vpop.f32.mrb[25].mxu1 }
 0x165   : > { %1321 = vst [vmem:[%s2241_s28 + $0x308] sm:$0xff] %v868_v60  ;;  %v870_v62 = vpop.f32.mrb[26].mxu0  ;;  %1323 = vst [vmem:[%s2241_s28 + $0x318] sm:$0xff] %v981_v61  ;;  %v983_v63 = vpop.f32.mrb[26].mxu1 }
 0x166   : > { %1328 = vst [vmem:[%s2241_s28 + $0x340] sm:$0xff] %v870_v62  ;;  %v872_v1 = vpop.f32.mrb[27].mxu0  ;;  %1330 = vst [vmem:[%s2241_s28 + $0x350] sm:$0xff] %v983_v63  ;;  %v985_v2 = vpop.f32.mrb[27].mxu1 }
 0x167   : > { %1329 = vst [vmem:[%s2241_s28 + $0x348] sm:$0xff] %v872_v1  ;;  %1331 = vst [vmem:[%s2241_s28 + $0x358] sm:$0xff] %v985_v2 }
 0x16b   : > { %v876_v3 = vpop.f32.mrb[28].mxu0  ;;  %v989_v4 = vpop.f32.mrb[28].mxu1 }
 0x16c   : > { %1336 = vst [vmem:[%s2241_s28 + $0x380] sm:$0xff] %v876_v3  ;;  %v878_v5 = vpop.f32.mrb[29].mxu0  ;;  %1338 = vst [vmem:[%s2241_s28 + $0x390] sm:$0xff] %v989_v4  ;;  %v991_v6 = vpop.f32.mrb[29].mxu1 }
 0x16d   : > { %1337 = vst [vmem:[%s2241_s28 + $0x388] sm:$0xff] %v878_v5  ;;  %v880_v7 = vpop.f32.mrb[30].mxu0  ;;  %1339 = vst [vmem:[%s2241_s28 + $0x398] sm:$0xff] %v991_v6  ;;  %v993_v9 = vpop.f32.mrb[30].mxu1 }
 0x16e   : > { %1344 = vst [vmem:[%s2241_s28 + $0x3c0] sm:$0xff] %v880_v7  ;;  %v882_v10 = vpop.f32.mrb[31].mxu0  ;;  %1346 = vst [vmem:[%s2241_s28 + $0x3d0] sm:$0xff] %v993_v9  ;;  %v995_v11 = vpop.f32.mrb[31].mxu1 }
 0x16f   : > { %1345 = vst [vmem:[%s2241_s28 + $0x3c8] sm:$0xff] %v882_v10  ;;  %1347 = vst [vmem:[%s2241_s28 + $0x3d8] sm:$0xff] %v995_v11 }
 0x173   : > { %v1032_v8 = vpop.f32.mrb[32].mxu0  ;;  %v1145_v12 = vpop.f32.mrb[32].mxu1 }
 0x174   : > { %1228 = vst [vmem:[%s2241_s28 + $0x20] sm:$0xff] %v1032_v8  ;;  %v1034_v13 = vpop.f32.mrb[33].mxu0  ;;  %1230 = vst [vmem:[%s2241_s28 + $0x30] sm:$0xff] %v1145_v12  ;;  %v1147_v0 = vpop.f32.mrb[33].mxu1  ;;  %v1377_v8 = vld [vmem:[%s2241_s28] sm:$0xff] (%p1949_p6)  ;;  %v1379_v12 = vld [vmem:[%s2241_s28 + $0x8] sm:$0xff] (%p1949_p6) }
 0x175   : > { %1229 = vst [vmem:[%s2241_s28 + $0x28] sm:$0xff] %v1034_v13  ;;  %v1036_v14 = vpop.f32.mrb[34].mxu0  ;;  %1231 = vst [vmem:[%s2241_s28 + $0x38] sm:$0xff] %v1147_v0  ;;  %v1149_v15 = vpop.f32.mrb[34].mxu1  ;;  %v1381_v13 = vld [vmem:[%s2241_s28 + $0x10] sm:$0xff] (%p1949_p6)  ;;  %v1383_v0 = vld [vmem:[%s2241_s28 + $0x18] sm:$0xff] (%p1949_p6) }
 0x176   : > { %1236 = vst [vmem:[%s2241_s28 + $0x60] sm:$0xff] %v1036_v14  ;;  %v1038_v16 = vpop.f32.mrb[35].mxu0  ;;  %1238 = vst [vmem:[%s2241_s28 + $0x70] sm:$0xff] %v1149_v15  ;;  %v1151_v17 = vpop.f32.mrb[35].mxu1 }
 0x177   : > { %1237 = vst [vmem:[%s2241_s28 + $0x68] sm:$0xff] %v1038_v16  ;;  %1239 = vst [vmem:[%s2241_s28 + $0x78] sm:$0xff] %v1151_v17 }
 0x178   : > { %1378 = vst [vmem:[%s2380_s30] sm:$0xff] (%p1949_p6), %v1377_v8  ;;  %1380 = vst [vmem:[%s2380_s30 + $0x8] sm:$0xff] (%p1949_p6), %v1379_v12  ;;  %v1505_v8 = vld [vmem:[%s2241_s28 + $0x200] sm:$0xff] (%p1949_p6)  ;;  %v1507_v12 = vld [vmem:[%s2241_s28 + $0x208] sm:$0xff] (%p1949_p6) }
 0x179   : > { %1382 = vst [vmem:[%s2380_s30 + $0x10] sm:$0xff] (%p1949_p6), %v1381_v13  ;;  %1384 = vst [vmem:[%s2380_s30 + $0x18] sm:$0xff] (%p1949_p6), %v1383_v0  ;;  %v1509_v13 = vld [vmem:[%s2241_s28 + $0x210] sm:$0xff] (%p1949_p6)  ;;  %v1511_v0 = vld [vmem:[%s2241_s28 + $0x218] sm:$0xff] (%p1949_p6) }
 0x17a   : > { %1506 = vst [vmem:[%s2380_s30 + $0x400] sm:$0xff] (%p1949_p6), %v1505_v8  ;;  %1508 = vst [vmem:[%s2380_s30 + $0x408] sm:$0xff] (%p1949_p6), %v1507_v12 }
 0x17b   : > { %v1042_v18 = vpop.f32.mrb[36].mxu0  ;;  %v1155_v19 = vpop.f32.mrb[36].mxu1  ;;  %v1385_v14 = vld [vmem:[%s2241_s28 + $0x20] sm:$0xff] (%p1949_p6)  ;;  %v1389_v16 = vld [vmem:[%s2241_s28 + $0x30] sm:$0xff] (%p1949_p6)  ;;  %1510 = vst [vmem:[%s2380_s30 + $0x410] sm:$0xff] (%p1949_p6), %v1509_v13  ;;  %1512 = vst [vmem:[%s2380_s30 + $0x418] sm:$0xff] (%p1949_p6), %v1511_v0 }
 0x17c   : > { %1244 = vst [vmem:[%s2241_s28 + $0xa0] sm:$0xff] %v1042_v18  ;;  %v1044_v20 = vpop.f32.mrb[37].mxu0  ;;  %1246 = vst [vmem:[%s2241_s28 + $0xb0] sm:$0xff] %v1155_v19  ;;  %v1157_v21 = vpop.f32.mrb[37].mxu1  ;;  %v1387_v15 = vld [vmem:[%s2241_s28 + $0x28] sm:$0xff] (%p1949_p6)  ;;  %v1391_v17 = vld [vmem:[%s2241_s28 + $0x38] sm:$0xff] (%p1949_p6) }
 0x17d   : > { %1245 = vst [vmem:[%s2241_s28 + $0xa8] sm:$0xff] %v1044_v20  ;;  %v1046_v22 = vpop.f32.mrb[38].mxu0  ;;  %1247 = vst [vmem:[%s2241_s28 + $0xb8] sm:$0xff] %v1157_v21  ;;  %v1159_v23 = vpop.f32.mrb[38].mxu1  ;;  %v1393_v18 = vld [vmem:[%s2241_s28 + $0x40] sm:$0xff] (%p1949_p6)  ;;  %v1395_v19 = vld [vmem:[%s2241_s28 + $0x48] sm:$0xff] (%p1949_p6) }
 0x17e   : > { %1252 = vst [vmem:[%s2241_s28 + $0xe0] sm:$0xff] %v1046_v22  ;;  %v1048_v24 = vpop.f32.mrb[39].mxu0  ;;  %1254 = vst [vmem:[%s2241_s28 + $0xf0] sm:$0xff] %v1159_v23  ;;  %v1161_v25 = vpop.f32.mrb[39].mxu1  ;;  %v1397_v20 = vld [vmem:[%s2241_s28 + $0x50] sm:$0xff] (%p1949_p6)  ;;  %v1399_v21 = vld [vmem:[%s2241_s28 + $0x58] sm:$0xff] (%p1949_p6) }
 0x17f   : > { %1253 = vst [vmem:[%s2241_s28 + $0xe8] sm:$0xff] %v1048_v24  ;;  %1255 = vst [vmem:[%s2241_s28 + $0xf8] sm:$0xff] %v1161_v25  ;;  %v1401_v22 = vld [vmem:[%s2241_s28 + $0x60] sm:$0xff] (%p1949_p6)  ;;  %v1403_v23 = vld [vmem:[%s2241_s28 + $0x68] sm:$0xff] (%p1949_p6) }
 0x180   : > { %1386 = vst [vmem:[%s2380_s30 + $0x20] sm:$0xff] (%p1949_p6), %v1385_v14  ;;  %1388 = vst [vmem:[%s2380_s30 + $0x28] sm:$0xff] (%p1949_p6), %v1387_v15  ;;  %v1405_v24 = vld [vmem:[%s2241_s28 + $0x70] sm:$0xff] (%p1949_p6)  ;;  %v1407_v25 = vld [vmem:[%s2241_s28 + $0x78] sm:$0xff] (%p1949_p6) }
 0x181   : > { %1390 = vst [vmem:[%s2380_s30 + $0x30] sm:$0xff] (%p1949_p6), %v1389_v16  ;;  %1392 = vst [vmem:[%s2380_s30 + $0x38] sm:$0xff] (%p1949_p6), %v1391_v17 }
 0x182   : > { %1394 = vst [vmem:[%s2380_s30 + $0x80] sm:$0xff] (%p1949_p6), %v1393_v18  ;;  %1396 = vst [vmem:[%s2380_s30 + $0x88] sm:$0xff] (%p1949_p6), %v1395_v19  ;;  %v1521_v18 = vld [vmem:[%s2241_s28 + $0x240] sm:$0xff] (%p1949_p6)  ;;  %v1523_v19 = vld [vmem:[%s2241_s28 + $0x248] sm:$0xff] (%p1949_p6) }
 0x183   : > { %v1052_v26 = vpop.f32.mrb[40].mxu0  ;;  %v1165_v27 = vpop.f32.mrb[40].mxu1  ;;  %1398 = vst [vmem:[%s2380_s30 + $0x90] sm:$0xff] (%p1949_p6), %v1397_v20  ;;  %1400 = vst [vmem:[%s2380_s30 + $0x98] sm:$0xff] (%p1949_p6), %v1399_v21  ;;  %v1525_v20 = vld [vmem:[%s2241_s28 + $0x250] sm:$0xff] (%p1949_p6)  ;;  %v1527_v21 = vld [vmem:[%s2241_s28 + $0x258] sm:$0xff] (%p1949_p6) }
 0x184   : > { %1260 = vst [vmem:[%s2241_s28 + $0x120] sm:$0xff] %v1052_v26  ;;  %v1054_v28 = vpop.f32.mrb[41].mxu0  ;;  %1262 = vst [vmem:[%s2241_s28 + $0x130] sm:$0xff] %v1165_v27  ;;  %v1167_v29 = vpop.f32.mrb[41].mxu1  ;;  %v1409_v26 = vld [vmem:[%s2241_s28 + $0x80] sm:$0xff] (%p1949_p6)  ;;  %v1411_v27 = vld [vmem:[%s2241_s28 + $0x88] sm:$0xff] (%p1949_p6) }
 0x185   : > { %1261 = vst [vmem:[%s2241_s28 + $0x128] sm:$0xff] %v1054_v28  ;;  %v1056_v30 = vpop.f32.mrb[42].mxu0  ;;  %1263 = vst [vmem:[%s2241_s28 + $0x138] sm:$0xff] %v1167_v29  ;;  %v1169_v31 = vpop.f32.mrb[42].mxu1  ;;  %v1413_v28 = vld [vmem:[%s2241_s28 + $0x90] sm:$0xff] (%p1949_p6)  ;;  %v1415_v29 = vld [vmem:[%s2241_s28 + $0x98] sm:$0xff] (%p1949_p6) }
 0x186   : > { %1268 = vst [vmem:[%s2241_s28 + $0x160] sm:$0xff] %v1056_v30  ;;  %v1058_v32 = vpop.f32.mrb[43].mxu0  ;;  %1270 = vst [vmem:[%s2241_s28 + $0x170] sm:$0xff] %v1169_v31  ;;  %v1171_v33 = vpop.f32.mrb[43].mxu1  ;;  %v1417_v30 = vld [vmem:[%s2241_s28 + $0xa0] sm:$0xff] (%p1949_p6)  ;;  %v1419_v31 = vld [vmem:[%s2241_s28 + $0xa8] sm:$0xff] (%p1949_p6) }
 0x187   : > { %1269 = vst [vmem:[%s2241_s28 + $0x168] sm:$0xff] %v1058_v32  ;;  %1271 = vst [vmem:[%s2241_s28 + $0x178] sm:$0xff] %v1171_v33  ;;  %v1421_v32 = vld [vmem:[%s2241_s28 + $0xb0] sm:$0xff] (%p1949_p6)  ;;  %v1423_v33 = vld [vmem:[%s2241_s28 + $0xb8] sm:$0xff] (%p1949_p6) }
 0x188   : > { %1402 = vst [vmem:[%s2380_s30 + $0xa0] sm:$0xff] (%p1949_p6), %v1401_v22  ;;  %1404 = vst [vmem:[%s2380_s30 + $0xa8] sm:$0xff] (%p1949_p6), %v1403_v23 }
 0x189   : > { %1406 = vst [vmem:[%s2380_s30 + $0xb0] sm:$0xff] (%p1949_p6), %v1405_v24  ;;  %1408 = vst [vmem:[%s2380_s30 + $0xb8] sm:$0xff] (%p1949_p6), %v1407_v25 }
 0x18a   : > { %1410 = vst [vmem:[%s2380_s30 + $0x100] sm:$0xff] (%p1949_p6), %v1409_v26  ;;  %1412 = vst [vmem:[%s2380_s30 + $0x108] sm:$0xff] (%p1949_p6), %v1411_v27  ;;  %v1537_v26 = vld [vmem:[%s2241_s28 + $0x280] sm:$0xff] (%p1949_p6)  ;;  %v1539_v27 = vld [vmem:[%s2241_s28 + $0x288] sm:$0xff] (%p1949_p6) }
 0x18b   : > { %v1062_v34 = vpop.f32.mrb[44].mxu0  ;;  %v1175_v35 = vpop.f32.mrb[44].mxu1  ;;  %1414 = vst [vmem:[%s2380_s30 + $0x110] sm:$0xff] (%p1949_p6), %v1413_v28  ;;  %1416 = vst [vmem:[%s2380_s30 + $0x118] sm:$0xff] (%p1949_p6), %v1415_v29  ;;  %v1541_v28 = vld [vmem:[%s2241_s28 + $0x290] sm:$0xff] (%p1949_p6)  ;;  %v1543_v29 = vld [vmem:[%s2241_s28 + $0x298] sm:$0xff] (%p1949_p6) }
 0x18c   : > { %1276 = vst [vmem:[%s2241_s28 + $0x1a0] sm:$0xff] %v1062_v34  ;;  %v1064_v36 = vpop.f32.mrb[45].mxu0  ;;  %1278 = vst [vmem:[%s2241_s28 + $0x1b0] sm:$0xff] %v1175_v35  ;;  %v1177_v37 = vpop.f32.mrb[45].mxu1  ;;  %v1425_v34 = vld [vmem:[%s2241_s28 + $0xc0] sm:$0xff] (%p1949_p6)  ;;  %v1427_v35 = vld [vmem:[%s2241_s28 + $0xc8] sm:$0xff] (%p1949_p6) }
 0x18d   : > { %1277 = vst [vmem:[%s2241_s28 + $0x1a8] sm:$0xff] %v1064_v36  ;;  %v1066_v38 = vpop.f32.mrb[46].mxu0  ;;  %1279 = vst [vmem:[%s2241_s28 + $0x1b8] sm:$0xff] %v1177_v37  ;;  %v1179_v39 = vpop.f32.mrb[46].mxu1  ;;  %v1429_v36 = vld [vmem:[%s2241_s28 + $0xd0] sm:$0xff] (%p1949_p6)  ;;  %v1431_v37 = vld [vmem:[%s2241_s28 + $0xd8] sm:$0xff] (%p1949_p6) }
 0x18e   : > { %1284 = vst [vmem:[%s2241_s28 + $0x1e0] sm:$0xff] %v1066_v38  ;;  %v1068_v40 = vpop.f32.mrb[47].mxu0  ;;  %1286 = vst [vmem:[%s2241_s28 + $0x1f0] sm:$0xff] %v1179_v39  ;;  %v1181_v41 = vpop.f32.mrb[47].mxu1  ;;  %v1433_v38 = vld [vmem:[%s2241_s28 + $0xe0] sm:$0xff] (%p1949_p6)  ;;  %v1435_v39 = vld [vmem:[%s2241_s28 + $0xe8] sm:$0xff] (%p1949_p6) }
 0x18f   : > { %1285 = vst [vmem:[%s2241_s28 + $0x1e8] sm:$0xff] %v1068_v40  ;;  %1287 = vst [vmem:[%s2241_s28 + $0x1f8] sm:$0xff] %v1181_v41  ;;  %v1437_v40 = vld [vmem:[%s2241_s28 + $0xf0] sm:$0xff] (%p1949_p6)  ;;  %v1439_v41 = vld [vmem:[%s2241_s28 + $0xf8] sm:$0xff] (%p1949_p6) }
 0x190   : > { %1418 = vst [vmem:[%s2380_s30 + $0x120] sm:$0xff] (%p1949_p6), %v1417_v30  ;;  %1420 = vst [vmem:[%s2380_s30 + $0x128] sm:$0xff] (%p1949_p6), %v1419_v31 }
 0x191   : > { %1422 = vst [vmem:[%s2380_s30 + $0x130] sm:$0xff] (%p1949_p6), %v1421_v32  ;;  %1424 = vst [vmem:[%s2380_s30 + $0x138] sm:$0xff] (%p1949_p6), %v1423_v33 }
 0x192   : > { %1426 = vst [vmem:[%s2380_s30 + $0x180] sm:$0xff] (%p1949_p6), %v1425_v34  ;;  %1428 = vst [vmem:[%s2380_s30 + $0x188] sm:$0xff] (%p1949_p6), %v1427_v35  ;;  %v1553_v34 = vld [vmem:[%s2241_s28 + $0x2c0] sm:$0xff] (%p1949_p6)  ;;  %v1555_v35 = vld [vmem:[%s2241_s28 + $0x2c8] sm:$0xff] (%p1949_p6) }
 0x193   : > { %v1072_v42 = vpop.f32.mrb[48].mxu0  ;;  %v1185_v43 = vpop.f32.mrb[48].mxu1  ;;  %1430 = vst [vmem:[%s2380_s30 + $0x190] sm:$0xff] (%p1949_p6), %v1429_v36  ;;  %1432 = vst [vmem:[%s2380_s30 + $0x198] sm:$0xff] (%p1949_p6), %v1431_v37  ;;  %v1557_v36 = vld [vmem:[%s2241_s28 + $0x2d0] sm:$0xff] (%p1949_p6)  ;;  %v1559_v37 = vld [vmem:[%s2241_s28 + $0x2d8] sm:$0xff] (%p1949_p6) }
 0x194   : > { %1292 = vst [vmem:[%s2241_s28 + $0x220] sm:$0xff] %v1072_v42  ;;  %v1074_v44 = vpop.f32.mrb[49].mxu0  ;;  %1294 = vst [vmem:[%s2241_s28 + $0x230] sm:$0xff] %v1185_v43  ;;  %v1187_v45 = vpop.f32.mrb[49].mxu1  ;;  %v1441_v42 = vld [vmem:[%s2241_s28 + $0x100] sm:$0xff] (%p1949_p6)  ;;  %v1443_v43 = vld [vmem:[%s2241_s28 + $0x108] sm:$0xff] (%p1949_p6) }
 0x195   : > { %1293 = vst [vmem:[%s2241_s28 + $0x228] sm:$0xff] %v1074_v44  ;;  %v1076_v46 = vpop.f32.mrb[50].mxu0  ;;  %1295 = vst [vmem:[%s2241_s28 + $0x238] sm:$0xff] %v1187_v45  ;;  %v1189_v47 = vpop.f32.mrb[50].mxu1  ;;  %v1445_v44 = vld [vmem:[%s2241_s28 + $0x110] sm:$0xff] (%p1949_p6)  ;;  %v1447_v45 = vld [vmem:[%s2241_s28 + $0x118] sm:$0xff] (%p1949_p6) }
 0x196   : > { %1300 = vst [vmem:[%s2241_s28 + $0x260] sm:$0xff] %v1076_v46  ;;  %v1078_v48 = vpop.f32.mrb[51].mxu0  ;;  %1302 = vst [vmem:[%s2241_s28 + $0x270] sm:$0xff] %v1189_v47  ;;  %v1191_v49 = vpop.f32.mrb[51].mxu1  ;;  %v1449_v46 = vld [vmem:[%s2241_s28 + $0x120] sm:$0xff] (%p1949_p6)  ;;  %v1451_v47 = vld [vmem:[%s2241_s28 + $0x128] sm:$0xff] (%p1949_p6) }
 0x197   : > { %1301 = vst [vmem:[%s2241_s28 + $0x268] sm:$0xff] %v1078_v48  ;;  %1303 = vst [vmem:[%s2241_s28 + $0x278] sm:$0xff] %v1191_v49  ;;  %v1453_v48 = vld [vmem:[%s2241_s28 + $0x130] sm:$0xff] (%p1949_p6)  ;;  %v1455_v49 = vld [vmem:[%s2241_s28 + $0x138] sm:$0xff] (%p1949_p6) }
 0x198   : > { %1434 = vst [vmem:[%s2380_s30 + $0x1a0] sm:$0xff] (%p1949_p6), %v1433_v38  ;;  %1436 = vst [vmem:[%s2380_s30 + $0x1a8] sm:$0xff] (%p1949_p6), %v1435_v39 }
 0x199   : > { %1438 = vst [vmem:[%s2380_s30 + $0x1b0] sm:$0xff] (%p1949_p6), %v1437_v40  ;;  %1440 = vst [vmem:[%s2380_s30 + $0x1b8] sm:$0xff] (%p1949_p6), %v1439_v41 }
 0x19a   : > { %1442 = vst [vmem:[%s2380_s30 + $0x200] sm:$0xff] (%p1949_p6), %v1441_v42  ;;  %1444 = vst [vmem:[%s2380_s30 + $0x208] sm:$0xff] (%p1949_p6), %v1443_v43  ;;  %v1569_v42 = vld [vmem:[%s2241_s28 + $0x300] sm:$0xff] (%p1949_p6)  ;;  %v1571_v43 = vld [vmem:[%s2241_s28 + $0x308] sm:$0xff] (%p1949_p6) }
 0x19b   : > { %v1082_v50 = vpop.f32.mrb[52].mxu0  ;;  %v1195_v51 = vpop.f32.mrb[52].mxu1  ;;  %1446 = vst [vmem:[%s2380_s30 + $0x210] sm:$0xff] (%p1949_p6), %v1445_v44  ;;  %1448 = vst [vmem:[%s2380_s30 + $0x218] sm:$0xff] (%p1949_p6), %v1447_v45  ;;  %v1513_v14 = vld [vmem:[%s2241_s28 + $0x220] sm:$0xff] (%p1949_p6)  ;;  %v1517_v16 = vld [vmem:[%s2241_s28 + $0x230] sm:$0xff] (%p1949_p6) }
 0x19c   : > { %1308 = vst [vmem:[%s2241_s28 + $0x2a0] sm:$0xff] %v1082_v50  ;;  %v1084_v52 = vpop.f32.mrb[53].mxu0  ;;  %1310 = vst [vmem:[%s2241_s28 + $0x2b0] sm:$0xff] %v1195_v51  ;;  %v1197_v53 = vpop.f32.mrb[53].mxu1  ;;  %v1457_v50 = vld [vmem:[%s2241_s28 + $0x140] sm:$0xff] (%p1949_p6)  ;;  %v1459_v51 = vld [vmem:[%s2241_s28 + $0x148] sm:$0xff] (%p1949_p6) }
 0x19d   : > { %1309 = vst [vmem:[%s2241_s28 + $0x2a8] sm:$0xff] %v1084_v52  ;;  %v1086_v54 = vpop.f32.mrb[54].mxu0  ;;  %1311 = vst [vmem:[%s2241_s28 + $0x2b8] sm:$0xff] %v1197_v53  ;;  %v1199_v55 = vpop.f32.mrb[54].mxu1  ;;  %v1461_v52 = vld [vmem:[%s2241_s28 + $0x150] sm:$0xff] (%p1949_p6)  ;;  %v1463_v53 = vld [vmem:[%s2241_s28 + $0x158] sm:$0xff] (%p1949_p6) }
 0x19e   : > { %1316 = vst [vmem:[%s2241_s28 + $0x2e0] sm:$0xff] %v1086_v54  ;;  %v1088_v56 = vpop.f32.mrb[55].mxu0  ;;  %1318 = vst [vmem:[%s2241_s28 + $0x2f0] sm:$0xff] %v1199_v55  ;;  %v1201_v57 = vpop.f32.mrb[55].mxu1  ;;  %v1465_v54 = vld [vmem:[%s2241_s28 + $0x160] sm:$0xff] (%p1949_p6)  ;;  %v1467_v55 = vld [vmem:[%s2241_s28 + $0x168] sm:$0xff] (%p1949_p6) }
 0x19f   : > { %1317 = vst [vmem:[%s2241_s28 + $0x2e8] sm:$0xff] %v1088_v56  ;;  %1319 = vst [vmem:[%s2241_s28 + $0x2f8] sm:$0xff] %v1201_v57  ;;  %v1469_v56 = vld [vmem:[%s2241_s28 + $0x170] sm:$0xff] (%p1949_p6)  ;;  %v1471_v57 = vld [vmem:[%s2241_s28 + $0x178] sm:$0xff] (%p1949_p6) }
 0x1a0   : > { %1450 = vst [vmem:[%s2380_s30 + $0x220] sm:$0xff] (%p1949_p6), %v1449_v46  ;;  %1452 = vst [vmem:[%s2380_s30 + $0x228] sm:$0xff] (%p1949_p6), %v1451_v47  ;;  %v1515_v15 = vld [vmem:[%s2241_s28 + $0x228] sm:$0xff] (%p1949_p6)  ;;  %v1519_v17 = vld [vmem:[%s2241_s28 + $0x238] sm:$0xff] (%p1949_p6) }
 0x1a1   : > { %1454 = vst [vmem:[%s2380_s30 + $0x230] sm:$0xff] (%p1949_p6), %v1453_v48  ;;  %1456 = vst [vmem:[%s2380_s30 + $0x238] sm:$0xff] (%p1949_p6), %v1455_v49  ;;  %v1529_v22 = vld [vmem:[%s2241_s28 + $0x260] sm:$0xff] (%p1949_p6)  ;;  %v1531_v23 = vld [vmem:[%s2241_s28 + $0x268] sm:$0xff] (%p1949_p6) }
 0x1a2   : > { %1458 = vst [vmem:[%s2380_s30 + $0x280] sm:$0xff] (%p1949_p6), %v1457_v50  ;;  %1460 = vst [vmem:[%s2380_s30 + $0x288] sm:$0xff] (%p1949_p6), %v1459_v51  ;;  %v1533_v24 = vld [vmem:[%s2241_s28 + $0x270] sm:$0xff] (%p1949_p6)  ;;  %v1535_v25 = vld [vmem:[%s2241_s28 + $0x278] sm:$0xff] (%p1949_p6) }
 0x1a3   : > { %v1092_v58 = vpop.f32.mrb[56].mxu0  ;;  %v1205_v59 = vpop.f32.mrb[56].mxu1  ;;  %1462 = vst [vmem:[%s2380_s30 + $0x290] sm:$0xff] (%p1949_p6), %v1461_v52  ;;  %1464 = vst [vmem:[%s2380_s30 + $0x298] sm:$0xff] (%p1949_p6), %v1463_v53  ;;  %v1545_v30 = vld [vmem:[%s2241_s28 + $0x2a0] sm:$0xff] (%p1949_p6)  ;;  %v1549_v32 = vld [vmem:[%s2241_s28 + $0x2b0] sm:$0xff] (%p1949_p6) }
 0x1a4   : > { %1324 = vst [vmem:[%s2241_s28 + $0x320] sm:$0xff] %v1092_v58  ;;  %v1094_v60 = vpop.f32.mrb[57].mxu0  ;;  %1326 = vst [vmem:[%s2241_s28 + $0x330] sm:$0xff] %v1205_v59  ;;  %v1207_v61 = vpop.f32.mrb[57].mxu1  ;;  %v1473_v58 = vld [vmem:[%s2241_s28 + $0x180] sm:$0xff] (%p1949_p6)  ;;  %v1475_v59 = vld [vmem:[%s2241_s28 + $0x188] sm:$0xff] (%p1949_p6) }
 0x1a5   : > { %1325 = vst [vmem:[%s2241_s28 + $0x328] sm:$0xff] %v1094_v60  ;;  %v1096_v62 = vpop.f32.mrb[58].mxu0  ;;  %1327 = vst [vmem:[%s2241_s28 + $0x338] sm:$0xff] %v1207_v61  ;;  %v1209_v63 = vpop.f32.mrb[58].mxu1  ;;  %v1477_v60 = vld [vmem:[%s2241_s28 + $0x190] sm:$0xff] (%p1949_p6)  ;;  %v1479_v61 = vld [vmem:[%s2241_s28 + $0x198] sm:$0xff] (%p1949_p6) }
 0x1a6   : > { %1332 = vst [vmem:[%s2241_s28 + $0x360] sm:$0xff] %v1096_v62  ;;  %v1098_v1 = vpop.f32.mrb[59].mxu0  ;;  %1334 = vst [vmem:[%s2241_s28 + $0x370] sm:$0xff] %v1209_v63  ;;  %v1211_v2 = vpop.f32.mrb[59].mxu1  ;;  %v1481_v62 = vld [vmem:[%s2241_s28 + $0x1a0] sm:$0xff] (%p1949_p6)  ;;  %v1483_v63 = vld [vmem:[%s2241_s28 + $0x1a8] sm:$0xff] (%p1949_p6) }
 0x1a7   : > { %1333 = vst [vmem:[%s2241_s28 + $0x368] sm:$0xff] %v1098_v1  ;;  %1335 = vst [vmem:[%s2241_s28 + $0x378] sm:$0xff] %v1211_v2  ;;  %v1485_v1 = vld [vmem:[%s2241_s28 + $0x1b0] sm:$0xff] (%p1949_p6)  ;;  %v1487_v2 = vld [vmem:[%s2241_s28 + $0x1b8] sm:$0xff] (%p1949_p6) }
 0x1a8   : > { %1466 = vst [vmem:[%s2380_s30 + $0x2a0] sm:$0xff] (%p1949_p6), %v1465_v54  ;;  %1468 = vst [vmem:[%s2380_s30 + $0x2a8] sm:$0xff] (%p1949_p6), %v1467_v55  ;;  %v1547_v31 = vld [vmem:[%s2241_s28 + $0x2a8] sm:$0xff] (%p1949_p6)  ;;  %v1551_v33 = vld [vmem:[%s2241_s28 + $0x2b8] sm:$0xff] (%p1949_p6) }
 0x1a9   : > { %1358 = sbr.rel (!%p1949_p6) target bundleno = 468 (0x1d4), region = 55  ;;  %1470 = vst [vmem:[%s2380_s30 + $0x2b0] sm:$0xff] (%p1949_p6), %v1469_v56  ;;  %1472 = vst [vmem:[%s2380_s30 + $0x2b8] sm:$0xff] (%p1949_p6), %v1471_v57  ;;  %v1561_v38 = vld [vmem:[%s2241_s28 + $0x2e0] sm:$0xff] (%p1949_p6)  ;;  %v1563_v39 = vld [vmem:[%s2241_s28 + $0x2e8] sm:$0xff] (%p1949_p6) }
 0x1aa   : > { %1474 = vst [vmem:[%s2380_s30 + $0x300] sm:$0xff] (%p1949_p6), %v1473_v58  ;;  %1476 = vst [vmem:[%s2380_s30 + $0x308] sm:$0xff] (%p1949_p6), %v1475_v59  ;;  %v1565_v40 = vld [vmem:[%s2241_s28 + $0x2f0] sm:$0xff] (%p1949_p6)  ;;  %v1567_v41 = vld [vmem:[%s2241_s28 + $0x2f8] sm:$0xff] (%p1949_p6) }
 0x1ab   : > { %v1102_v3 = vpop.f32.mrb[60].mxu0  ;;  %v1215_v4 = vpop.f32.mrb[60].mxu1  ;;  %1478 = vst [vmem:[%s2380_s30 + $0x310] sm:$0xff] (%p1949_p6), %v1477_v60  ;;  %1480 = vst [vmem:[%s2380_s30 + $0x318] sm:$0xff] (%p1949_p6), %v1479_v61  ;;  %v1573_v44 = vld [vmem:[%s2241_s28 + $0x310] sm:$0xff] (%p1949_p6)  ;;  %v1575_v45 = vld [vmem:[%s2241_s28 + $0x318] sm:$0xff] (%p1949_p6) }
 0x1ac   : > { %1340 = vst [vmem:[%s2241_s28 + $0x3a0] sm:$0xff] %v1102_v3  ;;  %v1104_v5 = vpop.f32.mrb[61].mxu0  ;;  %1342 = vst [vmem:[%s2241_s28 + $0x3b0] sm:$0xff] %v1215_v4  ;;  %v1217_v6 = vpop.f32.mrb[61].mxu1  ;;  %v1489_v3 = vld [vmem:[%s2241_s28 + $0x1c0] sm:$0xff] (%p1949_p6)  ;;  %v1491_v4 = vld [vmem:[%s2241_s28 + $0x1c8] sm:$0xff] (%p1949_p6) }
 0x1ad   : > { %1341 = vst [vmem:[%s2241_s28 + $0x3a8] sm:$0xff] %v1104_v5  ;;  %v1106_v7 = vpop.f32.mrb[62].mxu0  ;;  %1343 = vst [vmem:[%s2241_s28 + $0x3b8] sm:$0xff] %v1217_v6  ;;  %v1219_v9 = vpop.f32.mrb[62].mxu1  ;;  %v1493_v5 = vld [vmem:[%s2241_s28 + $0x1d0] sm:$0xff] (%p1949_p6)  ;;  %v1495_v6 = vld [vmem:[%s2241_s28 + $0x1d8] sm:$0xff] (%p1949_p6) }
 0x1ae   : > { %1348 = vst [vmem:[%s2241_s28 + $0x3e0] sm:$0xff] %v1106_v7  ;;  %v1108_v10 = vpop.f32.mrb[63].mxu0  ;;  %1350 = vst [vmem:[%s2241_s28 + $0x3f0] sm:$0xff] %v1219_v9  ;;  %v1221_v11 = vpop.f32.mrb[63].mxu1  ;;  %v1497_v7 = vld [vmem:[%s2241_s28 + $0x1e0] sm:$0xff] (%p1949_p6)  ;;  %v1499_v9 = vld [vmem:[%s2241_s28 + $0x1e8] sm:$0xff] (%p1949_p6) }
 0x1af   : > { %1349 = vst [vmem:[%s2241_s28 + $0x3e8] sm:$0xff] %v1108_v10  ;;  %1351 = vst [vmem:[%s2241_s28 + $0x3f8] sm:$0xff] %v1221_v11  ;;  %v1501_v10 = vld [vmem:[%s2241_s28 + $0x1f0] sm:$0xff] (%p1949_p6)  ;;  %v1503_v11 = vld [vmem:[%s2241_s28 + $0x1f8] sm:$0xff] (%p1949_p6) }
 0x1b0   : > { %1482 = vst [vmem:[%s2380_s30 + $0x320] sm:$0xff] %v1481_v62  ;;  %1484 = vst [vmem:[%s2380_s30 + $0x328] sm:$0xff] %v1483_v63  ;;  %v1577_v46 = vld [vmem:[%s2241_s28 + $0x320] sm:$0xff]  ;;  %v1579_v47 = vld [vmem:[%s2241_s28 + $0x328] sm:$0xff] }
 0x1b1   : > { %1486 = vst [vmem:[%s2380_s30 + $0x330] sm:$0xff] %v1485_v1  ;;  %1488 = vst [vmem:[%s2380_s30 + $0x338] sm:$0xff] %v1487_v2  ;;  %v1581_v48 = vld [vmem:[%s2241_s28 + $0x330] sm:$0xff]  ;;  %v1583_v49 = vld [vmem:[%s2241_s28 + $0x338] sm:$0xff] }
 0x1b2   : > { %1490 = vst [vmem:[%s2380_s30 + $0x380] sm:$0xff] %v1489_v3  ;;  %1492 = vst [vmem:[%s2380_s30 + $0x388] sm:$0xff] %v1491_v4  ;;  %v1585_v50 = vld [vmem:[%s2241_s28 + $0x340] sm:$0xff]  ;;  %v1587_v51 = vld [vmem:[%s2241_s28 + $0x348] sm:$0xff] }
 0x1b3   : > { %1494 = vst [vmem:[%s2380_s30 + $0x390] sm:$0xff] %v1493_v5  ;;  %1496 = vst [vmem:[%s2380_s30 + $0x398] sm:$0xff] %v1495_v6  ;;  %v1589_v52 = vld [vmem:[%s2241_s28 + $0x350] sm:$0xff]  ;;  %v1591_v53 = vld [vmem:[%s2241_s28 + $0x358] sm:$0xff] }
 0x1b4   : > { %1498 = vst [vmem:[%s2380_s30 + $0x3a0] sm:$0xff] %v1497_v7  ;;  %1500 = vst [vmem:[%s2380_s30 + $0x3a8] sm:$0xff] %v1499_v9  ;;  %v1593_v54 = vld [vmem:[%s2241_s28 + $0x360] sm:$0xff]  ;;  %v1595_v55 = vld [vmem:[%s2241_s28 + $0x368] sm:$0xff] }
 0x1b5   : > { %1502 = vst [vmem:[%s2380_s30 + $0x3b0] sm:$0xff] %v1501_v10  ;;  %1504 = vst [vmem:[%s2380_s30 + $0x3b8] sm:$0xff] %v1503_v11  ;;  %v1597_v56 = vld [vmem:[%s2241_s28 + $0x370] sm:$0xff]  ;;  %v1599_v57 = vld [vmem:[%s2241_s28 + $0x378] sm:$0xff] }
 0x1b6   : > { %1514 = vst [vmem:[%s2380_s30 + $0x420] sm:$0xff] %v1513_v14  ;;  %1516 = vst [vmem:[%s2380_s30 + $0x428] sm:$0xff] %v1515_v15  ;;  %v1601_v58 = vld [vmem:[%s2241_s28 + $0x380] sm:$0xff]  ;;  %v1603_v59 = vld [vmem:[%s2241_s28 + $0x388] sm:$0xff] }
 0x1b7   : > { %1518 = vst [vmem:[%s2380_s30 + $0x430] sm:$0xff] %v1517_v16  ;;  %1520 = vst [vmem:[%s2380_s30 + $0x438] sm:$0xff] %v1519_v17  ;;  %v1605_v60 = vld [vmem:[%s2241_s28 + $0x390] sm:$0xff]  ;;  %v1607_v61 = vld [vmem:[%s2241_s28 + $0x398] sm:$0xff] }
 0x1b8   : > { %1522 = vst [vmem:[%s2380_s30 + $0x480] sm:$0xff] %v1521_v18  ;;  %1524 = vst [vmem:[%s2380_s30 + $0x488] sm:$0xff] %v1523_v19  ;;  %v1609_v62 = vld [vmem:[%s2241_s28 + $0x3a0] sm:$0xff]  ;;  %v1611_v63 = vld [vmem:[%s2241_s28 + $0x3a8] sm:$0xff] }
 0x1b9   : > { %1526 = vst [vmem:[%s2380_s30 + $0x490] sm:$0xff] %v1525_v20  ;;  %1528 = vst [vmem:[%s2380_s30 + $0x498] sm:$0xff] %v1527_v21  ;;  %v1613_v1 = vld [vmem:[%s2241_s28 + $0x3b0] sm:$0xff]  ;;  %v1615_v2 = vld [vmem:[%s2241_s28 + $0x3b8] sm:$0xff] }
 0x1ba   : > { %1530 = vst [vmem:[%s2380_s30 + $0x4a0] sm:$0xff] %v1529_v22  ;;  %1532 = vst [vmem:[%s2380_s30 + $0x4a8] sm:$0xff] %v1531_v23  ;;  %v1617_v3 = vld [vmem:[%s2241_s28 + $0x3c0] sm:$0xff]  ;;  %v1619_v4 = vld [vmem:[%s2241_s28 + $0x3c8] sm:$0xff] }
 0x1bb   : > { %1534 = vst [vmem:[%s2380_s30 + $0x4b0] sm:$0xff] %v1533_v24  ;;  %1536 = vst [vmem:[%s2380_s30 + $0x4b8] sm:$0xff] %v1535_v25  ;;  %v1621_v5 = vld [vmem:[%s2241_s28 + $0x3d0] sm:$0xff]  ;;  %v1623_v6 = vld [vmem:[%s2241_s28 + $0x3d8] sm:$0xff] }
 0x1bc   : > { %1538 = vst [vmem:[%s2380_s30 + $0x500] sm:$0xff] %v1537_v26  ;;  %1540 = vst [vmem:[%s2380_s30 + $0x508] sm:$0xff] %v1539_v27  ;;  %v1625_v7 = vld [vmem:[%s2241_s28 + $0x3e0] sm:$0xff]  ;;  %v1627_v9 = vld [vmem:[%s2241_s28 + $0x3e8] sm:$0xff] }
 0x1bd   : > { %1542 = vst [vmem:[%s2380_s30 + $0x510] sm:$0xff] %v1541_v28  ;;  %1544 = vst [vmem:[%s2380_s30 + $0x518] sm:$0xff] %v1543_v29  ;;  %v1629_v10 = vld [vmem:[%s2241_s28 + $0x3f0] sm:$0xff]  ;;  %v1631_v11 = vld [vmem:[%s2241_s28 + $0x3f8] sm:$0xff] }
 0x1be   : > { %1546 = vst [vmem:[%s2380_s30 + $0x520] sm:$0xff] %v1545_v30  ;;  %1548 = vst [vmem:[%s2380_s30 + $0x528] sm:$0xff] %v1547_v31 }
 0x1bf   : > { %1550 = vst [vmem:[%s2380_s30 + $0x530] sm:$0xff] %v1549_v32  ;;  %1552 = vst [vmem:[%s2380_s30 + $0x538] sm:$0xff] %v1551_v33 }
 0x1c0   : > { %1554 = vst [vmem:[%s2380_s30 + $0x580] sm:$0xff] %v1553_v34  ;;  %1556 = vst [vmem:[%s2380_s30 + $0x588] sm:$0xff] %v1555_v35 }
 0x1c1   : > { %1558 = vst [vmem:[%s2380_s30 + $0x590] sm:$0xff] %v1557_v36  ;;  %1560 = vst [vmem:[%s2380_s30 + $0x598] sm:$0xff] %v1559_v37 }
 0x1c2   : > { %1562 = vst [vmem:[%s2380_s30 + $0x5a0] sm:$0xff] %v1561_v38  ;;  %1564 = vst [vmem:[%s2380_s30 + $0x5a8] sm:$0xff] %v1563_v39 }
 0x1c3   : > { %1566 = vst [vmem:[%s2380_s30 + $0x5b0] sm:$0xff] %v1565_v40  ;;  %1568 = vst [vmem:[%s2380_s30 + $0x5b8] sm:$0xff] %v1567_v41 }
 0x1c4   : > { %1570 = vst [vmem:[%s2380_s30 + $0x600] sm:$0xff] %v1569_v42  ;;  %1572 = vst [vmem:[%s2380_s30 + $0x608] sm:$0xff] %v1571_v43 }
 0x1c5   : > { %1574 = vst [vmem:[%s2380_s30 + $0x610] sm:$0xff] %v1573_v44  ;;  %1576 = vst [vmem:[%s2380_s30 + $0x618] sm:$0xff] %v1575_v45 }
 0x1c6   : > { %1578 = vst [vmem:[%s2380_s30 + $0x620] sm:$0xff] %v1577_v46  ;;  %1580 = vst [vmem:[%s2380_s30 + $0x628] sm:$0xff] %v1579_v47 }
 0x1c7   : > { %1582 = vst [vmem:[%s2380_s30 + $0x630] sm:$0xff] %v1581_v48  ;;  %1584 = vst [vmem:[%s2380_s30 + $0x638] sm:$0xff] %v1583_v49 }
 0x1c8   : > { %1586 = vst [vmem:[%s2380_s30 + $0x680] sm:$0xff] %v1585_v50  ;;  %1588 = vst [vmem:[%s2380_s30 + $0x688] sm:$0xff] %v1587_v51 }
 0x1c9   : > { %1590 = vst [vmem:[%s2380_s30 + $0x690] sm:$0xff] %v1589_v52  ;;  %1592 = vst [vmem:[%s2380_s30 + $0x698] sm:$0xff] %v1591_v53 }
 0x1ca   : > { %1594 = vst [vmem:[%s2380_s30 + $0x6a0] sm:$0xff] %v1593_v54  ;;  %1596 = vst [vmem:[%s2380_s30 + $0x6a8] sm:$0xff] %v1595_v55 }
 0x1cb   : > { %1598 = vst [vmem:[%s2380_s30 + $0x6b0] sm:$0xff] %v1597_v56  ;;  %1600 = vst [vmem:[%s2380_s30 + $0x6b8] sm:$0xff] %v1599_v57 }
 0x1cc   : > { %1602 = vst [vmem:[%s2380_s30 + $0x700] sm:$0xff] %v1601_v58  ;;  %1604 = vst [vmem:[%s2380_s30 + $0x708] sm:$0xff] %v1603_v59 }
 0x1cd   : > { %1606 = vst [vmem:[%s2380_s30 + $0x710] sm:$0xff] %v1605_v60  ;;  %1608 = vst [vmem:[%s2380_s30 + $0x718] sm:$0xff] %v1607_v61 }
 0x1ce   : > { %1610 = vst [vmem:[%s2380_s30 + $0x720] sm:$0xff] %v1609_v62  ;;  %1612 = vst [vmem:[%s2380_s30 + $0x728] sm:$0xff] %v1611_v63 }
 0x1cf   : > { %1614 = vst [vmem:[%s2380_s30 + $0x730] sm:$0xff] %v1613_v1  ;;  %1616 = vst [vmem:[%s2380_s30 + $0x738] sm:$0xff] %v1615_v2 }
 0x1d0   : > { %1618 = vst [vmem:[%s2380_s30 + $0x780] sm:$0xff] %v1617_v3  ;;  %1620 = vst [vmem:[%s2380_s30 + $0x788] sm:$0xff] %v1619_v4 }
 0x1d1   : > { %1622 = vst [vmem:[%s2380_s30 + $0x790] sm:$0xff] %v1621_v5  ;;  %1624 = vst [vmem:[%s2380_s30 + $0x798] sm:$0xff] %v1623_v6 }
 0x1d2   : > { %1626 = vst [vmem:[%s2380_s30 + $0x7a0] sm:$0xff] %v1625_v7  ;;  %1628 = vst [vmem:[%s2380_s30 + $0x7a8] sm:$0xff] %v1627_v9 }
 0x1d3   : > { %1630 = vst [vmem:[%s2380_s30 + $0x7b0] sm:$0xff] %v1629_v10  ;;  %1632 = vst [vmem:[%s2380_s30 + $0x7b8] sm:$0xff] %v1631_v11 }
 0x1d4 PF: > { %s12_s13 = sadd.s32 1, %s1896_s13   ;;  %s2654_s9 = smov %s1884_s10 }
 0x1d5   : > { %p9_p11 = scmp.ge.s32.totalorder %s12_s13, 4   ;;  %s2655_s10 = smov %s1954_s19 }
 0x1d6   : > { %s2656_s11 = smov %s1892_s12  ;;  %s2657_s12 = smov %s2659_s14 }
 0x1d7   :  { %11 = sbr.rel (!%p9_p11) target bundleno = 3 (0x3), region = 112 }

// kernel: small_deconvnet_forward.6
= control target key start
LH: loop header
LB: loop body
LE: loop exit
PB: predicated region body
PF: predicated region fallthrough
CT: control target
= control target key end

     0   :  { %s2765_s9 = smov 0   ;;  %s2767_s10 = smov 0   ;;  %s4041_s0 = inlined_call_operand.vmem [shape: bf16[512,128], index: 0, kind: input, shape index: {}]   ;;  %s4042_s1 = inlined_call_operand.vmem [shape: bf16[128,4096], index: 1, kind: input, shape index: {}]   ;;  %s4043_s2 = inlined_call_operand.vmem [shape: f32[512,4096], index: 2, kind: output, shape index: {}]  }
   0x1   :  { %s2769_s11 = smov 0   ;;  %s2771_s12 = smov 0  }
   0x2   :  { %s2773_s13 = smov 0   ;;  %s2775_s14 = smov 0  }
   0x3   :  { %s2777_s15 = smov 0   ;;  %s2779_s16 = smov 0  }
   0x4   :  { %s2781_s17 = smov 0  }
   0x5 LB: > { %s2487_s18 = sadd.s32 4294967295, %s2747_s17   ;;  %s21_s19 = sadd.s32 1, %s2739_s15  ;;  %s2747_s17 = sphi %s2781_s17, %s12_s17   ;;  %s2743_s16 = sphi %s2779_s16, %s4053_s16   ;;  %s2739_s15 = sphi %s2777_s15, %s4052_s15   ;;  %s2735_s14 = sphi %s2775_s14, %s4051_s14   ;;  %s2731_s13 = sphi %s2773_s13, %s4050_s13   ;;  %s2727_s12 = sphi %s2771_s12, %s4049_s12   ;;  %s2723_s11 = sphi %s2769_s11, %s4048_s11   ;;  %s2719_s10 = sphi %s2767_s10, %s4047_s10   ;;  %s2715_s9 = sphi %s2765_s9, %s4046_s9  }
   0x6   : > { %p22_p0 = scmp.ge.s32.totalorder %s21_s19, 4  ;;  %s24_s20 = sadd.s32 1, %s2743_s16 }
   0x7   : > { %s57_s21 = sadd.s32 1, %s2727_s12  ;;  %p64_p1 = scmp.ne.s32.totalorder %s2727_s12, %s2723_s11 }
   0x8   : > { %s4055_s19 = smov (%p22_p0, %s21_s19), 0  ;;  %s4057_s20 = smov (!%p22_p0, %s24_s20), %s2743_s16 }
   0x9   : > { %s54_s22 = ssub.s32 %s2739_s15, %s4055_s19  ;;  %p65_p2 = scmp.eq.s32.totalorder %s2747_s17, 0 }
   0xa   : > { %p26_p3 = scmp.ge.s32.totalorder %s4057_s20, 2  ;;  %p55_p4 = scmp.eq.s32.totalorder %s54_s22, 0 }
   0xb   : > { %p66_p5 = por %p65_p2, %p64_p1  ;;  %s85_s23 = sadd.s32 1, %s2719_s10 }
   0xc   : > { %s4059_s20 = smov (%p26_p3, %s4057_s20), 0  ;;  %p95_p6 = scmp.ne.s32.totalorder %s2719_s10, %s2715_s9 }
   0xd   : > { %s2826_s24 = scalar_select %p55_p4, %s2727_s12, %s57_s21  }
   0xe   : > { %s80_s25 = ssub.s32 %s2743_s16, %s4059_s20  ;;  %p96_p7 = scmp.eq.s32.totalorder %s2487_s18, 7 }
   0xf   : > { %s82_s26 = sor.u32 %s80_s25, %s54_s22  ;;  %p2490_p10 = scmp.ge.s32.totalorder %s2747_s17, 8 }
  0x10   : > { %p83_p8 = scmp.eq.s32.totalorder %s82_s26, 0  ;;  %p2832_p9 = por %p96_p7, %p95_p6 }
  0x11   : > { %118 = sbr.rel (%p2490_p10) target bundleno = 60 (0x3c), region = 16 }
  0x12   : > { %s2837_s28 = scalar_select %p83_p8, %s2719_s10, %s85_s23  }
  0x18   : > { %130 = sbr.rel (!%p66_p5) target bundleno = 60 (0x3c), region = 24  ;;  %s132_s29 = sand.u32 (%p66_p5), 1, %s2727_s12  }
  0x19   : > { %s2586_s30 = sshll.u32 (%p66_p5), %s2739_s15, 5  ;;  %s2491_s3 = sshll.u32 (%p66_p5), %s132_s29, 9 }
  0x1a   : > { %s2845_s6 = scalar_lea.vmem (%p66_p5), %s4042_s1, %s2586_s30  ;;  %s2850_s7 = scalar_lea.vmem (%p66_p5), [#allocation2], %s2491_s3 }
  0x1b   : > { %v150_v0 = vld [vmem:[%s2845_s6] sm:$0xff] (%p66_p5)  ;;  %v152_v1 = vld [vmem:[%s2845_s6 + $0x8] sm:$0xff] (%p66_p5)  ;;  %v154_v2 = vld [vmem:[%s2845_s6 + $0x10] sm:$0xff] (%p66_p5) }
  0x1c   : > { %151 = vst [vmem:[%s2850_s7] sm:$0xff] (%p66_p5), %v150_v0  ;;  %153 = vst [vmem:[%s2850_s7 + $0x8] sm:$0xff] (%p66_p5), %v152_v1  ;;  %v156_v3 = vld [vmem:[%s2845_s6 + $0x18] sm:$0xff] (%p66_p5)  ;;  %v158_v4 = vld [vmem:[%s2845_s6 + $0x80] sm:$0xff] (%p66_p5) }
  0x1d   : > { %155 = vst [vmem:[%s2850_s7 + $0x10] sm:$0xff] (%p66_p5), %v154_v2  ;;  %v160_v5 = vld [vmem:[%s2845_s6 + $0x88] sm:$0xff] (%p66_p5)  ;;  %157 = vst [vmem:[%s2850_s7 + $0x18] sm:$0xff] (%p66_p5), %v156_v3  ;;  %v162_v6 = vld [vmem:[%s2845_s6 + $0x90] sm:$0xff] (%p66_p5) }
  0x1e   : > { %159 = vst [vmem:[%s2850_s7 + $0x20] sm:$0xff] (%p66_p5), %v158_v4  ;;  %161 = vst [vmem:[%s2850_s7 + $0x28] sm:$0xff] (%p66_p5), %v160_v5  ;;  %v164_v7 = vld [vmem:[%s2845_s6 + $0x98] sm:$0xff] (%p66_p5)  ;;  %v166_v8 = vld [vmem:[%s2845_s6 + $0x100] sm:$0xff] (%p66_p5) }
  0x1f   : > { %163 = vst [vmem:[%s2850_s7 + $0x30] sm:$0xff] %v162_v6  ;;  %165 = vst [vmem:[%s2850_s7 + $0x38] sm:$0xff] %v164_v7  ;;  %v168_v9 = vld [vmem:[%s2845_s6 + $0x108] sm:$0xff]  ;;  %v170_v10 = vld [vmem:[%s2845_s6 + $0x110] sm:$0xff] }
  0x20   : > { %167 = vst [vmem:[%s2850_s7 + $0x40] sm:$0xff] %v166_v8  ;;  %v172_v11 = vld [vmem:[%s2845_s6 + $0x118] sm:$0xff]  ;;  %169 = vst [vmem:[%s2850_s7 + $0x48] sm:$0xff] %v168_v9  ;;  %v174_v12 = vld [vmem:[%s2845_s6 + $0x180] sm:$0xff] }
  0x21   : > { %171 = vst [vmem:[%s2850_s7 + $0x50] sm:$0xff] %v170_v10  ;;  %173 = vst [vmem:[%s2850_s7 + $0x58] sm:$0xff] %v172_v11  ;;  %v176_v13 = vld [vmem:[%s2845_s6 + $0x188] sm:$0xff]  ;;  %v178_v14 = vld [vmem:[%s2845_s6 + $0x190] sm:$0xff] }
  0x22   : > { %175 = vst [vmem:[%s2850_s7 + $0x60] sm:$0xff] %v174_v12  ;;  %177 = vst [vmem:[%s2850_s7 + $0x68] sm:$0xff] %v176_v13  ;;  %v180_v15 = vld [vmem:[%s2845_s6 + $0x198] sm:$0xff]  ;;  %v182_v16 = vld [vmem:[%s2845_s6 + $0x200] sm:$0xff] }
  0x23   : > { %179 = vst [vmem:[%s2850_s7 + $0x70] sm:$0xff] %v178_v14  ;;  %v184_v17 = vld [vmem:[%s2845_s6 + $0x208] sm:$0xff]  ;;  %181 = vst [vmem:[%s2850_s7 + $0x78] sm:$0xff] %v180_v15  ;;  %v186_v18 = vld [vmem:[%s2845_s6 + $0x210] sm:$0xff] }
  0x24   : > { %183 = vst [vmem:[%s2850_s7 + $0x80] sm:$0xff] %v182_v16  ;;  %185 = vst [vmem:[%s2850_s7 + $0x88] sm:$0xff] %v184_v17  ;;  %v188_v19 = vld [vmem:[%s2845_s6 + $0x218] sm:$0xff]  ;;  %v190_v20 = vld [vmem:[%s2845_s6 + $0x280] sm:$0xff] }
  0x25   : > { %187 = vst [vmem:[%s2850_s7 + $0x90] sm:$0xff] %v186_v18  ;;  %189 = vst [vmem:[%s2850_s7 + $0x98] sm:$0xff] %v188_v19  ;;  %v192_v21 = vld [vmem:[%s2845_s6 + $0x288] sm:$0xff]  ;;  %v194_v22 = vld [vmem:[%s2845_s6 + $0x290] sm:$0xff] }
  0x26   : > { %191 = vst [vmem:[%s2850_s7 + $0xa0] sm:$0xff] %v190_v20  ;;  %v196_v23 = vld [vmem:[%s2845_s6 + $0x298] sm:$0xff]  ;;  %193 = vst [vmem:[%s2850_s7 + $0xa8] sm:$0xff] %v192_v21  ;;  %v198_v24 = vld [vmem:[%s2845_s6 + $0x300] sm:$0xff] }
  0x27   : > { %195 = vst [vmem:[%s2850_s7 + $0xb0] sm:$0xff] %v194_v22  ;;  %197 = vst [vmem:[%s2850_s7 + $0xb8] sm:$0xff] %v196_v23  ;;  %v200_v25 = vld [vmem:[%s2845_s6 + $0x308] sm:$0xff]  ;;  %v202_v26 = vld [vmem:[%s2845_s6 + $0x310] sm:$0xff] }
  0x28   : > { %199 = vst [vmem:[%s2850_s7 + $0xc0] sm:$0xff] %v198_v24  ;;  %201 = vst [vmem:[%s2850_s7 + $0xc8] sm:$0xff] %v200_v25  ;;  %v204_v27 = vld [vmem:[%s2845_s6 + $0x318] sm:$0xff]  ;;  %v206_v28 = vld [vmem:[%s2845_s6 + $0x380] sm:$0xff] }
  0x29   : > { %203 = vst [vmem:[%s2850_s7 + $0xd0] sm:$0xff] %v202_v26  ;;  %v208_v29 = vld [vmem:[%s2845_s6 + $0x388] sm:$0xff]  ;;  %205 = vst [vmem:[%s2850_s7 + $0xd8] sm:$0xff] %v204_v27  ;;  %v210_v30 = vld [vmem:[%s2845_s6 + $0x390] sm:$0xff] }
  0x2a   : > { %207 = vst [vmem:[%s2850_s7 + $0xe0] sm:$0xff] %v206_v28  ;;  %209 = vst [vmem:[%s2850_s7 + $0xe8] sm:$0xff] %v208_v29  ;;  %v212_v31 = vld [vmem:[%s2845_s6 + $0x398] sm:$0xff]  ;;  %v214_v32 = vld [vmem:[%s2845_s6 + $0x400] sm:$0xff] }
  0x2b   : > { %211 = vst [vmem:[%s2850_s7 + $0xf0] sm:$0xff] %v210_v30  ;;  %213 = vst [vmem:[%s2850_s7 + $0xf8] sm:$0xff] %v212_v31  ;;  %v216_v33 = vld [vmem:[%s2845_s6 + $0x408] sm:$0xff]  ;;  %v218_v34 = vld [vmem:[%s2845_s6 + $0x410] sm:$0xff] }
  0x2c   : > { %215 = vst [vmem:[%s2850_s7 + $0x100] sm:$0xff] %v214_v32  ;;  %v220_v35 = vld [vmem:[%s2845_s6 + $0x418] sm:$0xff]  ;;  %217 = vst [vmem:[%s2850_s7 + $0x108] sm:$0xff] %v216_v33  ;;  %v222_v36 = vld [vmem:[%s2845_s6 + $0x480] sm:$0xff] }
  0x2d   : > { %219 = vst [vmem:[%s2850_s7 + $0x110] sm:$0xff] %v218_v34  ;;  %221 = vst [vmem:[%s2850_s7 + $0x118] sm:$0xff] %v220_v35  ;;  %v224_v37 = vld [vmem:[%s2845_s6 + $0x488] sm:$0xff]  ;;  %v226_v38 = vld [vmem:[%s2845_s6 + $0x490] sm:$0xff] }
  0x2e   : > { %223 = vst [vmem:[%s2850_s7 + $0x120] sm:$0xff] %v222_v36  ;;  %225 = vst [vmem:[%s2850_s7 + $0x128] sm:$0xff] %v224_v37  ;;  %v228_v39 = vld [vmem:[%s2845_s6 + $0x498] sm:$0xff]  ;;  %v230_v40 = vld [vmem:[%s2845_s6 + $0x500] sm:$0xff] }
  0x2f   : > { %227 = vst [vmem:[%s2850_s7 + $0x130] sm:$0xff] %v226_v38  ;;  %v232_v41 = vld [vmem:[%s2845_s6 + $0x508] sm:$0xff]  ;;  %229 = vst [vmem:[%s2850_s7 + $0x138] sm:$0xff] %v228_v39  ;;  %v234_v42 = vld [vmem:[%s2845_s6 + $0x510] sm:$0xff] }
  0x30   : > { %231 = vst [vmem:[%s2850_s7 + $0x140] sm:$0xff] %v230_v40  ;;  %233 = vst [vmem:[%s2850_s7 + $0x148] sm:$0xff] %v232_v41  ;;  %v236_v43 = vld [vmem:[%s2845_s6 + $0x518] sm:$0xff]  ;;  %v238_v44 = vld [vmem:[%s2845_s6 + $0x580] sm:$0xff] }
  0x31   : > { %235 = vst [vmem:[%s2850_s7 + $0x150] sm:$0xff] %v234_v42  ;;  %237 = vst [vmem:[%s2850_s7 + $0x158] sm:$0xff] %v236_v43  ;;  %v240_v45 = vld [vmem:[%s2845_s6 + $0x588] sm:$0xff]  ;;  %v242_v46 = vld [vmem:[%s2845_s6 + $0x590] sm:$0xff] }
  0x32   : > { %239 = vst [vmem:[%s2850_s7 + $0x160] sm:$0xff] %v238_v44  ;;  %v244_v47 = vld [vmem:[%s2845_s6 + $0x598] sm:$0xff]  ;;  %241 = vst [vmem:[%s2850_s7 + $0x168] sm:$0xff] %v240_v45  ;;  %v246_v48 = vld [vmem:[%s2845_s6 + $0x600] sm:$0xff] }
  0x33   : > { %243 = vst [vmem:[%s2850_s7 + $0x170] sm:$0xff] %v242_v46  ;;  %245 = vst [vmem:[%s2850_s7 + $0x178] sm:$0xff] %v244_v47  ;;  %v248_v49 = vld [vmem:[%s2845_s6 + $0x608] sm:$0xff]  ;;  %v250_v50 = vld [vmem:[%s2845_s6 + $0x610] sm:$0xff] }
  0x34   : > { %247 = vst [vmem:[%s2850_s7 + $0x180] sm:$0xff] %v246_v48  ;;  %249 = vst [vmem:[%s2850_s7 + $0x188] sm:$0xff] %v248_v49  ;;  %v252_v51 = vld [vmem:[%s2845_s6 + $0x618] sm:$0xff]  ;;  %v254_v52 = vld [vmem:[%s2845_s6 + $0x680] sm:$0xff] }
  0x35   : > { %251 = vst [vmem:[%s2850_s7 + $0x190] sm:$0xff] %v250_v50  ;;  %v256_v53 = vld [vmem:[%s2845_s6 + $0x688] sm:$0xff]  ;;  %253 = vst [vmem:[%s2850_s7 + $0x198] sm:$0xff] %v252_v51  ;;  %v258_v54 = vld [vmem:[%s2845_s6 + $0x690] sm:$0xff] }
  0x36   : > { %255 = vst [vmem:[%s2850_s7 + $0x1a0] sm:$0xff] %v254_v52  ;;  %257 = vst [vmem:[%s2850_s7 + $0x1a8] sm:$0xff] %v256_v53  ;;  %v260_v55 = vld [vmem:[%s2845_s6 + $0x698] sm:$0xff]  ;;  %v262_v56 = vld [vmem:[%s2845_s6 + $0x700] sm:$0xff] }
  0x37   : > { %259 = vst [vmem:[%s2850_s7 + $0x1b0] sm:$0xff] %v258_v54  ;;  %261 = vst [vmem:[%s2850_s7 + $0x1b8] sm:$0xff] %v260_v55  ;;  %v264_v57 = vld [vmem:[%s2845_s6 + $0x708] sm:$0xff]  ;;  %v266_v58 = vld [vmem:[%s2845_s6 + $0x710] sm:$0xff] }
  0x38   : > { %263 = vst [vmem:[%s2850_s7 + $0x1c0] sm:$0xff] %v262_v56  ;;  %v268_v59 = vld [vmem:[%s2845_s6 + $0x718] sm:$0xff]  ;;  %265 = vst [vmem:[%s2850_s7 + $0x1c8] sm:$0xff] %v264_v57  ;;  %v270_v60 = vld [vmem:[%s2845_s6 + $0x780] sm:$0xff] }
  0x39   : > { %267 = vst [vmem:[%s2850_s7 + $0x1d0] sm:$0xff] %v266_v58  ;;  %269 = vst [vmem:[%s2850_s7 + $0x1d8] sm:$0xff] %v268_v59  ;;  %v272_v61 = vld [vmem:[%s2845_s6 + $0x788] sm:$0xff]  ;;  %v274_v62 = vld [vmem:[%s2845_s6 + $0x790] sm:$0xff] }
  0x3a   : > { %271 = vst [vmem:[%s2850_s7 + $0x1e0] sm:$0xff] %v270_v60  ;;  %273 = vst [vmem:[%s2850_s7 + $0x1e8] sm:$0xff] %v272_v61  ;;  %v276_v63 = vld [vmem:[%s2845_s6 + $0x798] sm:$0xff] }
  0x3b   : > { %275 = vst [vmem:[%s2850_s7 + $0x1f0] sm:$0xff] %v274_v62  ;;  %277 = vst [vmem:[%s2850_s7 + $0x1f8] sm:$0xff] %v276_v63 }
  0x3c PF: > { %p2494_p11 = scmp.ge.s32.totalorder %s2747_s17, 1  ;;  %p282_p12 = scmp.lt.s32.totalorder %s2747_s17, 9 }
  0x3e   : > { %p283_p13 = pnand %p2494_p11, %p282_p12 }
  0x3f   : > { %s289_s8 = sand.u32 (!%p283_p13), 1, %s2723_s11   ;;  %s2497_s18 = sshll.u32 (!%p283_p13), %s2735_s14, 5  ;;  %v2749_v0 = vmov (!%p283_p13), 0  }
  0x40   : > { %286 = sbr.rel (%p283_p13) target bundleno = 666 (0x29a), region = 47  ;;  %s2495_s21 = sshll.u32 (!%p283_p13), %s289_s8, 9  ;;  %868 = vmatprep.mubr.bf16.mxu0 (!%p283_p13), %v2749_v0  ;;  %1061 = vmatprep.mubr.bf16.mxu1 (!%p283_p13), %v2749_v0 }
  0x41   : > { %p2983_p0 = scmp.lt.s32.totalorder (!%p283_p13), %s2497_s18, 63  ;;  %s2987_s23 = scalar_lea.vmem (!%p283_p13), [#allocation2], %s2495_s21 }
  0x42   : > { %v356_v1 = vld [vmem:[%s2987_s23] sm:$0xff] (!%p283_p13)  ;;  %v357_v3 = vld [vmem:[%s2987_s23 + $0x8] sm:$0xff] (!%p283_p13)  ;;  %v358_v62 = vld [vmem:[%s2987_s23 + $0x10] sm:$0xff] (!%p283_p13)  ;;  %s311_s30 = sand.u32 (!%p283_p13), 1, %s2715_s9  }
  0x43   : > { %v360_v2 = vld [vmem:[%s2987_s23 + $0x20] sm:$0xff] (!%p283_p13)  ;;  %v361_v5 = vld [vmem:[%s2987_s23 + $0x28] sm:$0xff] (!%p283_p13)  ;;  %v362_v63 = vld [vmem:[%s2987_s23 + $0x30] sm:$0xff] (!%p283_p13)  ;;  %s2496_s3 = sshll.u32 (!%p283_p13), %s311_s30, 11 }
  0x44   : > { %v2516_v4 = vcombine.high (!%p283_p13), %v356_v1, %v360_v2  ;;  %v2515_v6 = vcombine.low (!%p283_p13), %v356_v1, %v360_v2  ;;  %v364_v7 = vld [vmem:[%s2987_s23 + $0x40] sm:$0xff] (!%p283_p13)  ;;  %v2518_v9 = vcombine.high (!%p283_p13), %v357_v3, %v361_v5  ;;  %v2517_v10 = vcombine.low (!%p283_p13), %v357_v3, %v361_v5  ;;  %v365_v12 = vld [vmem:[%s2987_s23 + $0x48] sm:$0xff] (!%p283_p13)  ;;  %v359_v2 = vld [vmem:[%s2987_s23 + $0x18] sm:$0xff] (!%p283_p13)  ;;  %s3217_s4 = scalar_lea.vmem (!%p283_p13), [#allocation3], %s2496_s3 }
  0x45   : > { %v368_v8 = vld [vmem:[%s2987_s23 + $0x60] sm:$0xff] (!%p283_p13)  ;;  %v369_v13 = vld [vmem:[%s2987_s23 + $0x68] sm:$0xff] (!%p283_p13)  ;;  %v363_v3 = vld [vmem:[%s2987_s23 + $0x38] sm:$0xff] (!%p283_p13) }
  0x46   : > { %v2524_v11 = vcombine.high (!%p283_p13), %v364_v7, %v368_v8  ;;  %v372_v14 = vld [vmem:[%s2987_s23 + $0x80] sm:$0xff] (!%p283_p13)  ;;  %836 = vmatprep.subr.bf16.mxu0 (!%p283_p13), %v2516_v4  ;;  %v2526_v15 = vcombine.high (!%p283_p13), %v365_v12, %v369_v13  ;;  %v373_v17 = vld [vmem:[%s2987_s23 + $0x88] sm:$0xff] (!%p283_p13)  ;;  %1029 = vmatprep.subr.bf16.mxu1 (!%p283_p13), %v2518_v9  ;;  %v2523_v19 = vcombine.low (!%p283_p13), %v364_v7, %v368_v8  ;;  %v366_v9 = vld [vmem:[%s2987_s23 + $0x50] sm:$0xff] (!%p283_p13) }
  0x47   : > { %s4061_s18 = smov (!%p2983_p0, %s2497_s18), 63  ;;  %v376_v16 = vld [vmem:[%s2987_s23 + $0xa0] sm:$0xff]  ;;  %v377_v18 = vld [vmem:[%s2987_s23 + $0xa8] sm:$0xff]  ;;  %837 = vmatpush1.bf16.msra.mxu0 %v2515_v6  ;;  %1030 = vmatpush1.bf16.msra.mxu1 %v2517_v10  ;;  %v2525_v20 = vcombine.low %v365_v12, %v369_v13  ;;  %v2520_v6 = vcombine.high %v358_v62, %v362_v63  ;;  %v2522_v8 = vcombine.high %v359_v2, %v363_v3  ;;  %v370_v10 = vld [vmem:[%s2987_s23 + $0x70] sm:$0xff]  ;;  %s2581_s9 = sshll.u32 (%p2832_p9), %s2731_s13, 3 }
  0x48   : > { %838 = vmatprep.subr.bf16.mxu0 %v2524_v11  ;;  %v2532_v21 = vcombine.high %v372_v14, %v376_v16  ;;  %1031 = vmatprep.subr.bf16.mxu1 %v2526_v15  ;;  %v2534_v22 = vcombine.high %v373_v17, %v377_v18  ;;  %v380_v23 = vld [vmem:[%s2987_s23 + $0xc0] sm:$0xff]  ;;  %s2498_s11 = sshll.u32 %s4061_s18, 2  ;;  %v381_v25 = vld [vmem:[%s2987_s23 + $0xc8] sm:$0xff]  ;;  %v2531_v27 = vcombine.low %v372_v14, %v376_v16  ;;  %v367_v12 = vld [vmem:[%s2987_s23 + $0x58] sm:$0xff]  ;;  %s2587_s5 = sshll.u32 (%p2832_p9), %s2735_s14, 10 }
  0x49   : > { %v384_v24 = vld [vmem:[%s2987_s23 + $0xe0] sm:$0xff]  ;;  %v385_v26 = vld [vmem:[%s2987_s23 + $0xe8] sm:$0xff]  ;;  %v2533_v28 = vcombine.low %v373_v17, %v377_v18  ;;  %s3010_s29 = scalar_lea.vmem %s4041_s0, %s2498_s11  ;;  %v2519_v11 = vcombine.low %v358_v62, %v362_v63  ;;  %v371_v13 = vld [vmem:[%s2987_s23 + $0x78] sm:$0xff]  ;;  %v2521_v14 = vcombine.low %v359_v2, %v363_v3  ;;  %v2528_v16 = vcombine.high %v366_v9, %v370_v10  ;;  %s1874_s27 = sadd.s32 (%p2832_p9), %s2587_s5, %s2581_s9 }
  0x4a   : > { %v2540_v29 = vcombine.high %v380_v23, %v384_v24  ;;  %v2542_v30 = vcombine.high %v381_v25, %v385_v26  ;;  %v388_v31 = vld [vmem:[%s2987_s23 + $0x100] sm:$0xff]  ;;  %v389_v33 = vld [vmem:[%s2987_s23 + $0x108] sm:$0xff]  ;;  %v2539_v35 = vcombine.low %v380_v23, %v384_v24  ;;  %v2541_v36 = vcombine.low %v381_v25, %v385_v26  ;;  %v374_v15 = vld [vmem:[%s2987_s23 + $0x90] sm:$0xff]  ;;  %s2583_s6 = sshll.u32 (%p2832_p9), %s1874_s27, 3 }
  0x4b   : > { %839 = vmatpush1.bf16.msra.mxu0 %v2523_v19  ;;  %1032 = vmatpush1.bf16.msra.mxu1 %v2525_v20  ;;  %v392_v32 = vld [vmem:[%s2987_s23 + $0x120] sm:$0xff]  ;;  %v393_v34 = vld [vmem:[%s2987_s23 + $0x128] sm:$0xff]  ;;  %v378_v17 = vld [vmem:[%s2987_s23 + $0xb0] sm:$0xff]  ;;  %v2530_v18 = vcombine.high %v367_v12, %v371_v13  ;;  %s3509_s18 = scalar_lea.vmem (%p2832_p9), %s4043_s2, %s2583_s6 }
  0x4c   : > { %840 = vmatprep.subr.bf16.mxu0 %v2532_v21  ;;  %1033 = vmatprep.subr.bf16.mxu1 %v2534_v22  ;;  %v2548_v37 = vcombine.high %v388_v31, %v392_v32  ;;  %v396_v38 = vld [vmem:[%s2987_s23 + $0x140] sm:$0xff]  ;;  %v2550_v39 = vcombine.high %v389_v33, %v393_v34  ;;  %v397_v41 = vld [vmem:[%s2987_s23 + $0x148] sm:$0xff]  ;;  %v2547_v43 = vcombine.low %v388_v31, %v392_v32  ;;  %v375_v19 = vld [vmem:[%s2987_s23 + $0x98] sm:$0xff] }
  0x4d   : > { %v400_v40 = vld [vmem:[%s2987_s23 + $0x160] sm:$0xff]  ;;  %v401_v42 = vld [vmem:[%s2987_s23 + $0x168] sm:$0xff]  ;;  %v2549_v44 = vcombine.low %v389_v33, %v393_v34  ;;  %v379_v20 = vld [vmem:[%s2987_s23 + $0xb8] sm:$0xff]  ;;  %v2527_v21 = vcombine.low %v366_v9, %v370_v10  ;;  %v2529_v22 = vcombine.low %v367_v12, %v371_v13  ;;  %v2536_v23 = vcombine.high %v374_v15, %v378_v17 }
  0x4e   : > { %v2556_v45 = vcombine.high %v396_v38, %v400_v40  ;;  %v2558_v46 = vcombine.high %v397_v41, %v401_v42  ;;  %v404_v47 = vld [vmem:[%s2987_s23 + $0x180] sm:$0xff]  ;;  %v405_v49 = vld [vmem:[%s2987_s23 + $0x188] sm:$0xff]  ;;  %v2555_v51 = vcombine.low %v396_v38, %v400_v40  ;;  %v2557_v52 = vcombine.low %v397_v41, %v401_v42  ;;  %v382_v26 = vld [vmem:[%s2987_s23 + $0xd0] sm:$0xff] }
  0x4f   : > { %841 = vmatpush1.bf16.msra.mxu0 %v2531_v27  ;;  %1034 = vmatpush1.bf16.msra.mxu1 %v2533_v28  ;;  %v408_v48 = vld [vmem:[%s2987_s23 + $0x1a0] sm:$0xff]  ;;  %v409_v50 = vld [vmem:[%s2987_s23 + $0x1a8] sm:$0xff]  ;;  %v2538_v24 = vcombine.high %v375_v19, %v379_v20  ;;  %v386_v27 = vld [vmem:[%s2987_s23 + $0xf0] sm:$0xff]  ;;  %v2537_v31 = vcombine.low %v375_v19, %v379_v20 }
  0x50   : > { %842 = vmatprep.subr.bf16.mxu0 %v2540_v29  ;;  %1035 = vmatprep.subr.bf16.mxu1 %v2542_v30  ;;  %v2564_v53 = vcombine.high %v404_v47, %v408_v48  ;;  %v2566_v54 = vcombine.high %v405_v49, %v409_v50  ;;  %v412_v55 = vld [vmem:[%s2987_s23 + $0x1c0] sm:$0xff]  ;;  %v413_v57 = vld [vmem:[%s2987_s23 + $0x1c8] sm:$0xff]  ;;  %v2563_v59 = vcombine.low %v404_v47, %v408_v48  ;;  %v383_v28 = vld [vmem:[%s2987_s23 + $0xd8] sm:$0xff] }
  0x51   : > { %v416_v56 = vld [vmem:[%s2987_s23 + $0x1e0] sm:$0xff]  ;;  %v417_v58 = vld [vmem:[%s2987_s23 + $0x1e8] sm:$0xff]  ;;  %v2565_v60 = vcombine.low %v405_v49, %v409_v50  ;;  %v387_v29 = vld [vmem:[%s2987_s23 + $0xf8] sm:$0xff]  ;;  %v2535_v30 = vcombine.low %v374_v15, %v378_v17  ;;  %v2544_v32 = vcombine.high %v382_v26, %v386_v27  ;;  %v2543_v38 = vcombine.low %v382_v26, %v386_v27 }
  0x52   : > { %v2572_v61 = vcombine.high %v412_v55, %v416_v56  ;;  %v2574_v1 = vcombine.high %v413_v57, %v417_v58  ;;  %v2571_v4 = vcombine.low %v412_v55, %v416_v56  ;;  %v2573_v5 = vcombine.low %v413_v57, %v417_v58  ;;  %v3033_v7 = vld [vmem:[%s3010_s29] sm:$0xff]   ;;  %v3048_v25 = vld [vmem:[%s3010_s29 + $0x8] sm:$0xff]   ;;  %v390_v34 = vld [vmem:[%s2987_s23 + $0x110] sm:$0xff] }
  0x53   : > { %843 = vmatpush1.bf16.msra.mxu0 %v2539_v35  ;;  %1036 = vmatpush1.bf16.msra.mxu1 %v2541_v36  ;;  %v2546_v33 = vcombine.high %v383_v28, %v387_v29  ;;  %v394_v35 = vld [vmem:[%s2987_s23 + $0x130] sm:$0xff]  ;;  %v391_v36 = vld [vmem:[%s2987_s23 + $0x118] sm:$0xff]  ;;  %v3096_v9 = vld [vmem:[%s3010_s29 + $0x28] sm:$0xff]  }
  0x54   : > { %844 = vmatprep.subr.bf16.mxu0 %v2548_v37  ;;  %1037 = vmatprep.subr.bf16.mxu1 %v2550_v39  ;;  %v395_v37 = vld [vmem:[%s2987_s23 + $0x138] sm:$0xff]  ;;  %v2545_v39 = vcombine.low %v383_v28, %v387_v29  ;;  %v2552_v40 = vcombine.high %v390_v34, %v394_v35  ;;  %v3063_v41 = vld [vmem:[%s3010_s29 + $0x10] sm:$0xff]   ;;  %v2551_v47 = vcombine.low %v390_v34, %v394_v35  ;;  %v3117_v12 = vld [vmem:[%s3010_s29 + $0x40] sm:$0xff]  }
  0x55   : > { %v2554_v42 = vcombine.high %v391_v36, %v395_v37  ;;  %v2553_v48 = vcombine.low %v391_v36, %v395_v37  ;;  %v3078_v58 = vld [vmem:[%s3010_s29 + $0x18] sm:$0xff]   ;;  %v3103_v10 = vld [vmem:[%s3010_s29 + $0x30] sm:$0xff]   ;;  %v3124_v13 = vld [vmem:[%s3010_s29 + $0x48] sm:$0xff]  }
  0x56   : > { %v415_v62 = vld [vmem:[%s2987_s23 + $0x1d8] sm:$0xff]  ;;  %v3152_v17 = vld [vmem:[%s3010_s29 + $0x68] sm:$0xff]  }
  0x57   : > { %845 = vmatpush1.bf16.msra.mxu0 %v2547_v43  ;;  %1038 = vmatpush1.bf16.msra.mxu1 %v2549_v44  ;;  %v398_v43 = vld [vmem:[%s2987_s23 + $0x150] sm:$0xff]  ;;  %v419_v63 = vld [vmem:[%s2987_s23 + $0x1f8] sm:$0xff] }
  0x58   : > { %846 = vmatprep.subr.bf16.mxu0 %v2556_v45  ;;  %1039 = vmatprep.subr.bf16.mxu1 %v2558_v46  ;;  %v402_v44 = vld [vmem:[%s2987_s23 + $0x170] sm:$0xff]  ;;  %v399_v45 = vld [vmem:[%s2987_s23 + $0x158] sm:$0xff] }
  0x59   : > { %v403_v46 = vld [vmem:[%s2987_s23 + $0x178] sm:$0xff]  ;;  %v2560_v49 = vcombine.high %v398_v43, %v402_v44  ;;  %v2559_v55 = vcombine.low %v398_v43, %v402_v44 }
  0x5a   : > { %v2562_v50 = vcombine.high %v399_v45, %v403_v46  ;;  %v2561_v56 = vcombine.low %v399_v45, %v403_v46  ;;  %v3138_v15 = vld [vmem:[%s3010_s29 + $0x58] sm:$0xff]  }
  0x5b   : > { %847 = vmatpush1.bf16.msra.mxu0 %v2555_v51  ;;  %1040 = vmatpush1.bf16.msra.mxu1 %v2557_v52  ;;  %v406_v51 = vld [vmem:[%s2987_s23 + $0x190] sm:$0xff]  ;;  %v3166_v19 = vld [vmem:[%s3010_s29 + $0x78] sm:$0xff]  }
  0x5c   : > { %848 = vmatprep.subr.bf16.mxu0 %v2564_v53  ;;  %1041 = vmatprep.subr.bf16.mxu1 %v2566_v54  ;;  %v410_v52 = vld [vmem:[%s2987_s23 + $0x1b0] sm:$0xff]  ;;  %v407_v53 = vld [vmem:[%s2987_s23 + $0x198] sm:$0xff] }
  0x5d   : > { %v411_v54 = vld [vmem:[%s2987_s23 + $0x1b8] sm:$0xff]  ;;  %v2568_v57 = vcombine.high %v406_v51, %v410_v52 }
  0x5e   : > { %v2569_v2 = vcombine.low %v407_v53, %v411_v54 }
  0x5f   : > { %849 = vmatpush1.bf16.msra.mxu0 %v2563_v59  ;;  %1042 = vmatpush1.bf16.msra.mxu1 %v2565_v60  ;;  %v2570_v59 = vcombine.high %v407_v53, %v411_v54  ;;  %v414_v60 = vld [vmem:[%s2987_s23 + $0x1d0] sm:$0xff] }
  0x60   : > { %850 = vmatprep.subr.bf16.mxu0 %v2572_v61  ;;  %1043 = vmatprep.subr.bf16.mxu1 %v2574_v1  ;;  %v418_v61 = vld [vmem:[%s2987_s23 + $0x1f0] sm:$0xff]  ;;  %v2567_v1 = vcombine.low %v406_v51, %v410_v52 }
  0x61   : > { %v2576_v3 = vcombine.high %v414_v60, %v418_v61 }
  0x63   : > { %851 = vmatpush1.bf16.msra.mxu0 %v2571_v4  ;;  %1044 = vmatpush1.bf16.msra.mxu1 %v2573_v5  ;;  %v2578_v4 = vcombine.high %v415_v62, %v419_v63  ;;  %v2575_v5 = vcombine.low %v414_v60, %v418_v61 }
  0x64   : > { %1222 = vmatprep.subr.bf16.mxu0 %v2520_v6  ;;  %1415 = vmatprep.subr.bf16.mxu1 %v2522_v8  ;;  %v2577_v6 = vcombine.low %v415_v62, %v419_v63  ;;  %v3089_v8 = vld [vmem:[%s3010_s29 + $0x20] sm:$0xff]  }
  0x66   : > { %869 = vmatmul.mubr.bf16.vlgmr.msra.gmra.mrb[0].mxu0 %v3033_v7  ;;  %1062 = vmatmul.mubr.bf16.vlgmr.msra.gmra.mrb[0].mxu1 %v3033_v7 }
  0x67   : > { %1223 = vmatpush1.bf16.msra.mxu0 %v2519_v11  ;;  %1416 = vmatpush1.bf16.msra.mxu1 %v2521_v14  ;;  %v3110_v11 = vld [vmem:[%s3010_s29 + $0x38] sm:$0xff]   ;;  %v3131_v14 = vld [vmem:[%s3010_s29 + $0x50] sm:$0xff]  }
  0x68   : > { %878 = vmatprep.mubr.bf16.mxu0 %v2749_v0  ;;  %1071 = vmatprep.mubr.bf16.mxu1 %v2749_v0 }
  0x69   : > { %1224 = vmatprep.subr.bf16.mxu0 %v2528_v16  ;;  %1417 = vmatprep.subr.bf16.mxu1 %v2530_v18  ;;  %v3145_v16 = vld [vmem:[%s3010_s29 + $0x60] sm:$0xff]   ;;  %v3159_v18 = vld [vmem:[%s3010_s29 + $0x70] sm:$0xff]  }
  0x6b   : > { %1225 = vmatpush1.bf16.msra.mxu0 %v2527_v21  ;;  %1418 = vmatpush1.bf16.msra.mxu1 %v2529_v22 }
  0x6c   : > { %1226 = vmatprep.subr.bf16.mxu0 %v2536_v23  ;;  %1419 = vmatprep.subr.bf16.mxu1 %v2538_v24 }
  0x6e   : > { %879 = vmatmul.mubr.bf16.gmra.mrb[4].mxu0 %v3048_v25  ;;  %1072 = vmatmul.mubr.bf16.gmra.mrb[4].mxu1 %v3048_v25 }
  0x6f   : > { %888 = vmatprep.mubr.bf16.mxu0 %v2749_v0  ;;  %1081 = vmatprep.mubr.bf16.mxu1 %v2749_v0 }
  0x70   : > { %1227 = vmatpush1.bf16.msra.mxu0 %v2535_v30  ;;  %1420 = vmatpush1.bf16.msra.mxu1 %v2537_v31 }
  0x71   : > { %1228 = vmatprep.subr.bf16.mxu0 %v2544_v32  ;;  %1421 = vmatprep.subr.bf16.mxu1 %v2546_v33 }
  0x74   : > { %1229 = vmatpush1.bf16.msra.mxu0 %v2543_v38  ;;  %1422 = vmatpush1.bf16.msra.mxu1 %v2545_v39 }
  0x75   : > { %1230 = vmatprep.subr.bf16.mxu0 %v2552_v40  ;;  %1423 = vmatprep.subr.bf16.mxu1 %v2554_v42 }
  0x76   : > { %889 = vmatmul.mubr.bf16.gmra.mrb[8].mxu0 %v3063_v41  ;;  %1082 = vmatmul.mubr.bf16.gmra.mrb[8].mxu1 %v3063_v41 }
  0x77   : > { %898 = vmatprep.mubr.bf16.mxu0 %v2749_v0  ;;  %1091 = vmatprep.mubr.bf16.mxu1 %v2749_v0 }
  0x78   : > { %1231 = vmatpush1.bf16.msra.mxu0 %v2551_v47  ;;  %1424 = vmatpush1.bf16.msra.mxu1 %v2553_v48 }
  0x79   : > { %1232 = vmatprep.subr.bf16.mxu0 %v2560_v49  ;;  %1425 = vmatprep.subr.bf16.mxu1 %v2562_v50 }
  0x7c   : > { %1233 = vmatpush1.bf16.msra.mxu0 %v2559_v55  ;;  %1426 = vmatpush1.bf16.msra.mxu1 %v2561_v56 }
  0x7d   : > { %1234 = vmatprep.subr.bf16.mxu0 %v2568_v57  ;;  %1427 = vmatprep.subr.bf16.mxu1 %v2570_v59 }
  0x7e   : > { %899 = vmatmul.mubr.bf16.gmra.mrb[12].mxu0 %v3078_v58  ;;  %1092 = vmatmul.mubr.bf16.gmra.mrb[12].mxu1 %v3078_v58 }
  0x7f   : > { %908 = vmatprep.mubr.bf16.mxu0 %v2749_v0  ;;  %1101 = vmatprep.mubr.bf16.mxu1 %v2749_v0 }
  0x80   : > { %1235 = vmatpush1.bf16.msra.mxu0 %v2567_v1  ;;  %1428 = vmatpush1.bf16.msra.mxu1 %v2569_v2 }
  0x81   : > { %1236 = vmatprep.subr.bf16.mxu0 %v2576_v3  ;;  %1429 = vmatprep.subr.bf16.mxu1 %v2578_v4 }
  0x84   : > { %1237 = vmatpush1.bf16.msra.mxu0 %v2575_v5  ;;  %1430 = vmatpush1.bf16.msra.mxu1 %v2577_v6 }
  0x86   : > { %909 = vmatmul.mubr.bf16.gmra.mrb[16].mxu0 %v3089_v8  ;;  %1102 = vmatmul.mubr.bf16.gmra.mrb[16].mxu1 %v3089_v8 }
  0x87   : > { %918 = vmatprep.mubr.bf16.mxu0 %v2749_v0  ;;  %1111 = vmatprep.mubr.bf16.mxu1 %v2749_v0 }
  0x8e   : > { %919 = vmatmul.mubr.bf16.gmra.mrb[20].mxu0 %v3096_v9  ;;  %1112 = vmatmul.mubr.bf16.gmra.mrb[20].mxu1 %v3096_v9 }
  0x8f   : > { %928 = vmatprep.mubr.bf16.mxu0 %v2749_v0  ;;  %1121 = vmatprep.mubr.bf16.mxu1 %v2749_v0 }
  0x96   : > { %929 = vmatmul.mubr.bf16.gmra.mrb[24].mxu0 %v3103_v10  ;;  %1122 = vmatmul.mubr.bf16.gmra.mrb[24].mxu1 %v3103_v10 }
  0x97   : > { %938 = vmatprep.mubr.bf16.mxu0 %v2749_v0  ;;  %1131 = vmatprep.mubr.bf16.mxu1 %v2749_v0 }
  0x9e   : > { %939 = vmatmul.mubr.bf16.gmra.mrb[28].mxu0 %v3110_v11  ;;  %1132 = vmatmul.mubr.bf16.gmra.mrb[28].mxu1 %v3110_v11 }
  0x9f   : > { %948 = vmatprep.mubr.bf16.mxu0 %v2749_v0  ;;  %1141 = vmatprep.mubr.bf16.mxu1 %v2749_v0 }
  0xa6   : > { %949 = vmatmul.mubr.bf16.gmra.mrb[32].mxu0 %v3117_v12  ;;  %1142 = vmatmul.mubr.bf16.gmra.mrb[32].mxu1 %v3117_v12 }
  0xa7   : > { %958 = vmatprep.mubr.bf16.mxu0 %v2749_v0  ;;  %1151 = vmatprep.mubr.bf16.mxu1 %v2749_v0 }
  0xae   : > { %959 = vmatmul.mubr.bf16.gmra.mrb[36].mxu0 %v3124_v13  ;;  %1152 = vmatmul.mubr.bf16.gmra.mrb[36].mxu1 %v3124_v13 }
  0xaf   : > { %968 = vmatprep.mubr.bf16.mxu0 %v2749_v0  ;;  %1161 = vmatprep.mubr.bf16.mxu1 %v2749_v0 }
  0xb6   : > { %969 = vmatmul.mubr.bf16.gmra.mrb[40].mxu0 %v3131_v14  ;;  %1162 = vmatmul.mubr.bf16.gmra.mrb[40].mxu1 %v3131_v14 }
  0xb7   : > { %978 = vmatprep.mubr.bf16.mxu0 %v2749_v0  ;;  %1171 = vmatprep.mubr.bf16.mxu1 %v2749_v0 }
  0xbe   : > { %979 = vmatmul.mubr.bf16.gmra.mrb[44].mxu0 %v3138_v15  ;;  %1172 = vmatmul.mubr.bf16.gmra.mrb[44].mxu1 %v3138_v15 }
  0xbf   : > { %988 = vmatprep.mubr.bf16.mxu0 %v2749_v0  ;;  %1181 = vmatprep.mubr.bf16.mxu1 %v2749_v0 }
  0xc6   : > { %989 = vmatmul.mubr.bf16.gmra.mrb[48].mxu0 %v3145_v16  ;;  %1182 = vmatmul.mubr.bf16.gmra.mrb[48].mxu1 %v3145_v16 }
  0xc7   : > { %998 = vmatprep.mubr.bf16.mxu0 %v2749_v0  ;;  %1191 = vmatprep.mubr.bf16.mxu1 %v2749_v0 }
  0xce   : > { %999 = vmatmul.mubr.bf16.gmra.mrb[52].mxu0 %v3152_v17  ;;  %1192 = vmatmul.mubr.bf16.gmra.mrb[52].mxu1 %v3152_v17 }
  0xcf   : > { %1008 = vmatprep.mubr.bf16.mxu0 %v2749_v0  ;;  %1201 = vmatprep.mubr.bf16.mxu1 %v2749_v0 }
  0xd6   : > { %1009 = vmatmul.mubr.bf16.gmra.mrb[56].mxu0 %v3159_v18  ;;  %1202 = vmatmul.mubr.bf16.gmra.mrb[56].mxu1 %v3159_v18 }
  0xd7   : > { %1018 = vmatprep.mubr.bf16.mxu0 %v2749_v0  ;;  %1211 = vmatprep.mubr.bf16.mxu1 %v2749_v0 }
  0xde   : > { %1019 = vmatmul.mubr.bf16.gmra.mrb[60].mxu0 %v3166_v19  ;;  %1212 = vmatmul.mubr.bf16.gmra.mrb[60].mxu1 %v3166_v19 }
  0xdf   : > { %1254 = vmatprep.mubr.bf16.mxu0 %v2749_v0  ;;  %1447 = vmatprep.mubr.bf16.mxu1 %v2749_v0 }
  0xe6   : > { %1255 = vmatmul.mubr.bf16.vlgmr.msra.gmra.mrb[64].mxu0 %v3033_v7  ;;  %1448 = vmatmul.mubr.bf16.vlgmr.msra.gmra.mrb[64].mxu1 %v3033_v7 }
  0xe7   : > { %1264 = vmatprep.mubr.bf16.mxu0 %v2749_v0  ;;  %1457 = vmatprep.mubr.bf16.mxu1 %v2749_v0 }
  0xee   : > { %1265 = vmatmul.mubr.bf16.gmra.mrb[68].mxu0 %v3048_v25  ;;  %1458 = vmatmul.mubr.bf16.gmra.mrb[68].mxu1 %v3048_v25 }
  0xef   : > { %1274 = vmatprep.mubr.bf16.mxu0 %v2749_v0  ;;  %1467 = vmatprep.mubr.bf16.mxu1 %v2749_v0 }
  0xf6   : > { %1275 = vmatmul.mubr.bf16.gmra.mrb[72].mxu0 %v3063_v41  ;;  %1468 = vmatmul.mubr.bf16.gmra.mrb[72].mxu1 %v3063_v41 }
  0xf7   : > { %1284 = vmatprep.mubr.bf16.mxu0 %v2749_v0  ;;  %1477 = vmatprep.mubr.bf16.mxu1 %v2749_v0 }
  0xfe   : > { %1285 = vmatmul.mubr.bf16.gmra.mrb[76].mxu0 %v3078_v58  ;;  %1478 = vmatmul.mubr.bf16.gmra.mrb[76].mxu1 %v3078_v58 }
  0xff   : > { %1294 = vmatprep.mubr.bf16.mxu0 %v2749_v0  ;;  %1487 = vmatprep.mubr.bf16.mxu1 %v2749_v0 }
 0x106   : > { %1295 = vmatmul.mubr.bf16.gmra.mrb[80].mxu0 %v3089_v8  ;;  %1488 = vmatmul.mubr.bf16.gmra.mrb[80].mxu1 %v3089_v8 }
 0x107   : > { %1304 = vmatprep.mubr.bf16.mxu0 %v2749_v0  ;;  %1497 = vmatprep.mubr.bf16.mxu1 %v2749_v0 }
 0x10e   : > { %1305 = vmatmul.mubr.bf16.gmra.mrb[84].mxu0 %v3096_v9  ;;  %1498 = vmatmul.mubr.bf16.gmra.mrb[84].mxu1 %v3096_v9 }
 0x10f   : > { %1314 = vmatprep.mubr.bf16.mxu0 %v2749_v0  ;;  %1507 = vmatprep.mubr.bf16.mxu1 %v2749_v0 }
 0x116   : > { %1315 = vmatmul.mubr.bf16.gmra.mrb[88].mxu0 %v3103_v10  ;;  %1508 = vmatmul.mubr.bf16.gmra.mrb[88].mxu1 %v3103_v10 }
 0x117   : > { %1324 = vmatprep.mubr.bf16.mxu0 %v2749_v0  ;;  %1517 = vmatprep.mubr.bf16.mxu1 %v2749_v0 }
 0x11e   : > { %1325 = vmatmul.mubr.bf16.gmra.mrb[92].mxu0 %v3110_v11  ;;  %1518 = vmatmul.mubr.bf16.gmra.mrb[92].mxu1 %v3110_v11 }
 0x11f   : > { %1334 = vmatprep.mubr.bf16.mxu0 %v2749_v0  ;;  %1527 = vmatprep.mubr.bf16.mxu1 %v2749_v0 }
 0x126   : > { %1335 = vmatmul.mubr.bf16.gmra.mrb[96].mxu0 %v3117_v12  ;;  %1528 = vmatmul.mubr.bf16.gmra.mrb[96].mxu1 %v3117_v12 }
 0x127   : > { %1344 = vmatprep.mubr.bf16.mxu0 %v2749_v0  ;;  %1537 = vmatprep.mubr.bf16.mxu1 %v2749_v0 }
 0x12e   : > { %1345 = vmatmul.mubr.bf16.gmra.mrb[100].mxu0 %v3124_v13  ;;  %1538 = vmatmul.mubr.bf16.gmra.mrb[100].mxu1 %v3124_v13 }
 0x12f   : > { %1354 = vmatprep.mubr.bf16.mxu0 %v2749_v0  ;;  %1547 = vmatprep.mubr.bf16.mxu1 %v2749_v0 }
 0x136   : > { %1355 = vmatmul.mubr.bf16.gmra.mrb[104].mxu0 %v3131_v14  ;;  %1548 = vmatmul.mubr.bf16.gmra.mrb[104].mxu1 %v3131_v14 }
 0x137   : > { %1364 = vmatprep.mubr.bf16.mxu0 %v2749_v0  ;;  %1557 = vmatprep.mubr.bf16.mxu1 %v2749_v0 }
 0x139   : > { %v870_v7 = vpop.f32.mrb[0].mxu0  ;;  %v1063_v20 = vpop.f32.mrb[0].mxu1 }
 0x13a   : > { %1608 = vst [vmem:[%s3217_s4] sm:$0xff] %v870_v7  ;;  %v872_v21 = vpop.f32.mrb[1].mxu0  ;;  %1610 = vst [vmem:[%s3217_s4 + $0x10] sm:$0xff] %v1063_v20  ;;  %v1065_v22 = vpop.f32.mrb[1].mxu1 }
 0x13b   : > { %1609 = vst [vmem:[%s3217_s4 + $0x8] sm:$0xff] %v872_v21  ;;  %v874_v23 = vpop.f32.mrb[2].mxu0  ;;  %1611 = vst [vmem:[%s3217_s4 + $0x18] sm:$0xff] %v1065_v22  ;;  %v1067_v24 = vpop.f32.mrb[2].mxu1 }
 0x13c   : > { %1616 = vst [vmem:[%s3217_s4 + $0x40] sm:$0xff] %v874_v23  ;;  %v876_v25 = vpop.f32.mrb[3].mxu0  ;;  %1618 = vst [vmem:[%s3217_s4 + $0x50] sm:$0xff] %v1067_v24  ;;  %v1069_v26 = vpop.f32.mrb[3].mxu1 }
 0x13d   : > { %1617 = vst [vmem:[%s3217_s4 + $0x48] sm:$0xff] %v876_v25  ;;  %1619 = vst [vmem:[%s3217_s4 + $0x58] sm:$0xff] %v1069_v26 }
 0x13e   : > { %1365 = vmatmul.mubr.bf16.gmra.mrb[108].mxu0 %v3138_v15  ;;  %1558 = vmatmul.mubr.bf16.gmra.mrb[108].mxu1 %v3138_v15 }
 0x13f   : > { %1374 = vmatprep.mubr.bf16.mxu0 %v2749_v0  ;;  %1567 = vmatprep.mubr.bf16.mxu1 %v2749_v0 }
 0x141   : > { %v880_v27 = vpop.f32.mrb[4].mxu0  ;;  %v1073_v28 = vpop.f32.mrb[4].mxu1 }
 0x142   : > { %1624 = vst [vmem:[%s3217_s4 + $0x80] sm:$0xff] %v880_v27  ;;  %v882_v29 = vpop.f32.mrb[5].mxu0  ;;  %1626 = vst [vmem:[%s3217_s4 + $0x90] sm:$0xff] %v1073_v28  ;;  %v1075_v30 = vpop.f32.mrb[5].mxu1 }
 0x143   : > { %1625 = vst [vmem:[%s3217_s4 + $0x88] sm:$0xff] %v882_v29  ;;  %v884_v31 = vpop.f32.mrb[6].mxu0  ;;  %1627 = vst [vmem:[%s3217_s4 + $0x98] sm:$0xff] %v1075_v30  ;;  %v1077_v32 = vpop.f32.mrb[6].mxu1 }
 0x144   : > { %1632 = vst [vmem:[%s3217_s4 + $0xc0] sm:$0xff] %v884_v31  ;;  %v886_v33 = vpop.f32.mrb[7].mxu0  ;;  %1634 = vst [vmem:[%s3217_s4 + $0xd0] sm:$0xff] %v1077_v32  ;;  %v1079_v34 = vpop.f32.mrb[7].mxu1 }
 0x145   : > { %1633 = vst [vmem:[%s3217_s4 + $0xc8] sm:$0xff] %v886_v33  ;;  %1635 = vst [vmem:[%s3217_s4 + $0xd8] sm:$0xff] %v1079_v34 }
 0x146   : > { %1375 = vmatmul.mubr.bf16.gmra.mrb[112].mxu0 %v3145_v16  ;;  %1568 = vmatmul.mubr.bf16.gmra.mrb[112].mxu1 %v3145_v16 }
 0x147   : > { %1384 = vmatprep.mubr.bf16.mxu0 %v2749_v0  ;;  %1577 = vmatprep.mubr.bf16.mxu1 %v2749_v0 }
 0x149   : > { %v890_v35 = vpop.f32.mrb[8].mxu0  ;;  %v1083_v36 = vpop.f32.mrb[8].mxu1 }
 0x14a   : > { %1640 = vst [vmem:[%s3217_s4 + $0x100] sm:$0xff] %v890_v35  ;;  %v892_v37 = vpop.f32.mrb[9].mxu0  ;;  %1642 = vst [vmem:[%s3217_s4 + $0x110] sm:$0xff] %v1083_v36  ;;  %v1085_v38 = vpop.f32.mrb[9].mxu1 }
 0x14b   : > { %1641 = vst [vmem:[%s3217_s4 + $0x108] sm:$0xff] %v892_v37  ;;  %v894_v39 = vpop.f32.mrb[10].mxu0  ;;  %1643 = vst [vmem:[%s3217_s4 + $0x118] sm:$0xff] %v1085_v38  ;;  %v1087_v40 = vpop.f32.mrb[10].mxu1 }
 0x14c   : > { %1648 = vst [vmem:[%s3217_s4 + $0x140] sm:$0xff] %v894_v39  ;;  %v896_v41 = vpop.f32.mrb[11].mxu0  ;;  %1650 = vst [vmem:[%s3217_s4 + $0x150] sm:$0xff] %v1087_v40  ;;  %v1089_v42 = vpop.f32.mrb[11].mxu1 }
 0x14d   : > { %1649 = vst [vmem:[%s3217_s4 + $0x148] sm:$0xff] %v896_v41  ;;  %1651 = vst [vmem:[%s3217_s4 + $0x158] sm:$0xff] %v1089_v42 }
 0x14e   : > { %1385 = vmatmul.mubr.bf16.gmra.mrb[116].mxu0 %v3152_v17  ;;  %1578 = vmatmul.mubr.bf16.gmra.mrb[116].mxu1 %v3152_v17 }
 0x14f   : > { %1394 = vmatprep.mubr.bf16.mxu0 %v2749_v0  ;;  %1587 = vmatprep.mubr.bf16.mxu1 %v2749_v0 }
 0x151   : > { %v900_v43 = vpop.f32.mrb[12].mxu0  ;;  %v1093_v44 = vpop.f32.mrb[12].mxu1 }
 0x152   : > { %1656 = vst [vmem:[%s3217_s4 + $0x180] sm:$0xff] %v900_v43  ;;  %v902_v45 = vpop.f32.mrb[13].mxu0  ;;  %1658 = vst [vmem:[%s3217_s4 + $0x190] sm:$0xff] %v1093_v44  ;;  %v1095_v46 = vpop.f32.mrb[13].mxu1 }
 0x153   : > { %1657 = vst [vmem:[%s3217_s4 + $0x188] sm:$0xff] %v902_v45  ;;  %v904_v47 = vpop.f32.mrb[14].mxu0  ;;  %1659 = vst [vmem:[%s3217_s4 + $0x198] sm:$0xff] %v1095_v46  ;;  %v1097_v48 = vpop.f32.mrb[14].mxu1 }
 0x154   : > { %1664 = vst [vmem:[%s3217_s4 + $0x1c0] sm:$0xff] %v904_v47  ;;  %v906_v49 = vpop.f32.mrb[15].mxu0  ;;  %1666 = vst [vmem:[%s3217_s4 + $0x1d0] sm:$0xff] %v1097_v48  ;;  %v1099_v50 = vpop.f32.mrb[15].mxu1 }
 0x155   : > { %1665 = vst [vmem:[%s3217_s4 + $0x1c8] sm:$0xff] %v906_v49  ;;  %1667 = vst [vmem:[%s3217_s4 + $0x1d8] sm:$0xff] %v1099_v50 }
 0x156   : > { %1395 = vmatmul.mubr.bf16.gmra.mrb[120].mxu0 %v3159_v18  ;;  %1588 = vmatmul.mubr.bf16.gmra.mrb[120].mxu1 %v3159_v18 }
 0x157   : > { %1404 = vmatprep.mubr.bf16.mxu0 %v2749_v0  ;;  %1597 = vmatprep.mubr.bf16.mxu1 %v2749_v0 }
 0x159   : > { %v910_v51 = vpop.f32.mrb[16].mxu0  ;;  %v1103_v52 = vpop.f32.mrb[16].mxu1 }
 0x15a   : > { %1672 = vst [vmem:[%s3217_s4 + $0x200] sm:$0xff] %v910_v51  ;;  %v912_v53 = vpop.f32.mrb[17].mxu0  ;;  %1674 = vst [vmem:[%s3217_s4 + $0x210] sm:$0xff] %v1103_v52  ;;  %v1105_v54 = vpop.f32.mrb[17].mxu1 }
 0x15b   : > { %1673 = vst [vmem:[%s3217_s4 + $0x208] sm:$0xff] %v912_v53  ;;  %v914_v55 = vpop.f32.mrb[18].mxu0  ;;  %1675 = vst [vmem:[%s3217_s4 + $0x218] sm:$0xff] %v1105_v54  ;;  %v1107_v56 = vpop.f32.mrb[18].mxu1 }
 0x15c   : > { %1680 = vst [vmem:[%s3217_s4 + $0x240] sm:$0xff] %v914_v55  ;;  %v916_v57 = vpop.f32.mrb[19].mxu0  ;;  %1682 = vst [vmem:[%s3217_s4 + $0x250] sm:$0xff] %v1107_v56  ;;  %v1109_v0 = vpop.f32.mrb[19].mxu1 }
 0x15d   : > { %1681 = vst [vmem:[%s3217_s4 + $0x248] sm:$0xff] %v916_v57  ;;  %1683 = vst [vmem:[%s3217_s4 + $0x258] sm:$0xff] %v1109_v0 }
 0x15e   : > { %1405 = vmatmul.mubr.bf16.gmra.mrb[124].mxu0 %v3166_v19  ;;  %1598 = vmatmul.mubr.bf16.gmra.mrb[124].mxu1 %v3166_v19 }
 0x161   : > { %v920_v58 = vpop.f32.mrb[20].mxu0  ;;  %v1113_v59 = vpop.f32.mrb[20].mxu1 }
 0x162   : > { %1688 = vst [vmem:[%s3217_s4 + $0x280] sm:$0xff] %v920_v58  ;;  %v922_v60 = vpop.f32.mrb[21].mxu0  ;;  %1690 = vst [vmem:[%s3217_s4 + $0x290] sm:$0xff] %v1113_v59  ;;  %v1115_v61 = vpop.f32.mrb[21].mxu1 }
 0x163   : > { %1689 = vst [vmem:[%s3217_s4 + $0x288] sm:$0xff] %v922_v60  ;;  %v924_v62 = vpop.f32.mrb[22].mxu0  ;;  %1691 = vst [vmem:[%s3217_s4 + $0x298] sm:$0xff] %v1115_v61  ;;  %v1117_v63 = vpop.f32.mrb[22].mxu1 }
 0x164   : > { %1696 = vst [vmem:[%s3217_s4 + $0x2c0] sm:$0xff] %v924_v62  ;;  %v926_v1 = vpop.f32.mrb[23].mxu0  ;;  %1698 = vst [vmem:[%s3217_s4 + $0x2d0] sm:$0xff] %v1117_v63  ;;  %v1119_v2 = vpop.f32.mrb[23].mxu1 }
 0x165   : > { %1697 = vst [vmem:[%s3217_s4 + $0x2c8] sm:$0xff] %v926_v1  ;;  %1699 = vst [vmem:[%s3217_s4 + $0x2d8] sm:$0xff] %v1119_v2 }
 0x169   : > { %v930_v3 = vpop.f32.mrb[24].mxu0  ;;  %v1123_v4 = vpop.f32.mrb[24].mxu1 }
 0x16a   : > { %1704 = vst [vmem:[%s3217_s4 + $0x300] sm:$0xff] %v930_v3  ;;  %v932_v5 = vpop.f32.mrb[25].mxu0  ;;  %1706 = vst [vmem:[%s3217_s4 + $0x310] sm:$0xff] %v1123_v4  ;;  %v1125_v6 = vpop.f32.mrb[25].mxu1 }
 0x16b   : > { %1705 = vst [vmem:[%s3217_s4 + $0x308] sm:$0xff] %v932_v5  ;;  %v934_v8 = vpop.f32.mrb[26].mxu0  ;;  %1707 = vst [vmem:[%s3217_s4 + $0x318] sm:$0xff] %v1125_v6  ;;  %v1127_v9 = vpop.f32.mrb[26].mxu1 }
 0x16c   : > { %1712 = vst [vmem:[%s3217_s4 + $0x340] sm:$0xff] %v934_v8  ;;  %v936_v10 = vpop.f32.mrb[27].mxu0  ;;  %1714 = vst [vmem:[%s3217_s4 + $0x350] sm:$0xff] %v1127_v9  ;;  %v1129_v11 = vpop.f32.mrb[27].mxu1 }
 0x16d   : > { %1713 = vst [vmem:[%s3217_s4 + $0x348] sm:$0xff] %v936_v10  ;;  %1715 = vst [vmem:[%s3217_s4 + $0x358] sm:$0xff] %v1129_v11 }
 0x171   : > { %v940_v12 = vpop.f32.mrb[28].mxu0  ;;  %v1133_v13 = vpop.f32.mrb[28].mxu1 }
 0x172   : > { %1720 = vst [vmem:[%s3217_s4 + $0x380] sm:$0xff] %v940_v12  ;;  %v942_v14 = vpop.f32.mrb[29].mxu0  ;;  %1722 = vst [vmem:[%s3217_s4 + $0x390] sm:$0xff] %v1133_v13  ;;  %v1135_v15 = vpop.f32.mrb[29].mxu1 }
 0x173   : > { %1721 = vst [vmem:[%s3217_s4 + $0x388] sm:$0xff] %v942_v14  ;;  %v944_v16 = vpop.f32.mrb[30].mxu0  ;;  %1723 = vst [vmem:[%s3217_s4 + $0x398] sm:$0xff] %v1135_v15  ;;  %v1137_v17 = vpop.f32.mrb[30].mxu1 }
 0x174   : > { %1728 = vst [vmem:[%s3217_s4 + $0x3c0] sm:$0xff] %v944_v16  ;;  %v946_v18 = vpop.f32.mrb[31].mxu0  ;;  %1730 = vst [vmem:[%s3217_s4 + $0x3d0] sm:$0xff] %v1137_v17  ;;  %v1139_v19 = vpop.f32.mrb[31].mxu1 }
 0x175   : > { %1729 = vst [vmem:[%s3217_s4 + $0x3c8] sm:$0xff] %v946_v18  ;;  %1731 = vst [vmem:[%s3217_s4 + $0x3d8] sm:$0xff] %v1139_v19 }
 0x179   : > { %v950_v7 = vpop.f32.mrb[32].mxu0  ;;  %v1143_v20 = vpop.f32.mrb[32].mxu1 }
 0x17a   : > { %1736 = vst [vmem:[%s3217_s4 + $0x400] sm:$0xff] %v950_v7  ;;  %v952_v21 = vpop.f32.mrb[33].mxu0  ;;  %1738 = vst [vmem:[%s3217_s4 + $0x410] sm:$0xff] %v1143_v20  ;;  %v1145_v22 = vpop.f32.mrb[33].mxu1 }
 0x17b   : > { %1737 = vst [vmem:[%s3217_s4 + $0x408] sm:$0xff] %v952_v21  ;;  %v954_v23 = vpop.f32.mrb[34].mxu0  ;;  %1739 = vst [vmem:[%s3217_s4 + $0x418] sm:$0xff] %v1145_v22  ;;  %v1147_v24 = vpop.f32.mrb[34].mxu1 }
 0x17c   : > { %1744 = vst [vmem:[%s3217_s4 + $0x440] sm:$0xff] %v954_v23  ;;  %v956_v25 = vpop.f32.mrb[35].mxu0  ;;  %1746 = vst [vmem:[%s3217_s4 + $0x450] sm:$0xff] %v1147_v24  ;;  %v1149_v26 = vpop.f32.mrb[35].mxu1 }
 0x17d   : > { %1745 = vst [vmem:[%s3217_s4 + $0x448] sm:$0xff] %v956_v25  ;;  %1747 = vst [vmem:[%s3217_s4 + $0x458] sm:$0xff] %v1149_v26 }
 0x181   : > { %v960_v27 = vpop.f32.mrb[36].mxu0  ;;  %v1153_v28 = vpop.f32.mrb[36].mxu1 }
 0x182   : > { %1752 = vst [vmem:[%s3217_s4 + $0x480] sm:$0xff] %v960_v27  ;;  %v962_v29 = vpop.f32.mrb[37].mxu0  ;;  %1754 = vst [vmem:[%s3217_s4 + $0x490] sm:$0xff] %v1153_v28  ;;  %v1155_v30 = vpop.f32.mrb[37].mxu1 }
 0x183   : > { %1753 = vst [vmem:[%s3217_s4 + $0x488] sm:$0xff] %v962_v29  ;;  %v964_v31 = vpop.f32.mrb[38].mxu0  ;;  %1755 = vst [vmem:[%s3217_s4 + $0x498] sm:$0xff] %v1155_v30  ;;  %v1157_v32 = vpop.f32.mrb[38].mxu1 }
 0x184   : > { %1760 = vst [vmem:[%s3217_s4 + $0x4c0] sm:$0xff] %v964_v31  ;;  %v966_v33 = vpop.f32.mrb[39].mxu0  ;;  %1762 = vst [vmem:[%s3217_s4 + $0x4d0] sm:$0xff] %v1157_v32  ;;  %v1159_v34 = vpop.f32.mrb[39].mxu1 }
 0x185   : > { %1761 = vst [vmem:[%s3217_s4 + $0x4c8] sm:$0xff] %v966_v33  ;;  %1763 = vst [vmem:[%s3217_s4 + $0x4d8] sm:$0xff] %v1159_v34 }
 0x189   : > { %v970_v35 = vpop.f32.mrb[40].mxu0  ;;  %v1163_v36 = vpop.f32.mrb[40].mxu1 }
 0x18a   : > { %1768 = vst [vmem:[%s3217_s4 + $0x500] sm:$0xff] %v970_v35  ;;  %v972_v37 = vpop.f32.mrb[41].mxu0  ;;  %1770 = vst [vmem:[%s3217_s4 + $0x510] sm:$0xff] %v1163_v36  ;;  %v1165_v38 = vpop.f32.mrb[41].mxu1 }
 0x18b   : > { %1769 = vst [vmem:[%s3217_s4 + $0x508] sm:$0xff] %v972_v37  ;;  %v974_v39 = vpop.f32.mrb[42].mxu0  ;;  %1771 = vst [vmem:[%s3217_s4 + $0x518] sm:$0xff] %v1165_v38  ;;  %v1167_v40 = vpop.f32.mrb[42].mxu1 }
 0x18c   : > { %1776 = vst [vmem:[%s3217_s4 + $0x540] sm:$0xff] %v974_v39  ;;  %v976_v41 = vpop.f32.mrb[43].mxu0  ;;  %1778 = vst [vmem:[%s3217_s4 + $0x550] sm:$0xff] %v1167_v40  ;;  %v1169_v42 = vpop.f32.mrb[43].mxu1 }
 0x18d   : > { %1777 = vst [vmem:[%s3217_s4 + $0x548] sm:$0xff] %v976_v41  ;;  %1779 = vst [vmem:[%s3217_s4 + $0x558] sm:$0xff] %v1169_v42 }
 0x191   : > { %v980_v43 = vpop.f32.mrb[44].mxu0  ;;  %v1173_v44 = vpop.f32.mrb[44].mxu1 }
 0x192   : > { %1784 = vst [vmem:[%s3217_s4 + $0x580] sm:$0xff] %v980_v43  ;;  %v982_v45 = vpop.f32.mrb[45].mxu0  ;;  %1786 = vst [vmem:[%s3217_s4 + $0x590] sm:$0xff] %v1173_v44  ;;  %v1175_v46 = vpop.f32.mrb[45].mxu1 }
 0x193   : > { %1785 = vst [vmem:[%s3217_s4 + $0x588] sm:$0xff] %v982_v45  ;;  %v984_v47 = vpop.f32.mrb[46].mxu0  ;;  %1787 = vst [vmem:[%s3217_s4 + $0x598] sm:$0xff] %v1175_v46  ;;  %v1177_v48 = vpop.f32.mrb[46].mxu1 }
 0x194   : > { %1792 = vst [vmem:[%s3217_s4 + $0x5c0] sm:$0xff] %v984_v47  ;;  %v986_v49 = vpop.f32.mrb[47].mxu0  ;;  %1794 = vst [vmem:[%s3217_s4 + $0x5d0] sm:$0xff] %v1177_v48  ;;  %v1179_v50 = vpop.f32.mrb[47].mxu1 }
 0x195   : > { %1793 = vst [vmem:[%s3217_s4 + $0x5c8] sm:$0xff] %v986_v49  ;;  %1795 = vst [vmem:[%s3217_s4 + $0x5d8] sm:$0xff] %v1179_v50 }
 0x199   : > { %v990_v51 = vpop.f32.mrb[48].mxu0  ;;  %v1183_v52 = vpop.f32.mrb[48].mxu1 }
 0x19a   : > { %1800 = vst [vmem:[%s3217_s4 + $0x600] sm:$0xff] %v990_v51  ;;  %v992_v53 = vpop.f32.mrb[49].mxu0  ;;  %1802 = vst [vmem:[%s3217_s4 + $0x610] sm:$0xff] %v1183_v52  ;;  %v1185_v54 = vpop.f32.mrb[49].mxu1 }
 0x19b   : > { %1801 = vst [vmem:[%s3217_s4 + $0x608] sm:$0xff] %v992_v53  ;;  %v994_v55 = vpop.f32.mrb[50].mxu0  ;;  %1803 = vst [vmem:[%s3217_s4 + $0x618] sm:$0xff] %v1185_v54  ;;  %v1187_v56 = vpop.f32.mrb[50].mxu1 }
 0x19c   : > { %1808 = vst [vmem:[%s3217_s4 + $0x640] sm:$0xff] %v994_v55  ;;  %v996_v57 = vpop.f32.mrb[51].mxu0  ;;  %1810 = vst [vmem:[%s3217_s4 + $0x650] sm:$0xff] %v1187_v56  ;;  %v1189_v0 = vpop.f32.mrb[51].mxu1 }
 0x19d   : > { %1809 = vst [vmem:[%s3217_s4 + $0x648] sm:$0xff] %v996_v57  ;;  %1811 = vst [vmem:[%s3217_s4 + $0x658] sm:$0xff] %v1189_v0 }
 0x1a1   : > { %v1000_v58 = vpop.f32.mrb[52].mxu0  ;;  %v1193_v59 = vpop.f32.mrb[52].mxu1 }
 0x1a2   : > { %1816 = vst [vmem:[%s3217_s4 + $0x680] sm:$0xff] %v1000_v58  ;;  %v1002_v60 = vpop.f32.mrb[53].mxu0  ;;  %1818 = vst [vmem:[%s3217_s4 + $0x690] sm:$0xff] %v1193_v59  ;;  %v1195_v61 = vpop.f32.mrb[53].mxu1 }
 0x1a3   : > { %1817 = vst [vmem:[%s3217_s4 + $0x688] sm:$0xff] %v1002_v60  ;;  %v1004_v62 = vpop.f32.mrb[54].mxu0  ;;  %1819 = vst [vmem:[%s3217_s4 + $0x698] sm:$0xff] %v1195_v61  ;;  %v1197_v63 = vpop.f32.mrb[54].mxu1 }
 0x1a4   : > { %1824 = vst [vmem:[%s3217_s4 + $0x6c0] sm:$0xff] %v1004_v62  ;;  %v1006_v1 = vpop.f32.mrb[55].mxu0  ;;  %1826 = vst [vmem:[%s3217_s4 + $0x6d0] sm:$0xff] %v1197_v63  ;;  %v1199_v2 = vpop.f32.mrb[55].mxu1 }
 0x1a5   : > { %1825 = vst [vmem:[%s3217_s4 + $0x6c8] sm:$0xff] %v1006_v1  ;;  %1827 = vst [vmem:[%s3217_s4 + $0x6d8] sm:$0xff] %v1199_v2 }
 0x1a9   : > { %v1010_v3 = vpop.f32.mrb[56].mxu0  ;;  %v1203_v4 = vpop.f32.mrb[56].mxu1 }
 0x1aa   : > { %1832 = vst [vmem:[%s3217_s4 + $0x700] sm:$0xff] %v1010_v3  ;;  %v1012_v5 = vpop.f32.mrb[57].mxu0  ;;  %1834 = vst [vmem:[%s3217_s4 + $0x710] sm:$0xff] %v1203_v4  ;;  %v1205_v6 = vpop.f32.mrb[57].mxu1 }
 0x1ab   : > { %1833 = vst [vmem:[%s3217_s4 + $0x708] sm:$0xff] %v1012_v5  ;;  %v1014_v8 = vpop.f32.mrb[58].mxu0  ;;  %1835 = vst [vmem:[%s3217_s4 + $0x718] sm:$0xff] %v1205_v6  ;;  %v1207_v9 = vpop.f32.mrb[58].mxu1 }
 0x1ac   : > { %1840 = vst [vmem:[%s3217_s4 + $0x740] sm:$0xff] %v1014_v8  ;;  %v1016_v10 = vpop.f32.mrb[59].mxu0  ;;  %1842 = vst [vmem:[%s3217_s4 + $0x750] sm:$0xff] %v1207_v9  ;;  %v1209_v11 = vpop.f32.mrb[59].mxu1 }
 0x1ad   : > { %1841 = vst [vmem:[%s3217_s4 + $0x748] sm:$0xff] %v1016_v10  ;;  %1843 = vst [vmem:[%s3217_s4 + $0x758] sm:$0xff] %v1209_v11 }
 0x1b1   : > { %v1020_v12 = vpop.f32.mrb[60].mxu0  ;;  %v1213_v13 = vpop.f32.mrb[60].mxu1 }
 0x1b2   : > { %1848 = vst [vmem:[%s3217_s4 + $0x780] sm:$0xff] %v1020_v12  ;;  %v1022_v14 = vpop.f32.mrb[61].mxu0  ;;  %1850 = vst [vmem:[%s3217_s4 + $0x790] sm:$0xff] %v1213_v13  ;;  %v1215_v15 = vpop.f32.mrb[61].mxu1 }
 0x1b3   : > { %1849 = vst [vmem:[%s3217_s4 + $0x788] sm:$0xff] %v1022_v14  ;;  %v1024_v16 = vpop.f32.mrb[62].mxu0  ;;  %1851 = vst [vmem:[%s3217_s4 + $0x798] sm:$0xff] %v1215_v15  ;;  %v1217_v17 = vpop.f32.mrb[62].mxu1 }
 0x1b4   : > { %1856 = vst [vmem:[%s3217_s4 + $0x7c0] sm:$0xff] %v1024_v16  ;;  %v1026_v18 = vpop.f32.mrb[63].mxu0  ;;  %1858 = vst [vmem:[%s3217_s4 + $0x7d0] sm:$0xff] %v1217_v17  ;;  %v1219_v19 = vpop.f32.mrb[63].mxu1 }
 0x1b5   : > { %1857 = vst [vmem:[%s3217_s4 + $0x7c8] sm:$0xff] %v1026_v18  ;;  %1859 = vst [vmem:[%s3217_s4 + $0x7d8] sm:$0xff] %v1219_v19 }
 0x1b9   : > { %v1256_v7 = vpop.f32.mrb[64].mxu0  ;;  %v1449_v20 = vpop.f32.mrb[64].mxu1 }
 0x1ba   : > { %1612 = vst [vmem:[%s3217_s4 + $0x20] sm:$0xff] %v1256_v7  ;;  %v1258_v21 = vpop.f32.mrb[65].mxu0  ;;  %1614 = vst [vmem:[%s3217_s4 + $0x30] sm:$0xff] %v1449_v20  ;;  %v1451_v22 = vpop.f32.mrb[65].mxu1 }
 0x1bb   : > { %1613 = vst [vmem:[%s3217_s4 + $0x28] sm:$0xff] %v1258_v21  ;;  %v1260_v23 = vpop.f32.mrb[66].mxu0  ;;  %1615 = vst [vmem:[%s3217_s4 + $0x38] sm:$0xff] %v1451_v22  ;;  %v1453_v24 = vpop.f32.mrb[66].mxu1 }
 0x1bc   : > { %1620 = vst [vmem:[%s3217_s4 + $0x60] sm:$0xff] %v1260_v23  ;;  %v1262_v25 = vpop.f32.mrb[67].mxu0  ;;  %1622 = vst [vmem:[%s3217_s4 + $0x70] sm:$0xff] %v1453_v24  ;;  %v1455_v26 = vpop.f32.mrb[67].mxu1 }
 0x1bd   : > { %1621 = vst [vmem:[%s3217_s4 + $0x68] sm:$0xff] %v1262_v25  ;;  %1623 = vst [vmem:[%s3217_s4 + $0x78] sm:$0xff] %v1455_v26 }
 0x1c1   : > { %v1266_v27 = vpop.f32.mrb[68].mxu0  ;;  %v1459_v28 = vpop.f32.mrb[68].mxu1 }
 0x1c2   : > { %1628 = vst [vmem:[%s3217_s4 + $0xa0] sm:$0xff] %v1266_v27  ;;  %v1268_v29 = vpop.f32.mrb[69].mxu0  ;;  %1630 = vst [vmem:[%s3217_s4 + $0xb0] sm:$0xff] %v1459_v28  ;;  %v1461_v30 = vpop.f32.mrb[69].mxu1 }
 0x1c3   : > { %1629 = vst [vmem:[%s3217_s4 + $0xa8] sm:$0xff] %v1268_v29  ;;  %v1270_v31 = vpop.f32.mrb[70].mxu0  ;;  %1631 = vst [vmem:[%s3217_s4 + $0xb8] sm:$0xff] %v1461_v30  ;;  %v1463_v32 = vpop.f32.mrb[70].mxu1 }
 0x1c4   : > { %1636 = vst [vmem:[%s3217_s4 + $0xe0] sm:$0xff] %v1270_v31  ;;  %v1272_v33 = vpop.f32.mrb[71].mxu0  ;;  %1638 = vst [vmem:[%s3217_s4 + $0xf0] sm:$0xff] %v1463_v32  ;;  %v1465_v34 = vpop.f32.mrb[71].mxu1 }
 0x1c5   : > { %1637 = vst [vmem:[%s3217_s4 + $0xe8] sm:$0xff] %v1272_v33  ;;  %1639 = vst [vmem:[%s3217_s4 + $0xf8] sm:$0xff] %v1465_v34 }
 0x1c9   : > { %v1276_v35 = vpop.f32.mrb[72].mxu0  ;;  %v1469_v36 = vpop.f32.mrb[72].mxu1 }
 0x1ca   : > { %1644 = vst [vmem:[%s3217_s4 + $0x120] sm:$0xff] %v1276_v35  ;;  %v1278_v37 = vpop.f32.mrb[73].mxu0  ;;  %1646 = vst [vmem:[%s3217_s4 + $0x130] sm:$0xff] %v1469_v36  ;;  %v1471_v38 = vpop.f32.mrb[73].mxu1 }
 0x1cb   : > { %1645 = vst [vmem:[%s3217_s4 + $0x128] sm:$0xff] %v1278_v37  ;;  %v1280_v39 = vpop.f32.mrb[74].mxu0  ;;  %1647 = vst [vmem:[%s3217_s4 + $0x138] sm:$0xff] %v1471_v38  ;;  %v1473_v40 = vpop.f32.mrb[74].mxu1 }
 0x1cc   : > { %1652 = vst [vmem:[%s3217_s4 + $0x160] sm:$0xff] %v1280_v39  ;;  %v1282_v41 = vpop.f32.mrb[75].mxu0  ;;  %1654 = vst [vmem:[%s3217_s4 + $0x170] sm:$0xff] %v1473_v40  ;;  %v1475_v42 = vpop.f32.mrb[75].mxu1 }
 0x1cd   : > { %1653 = vst [vmem:[%s3217_s4 + $0x168] sm:$0xff] %v1282_v41  ;;  %1655 = vst [vmem:[%s3217_s4 + $0x178] sm:$0xff] %v1475_v42 }
 0x1d1   : > { %v1286_v43 = vpop.f32.mrb[76].mxu0  ;;  %v1479_v44 = vpop.f32.mrb[76].mxu1 }
 0x1d2   : > { %1660 = vst [vmem:[%s3217_s4 + $0x1a0] sm:$0xff] %v1286_v43  ;;  %v1288_v45 = vpop.f32.mrb[77].mxu0  ;;  %1662 = vst [vmem:[%s3217_s4 + $0x1b0] sm:$0xff] %v1479_v44  ;;  %v1481_v46 = vpop.f32.mrb[77].mxu1 }
 0x1d3   : > { %1661 = vst [vmem:[%s3217_s4 + $0x1a8] sm:$0xff] %v1288_v45  ;;  %v1290_v47 = vpop.f32.mrb[78].mxu0  ;;  %1663 = vst [vmem:[%s3217_s4 + $0x1b8] sm:$0xff] %v1481_v46  ;;  %v1483_v48 = vpop.f32.mrb[78].mxu1 }
 0x1d4   : > { %1668 = vst [vmem:[%s3217_s4 + $0x1e0] sm:$0xff] %v1290_v47  ;;  %v1292_v49 = vpop.f32.mrb[79].mxu0  ;;  %1670 = vst [vmem:[%s3217_s4 + $0x1f0] sm:$0xff] %v1483_v48  ;;  %v1485_v50 = vpop.f32.mrb[79].mxu1 }
 0x1d5   : > { %1669 = vst [vmem:[%s3217_s4 + $0x1e8] sm:$0xff] %v1292_v49  ;;  %1671 = vst [vmem:[%s3217_s4 + $0x1f8] sm:$0xff] %v1485_v50 }
 0x1d9   : > { %v1296_v51 = vpop.f32.mrb[80].mxu0  ;;  %v1489_v52 = vpop.f32.mrb[80].mxu1 }
 0x1da   : > { %1676 = vst [vmem:[%s3217_s4 + $0x220] sm:$0xff] %v1296_v51  ;;  %v1298_v53 = vpop.f32.mrb[81].mxu0  ;;  %1678 = vst [vmem:[%s3217_s4 + $0x230] sm:$0xff] %v1489_v52  ;;  %v1491_v54 = vpop.f32.mrb[81].mxu1 }
 0x1db   : > { %1677 = vst [vmem:[%s3217_s4 + $0x228] sm:$0xff] %v1298_v53  ;;  %v1300_v55 = vpop.f32.mrb[82].mxu0  ;;  %1679 = vst [vmem:[%s3217_s4 + $0x238] sm:$0xff] %v1491_v54  ;;  %v1493_v56 = vpop.f32.mrb[82].mxu1 }
 0x1dc   : > { %1684 = vst [vmem:[%s3217_s4 + $0x260] sm:$0xff] %v1300_v55  ;;  %v1302_v57 = vpop.f32.mrb[83].mxu0  ;;  %1686 = vst [vmem:[%s3217_s4 + $0x270] sm:$0xff] %v1493_v56  ;;  %v1495_v0 = vpop.f32.mrb[83].mxu1 }
 0x1dd   : > { %1685 = vst [vmem:[%s3217_s4 + $0x268] sm:$0xff] %v1302_v57  ;;  %1687 = vst [vmem:[%s3217_s4 + $0x278] sm:$0xff] %v1495_v0 }
 0x1e1   : > { %v1306_v58 = vpop.f32.mrb[84].mxu0  ;;  %v1499_v59 = vpop.f32.mrb[84].mxu1 }
 0x1e2   : > { %1692 = vst [vmem:[%s3217_s4 + $0x2a0] sm:$0xff] %v1306_v58  ;;  %v1308_v60 = vpop.f32.mrb[85].mxu0  ;;  %1694 = vst [vmem:[%s3217_s4 + $0x2b0] sm:$0xff] %v1499_v59  ;;  %v1501_v61 = vpop.f32.mrb[85].mxu1 }
 0x1e3   : > { %1693 = vst [vmem:[%s3217_s4 + $0x2a8] sm:$0xff] %v1308_v60  ;;  %v1310_v62 = vpop.f32.mrb[86].mxu0  ;;  %1695 = vst [vmem:[%s3217_s4 + $0x2b8] sm:$0xff] %v1501_v61  ;;  %v1503_v63 = vpop.f32.mrb[86].mxu1 }
 0x1e4   : > { %1700 = vst [vmem:[%s3217_s4 + $0x2e0] sm:$0xff] %v1310_v62  ;;  %v1312_v1 = vpop.f32.mrb[87].mxu0  ;;  %1702 = vst [vmem:[%s3217_s4 + $0x2f0] sm:$0xff] %v1503_v63  ;;  %v1505_v2 = vpop.f32.mrb[87].mxu1 }
 0x1e5   : > { %1701 = vst [vmem:[%s3217_s4 + $0x2e8] sm:$0xff] %v1312_v1  ;;  %1703 = vst [vmem:[%s3217_s4 + $0x2f8] sm:$0xff] %v1505_v2 }
 0x1e9   : > { %v1316_v3 = vpop.f32.mrb[88].mxu0  ;;  %v1509_v4 = vpop.f32.mrb[88].mxu1 }
 0x1ea   : > { %1708 = vst [vmem:[%s3217_s4 + $0x320] sm:$0xff] %v1316_v3  ;;  %v1318_v5 = vpop.f32.mrb[89].mxu0  ;;  %1710 = vst [vmem:[%s3217_s4 + $0x330] sm:$0xff] %v1509_v4  ;;  %v1511_v6 = vpop.f32.mrb[89].mxu1 }
 0x1eb   : > { %1709 = vst [vmem:[%s3217_s4 + $0x328] sm:$0xff] %v1318_v5  ;;  %v1320_v8 = vpop.f32.mrb[90].mxu0  ;;  %1711 = vst [vmem:[%s3217_s4 + $0x338] sm:$0xff] %v1511_v6  ;;  %v1513_v9 = vpop.f32.mrb[90].mxu1 }
 0x1ec   : > { %1716 = vst [vmem:[%s3217_s4 + $0x360] sm:$0xff] %v1320_v8  ;;  %v1322_v10 = vpop.f32.mrb[91].mxu0  ;;  %1718 = vst [vmem:[%s3217_s4 + $0x370] sm:$0xff] %v1513_v9  ;;  %v1515_v11 = vpop.f32.mrb[91].mxu1 }
 0x1ed   : > { %1717 = vst [vmem:[%s3217_s4 + $0x368] sm:$0xff] %v1322_v10  ;;  %1719 = vst [vmem:[%s3217_s4 + $0x378] sm:$0xff] %v1515_v11 }
 0x1f1   : > { %v1326_v12 = vpop.f32.mrb[92].mxu0  ;;  %v1519_v13 = vpop.f32.mrb[92].mxu1 }
 0x1f2   : > { %1724 = vst [vmem:[%s3217_s4 + $0x3a0] sm:$0xff] %v1326_v12  ;;  %v1328_v14 = vpop.f32.mrb[93].mxu0  ;;  %1726 = vst [vmem:[%s3217_s4 + $0x3b0] sm:$0xff] %v1519_v13  ;;  %v1521_v15 = vpop.f32.mrb[93].mxu1 }
 0x1f3   : > { %1725 = vst [vmem:[%s3217_s4 + $0x3a8] sm:$0xff] %v1328_v14  ;;  %v1330_v16 = vpop.f32.mrb[94].mxu0  ;;  %1727 = vst [vmem:[%s3217_s4 + $0x3b8] sm:$0xff] %v1521_v15  ;;  %v1523_v17 = vpop.f32.mrb[94].mxu1 }
 0x1f4   : > { %1732 = vst [vmem:[%s3217_s4 + $0x3e0] sm:$0xff] %v1330_v16  ;;  %v1332_v18 = vpop.f32.mrb[95].mxu0  ;;  %1734 = vst [vmem:[%s3217_s4 + $0x3f0] sm:$0xff] %v1523_v17  ;;  %v1525_v19 = vpop.f32.mrb[95].mxu1 }
 0x1f5   : > { %1733 = vst [vmem:[%s3217_s4 + $0x3e8] sm:$0xff] %v1332_v18  ;;  %1735 = vst [vmem:[%s3217_s4 + $0x3f8] sm:$0xff] %v1525_v19 }
 0x1f9   : > { %v1336_v7 = vpop.f32.mrb[96].mxu0  ;;  %v1529_v20 = vpop.f32.mrb[96].mxu1 }
 0x1fa   : > { %1740 = vst [vmem:[%s3217_s4 + $0x420] sm:$0xff] %v1336_v7  ;;  %v1338_v21 = vpop.f32.mrb[97].mxu0  ;;  %1742 = vst [vmem:[%s3217_s4 + $0x430] sm:$0xff] %v1529_v20  ;;  %v1531_v22 = vpop.f32.mrb[97].mxu1  ;;  %v1889_v7 = vld [vmem:[%s3217_s4] sm:$0xff] (%p2832_p9)  ;;  %v1891_v20 = vld [vmem:[%s3217_s4 + $0x8] sm:$0xff] (%p2832_p9) }
 0x1fb   : > { %1741 = vst [vmem:[%s3217_s4 + $0x428] sm:$0xff] %v1338_v21  ;;  %v1340_v23 = vpop.f32.mrb[98].mxu0  ;;  %1743 = vst [vmem:[%s3217_s4 + $0x438] sm:$0xff] %v1531_v22  ;;  %v1533_v24 = vpop.f32.mrb[98].mxu1  ;;  %v1893_v21 = vld [vmem:[%s3217_s4 + $0x10] sm:$0xff] (%p2832_p9)  ;;  %v1895_v22 = vld [vmem:[%s3217_s4 + $0x18] sm:$0xff] (%p2832_p9) }
 0x1fc   : > { %1748 = vst [vmem:[%s3217_s4 + $0x460] sm:$0xff] %v1340_v23  ;;  %v1342_v25 = vpop.f32.mrb[99].mxu0  ;;  %1750 = vst [vmem:[%s3217_s4 + $0x470] sm:$0xff] %v1533_v24  ;;  %v1535_v26 = vpop.f32.mrb[99].mxu1  ;;  %v1897_v23 = vld [vmem:[%s3217_s4 + $0x20] sm:$0xff] (%p2832_p9)  ;;  %v1899_v24 = vld [vmem:[%s3217_s4 + $0x28] sm:$0xff] (%p2832_p9) }
 0x1fd   : > { %1749 = vst [vmem:[%s3217_s4 + $0x468] sm:$0xff] %v1342_v25  ;;  %1751 = vst [vmem:[%s3217_s4 + $0x478] sm:$0xff] %v1535_v26  ;;  %v1901_v25 = vld [vmem:[%s3217_s4 + $0x30] sm:$0xff] (%p2832_p9)  ;;  %v1903_v26 = vld [vmem:[%s3217_s4 + $0x38] sm:$0xff] (%p2832_p9) }
 0x1fe   : > { %1890 = vst [vmem:[%s3509_s18] sm:$0xff] (%p2832_p9), %v1889_v7  ;;  %1892 = vst [vmem:[%s3509_s18 + $0x8] sm:$0xff] (%p2832_p9), %v1891_v20  ;;  %v2017_v7 = vld [vmem:[%s3217_s4 + $0x200] sm:$0xff] (%p2832_p9)  ;;  %v2019_v20 = vld [vmem:[%s3217_s4 + $0x208] sm:$0xff] (%p2832_p9) }
 0x1ff   : > { %1894 = vst [vmem:[%s3509_s18 + $0x10] sm:$0xff] (%p2832_p9), %v1893_v21  ;;  %1896 = vst [vmem:[%s3509_s18 + $0x18] sm:$0xff] (%p2832_p9), %v1895_v22  ;;  %v2021_v21 = vld [vmem:[%s3217_s4 + $0x210] sm:$0xff] (%p2832_p9)  ;;  %v2023_v22 = vld [vmem:[%s3217_s4 + $0x218] sm:$0xff] (%p2832_p9) }
 0x200   : > { %1898 = vst [vmem:[%s3509_s18 + $0x20] sm:$0xff] (%p2832_p9), %v1897_v23  ;;  %1900 = vst [vmem:[%s3509_s18 + $0x28] sm:$0xff] (%p2832_p9), %v1899_v24  ;;  %v2025_v23 = vld [vmem:[%s3217_s4 + $0x220] sm:$0xff] (%p2832_p9)  ;;  %v2027_v24 = vld [vmem:[%s3217_s4 + $0x228] sm:$0xff] (%p2832_p9) }
 0x201   : > { %v1346_v27 = vpop.f32.mrb[100].mxu0  ;;  %v1539_v28 = vpop.f32.mrb[100].mxu1  ;;  %1902 = vst [vmem:[%s3509_s18 + $0x30] sm:$0xff] (%p2832_p9), %v1901_v25  ;;  %1904 = vst [vmem:[%s3509_s18 + $0x38] sm:$0xff] (%p2832_p9), %v1903_v26  ;;  %v2029_v25 = vld [vmem:[%s3217_s4 + $0x230] sm:$0xff] (%p2832_p9)  ;;  %v2031_v26 = vld [vmem:[%s3217_s4 + $0x238] sm:$0xff] (%p2832_p9) }
 0x202   : > { %1756 = vst [vmem:[%s3217_s4 + $0x4a0] sm:$0xff] %v1346_v27  ;;  %v1348_v29 = vpop.f32.mrb[101].mxu0  ;;  %1758 = vst [vmem:[%s3217_s4 + $0x4b0] sm:$0xff] %v1539_v28  ;;  %v1541_v30 = vpop.f32.mrb[101].mxu1  ;;  %v1905_v27 = vld [vmem:[%s3217_s4 + $0x40] sm:$0xff] (%p2832_p9)  ;;  %v1907_v28 = vld [vmem:[%s3217_s4 + $0x48] sm:$0xff] (%p2832_p9) }
 0x203   : > { %1757 = vst [vmem:[%s3217_s4 + $0x4a8] sm:$0xff] %v1348_v29  ;;  %v1350_v31 = vpop.f32.mrb[102].mxu0  ;;  %1759 = vst [vmem:[%s3217_s4 + $0x4b8] sm:$0xff] %v1541_v30  ;;  %v1543_v32 = vpop.f32.mrb[102].mxu1  ;;  %v1909_v29 = vld [vmem:[%s3217_s4 + $0x50] sm:$0xff] (%p2832_p9)  ;;  %v1911_v30 = vld [vmem:[%s3217_s4 + $0x58] sm:$0xff] (%p2832_p9) }
 0x204   : > { %1764 = vst [vmem:[%s3217_s4 + $0x4e0] sm:$0xff] %v1350_v31  ;;  %v1352_v33 = vpop.f32.mrb[103].mxu0  ;;  %1766 = vst [vmem:[%s3217_s4 + $0x4f0] sm:$0xff] %v1543_v32  ;;  %v1545_v34 = vpop.f32.mrb[103].mxu1  ;;  %v1913_v31 = vld [vmem:[%s3217_s4 + $0x60] sm:$0xff] (%p2832_p9)  ;;  %v1915_v32 = vld [vmem:[%s3217_s4 + $0x68] sm:$0xff] (%p2832_p9) }
 0x205   : > { %1765 = vst [vmem:[%s3217_s4 + $0x4e8] sm:$0xff] %v1352_v33  ;;  %1767 = vst [vmem:[%s3217_s4 + $0x4f8] sm:$0xff] %v1545_v34  ;;  %v1917_v33 = vld [vmem:[%s3217_s4 + $0x70] sm:$0xff] (%p2832_p9)  ;;  %v1919_v34 = vld [vmem:[%s3217_s4 + $0x78] sm:$0xff] (%p2832_p9) }
 0x206   : > { %1906 = vst [vmem:[%s3509_s18 + $0x100] sm:$0xff] (%p2832_p9), %v1905_v27  ;;  %1908 = vst [vmem:[%s3509_s18 + $0x108] sm:$0xff] (%p2832_p9), %v1907_v28  ;;  %v2033_v27 = vld [vmem:[%s3217_s4 + $0x240] sm:$0xff] (%p2832_p9)  ;;  %v2035_v28 = vld [vmem:[%s3217_s4 + $0x248] sm:$0xff] (%p2832_p9) }
 0x207   : > { %1910 = vst [vmem:[%s3509_s18 + $0x110] sm:$0xff] (%p2832_p9), %v1909_v29  ;;  %1912 = vst [vmem:[%s3509_s18 + $0x118] sm:$0xff] (%p2832_p9), %v1911_v30  ;;  %v2037_v29 = vld [vmem:[%s3217_s4 + $0x250] sm:$0xff] (%p2832_p9)  ;;  %v2039_v30 = vld [vmem:[%s3217_s4 + $0x258] sm:$0xff] (%p2832_p9) }
 0x208   : > { %1914 = vst [vmem:[%s3509_s18 + $0x120] sm:$0xff] (%p2832_p9), %v1913_v31  ;;  %1916 = vst [vmem:[%s3509_s18 + $0x128] sm:$0xff] (%p2832_p9), %v1915_v32  ;;  %v2041_v31 = vld [vmem:[%s3217_s4 + $0x260] sm:$0xff] (%p2832_p9)  ;;  %v2043_v32 = vld [vmem:[%s3217_s4 + $0x268] sm:$0xff] (%p2832_p9) }
 0x209   : > { %v1356_v35 = vpop.f32.mrb[104].mxu0  ;;  %v1549_v36 = vpop.f32.mrb[104].mxu1  ;;  %1918 = vst [vmem:[%s3509_s18 + $0x130] sm:$0xff] (%p2832_p9), %v1917_v33  ;;  %1920 = vst [vmem:[%s3509_s18 + $0x138] sm:$0xff] (%p2832_p9), %v1919_v34  ;;  %v2045_v33 = vld [vmem:[%s3217_s4 + $0x270] sm:$0xff] (%p2832_p9)  ;;  %v2047_v34 = vld [vmem:[%s3217_s4 + $0x278] sm:$0xff] (%p2832_p9) }
 0x20a   : > { %1772 = vst [vmem:[%s3217_s4 + $0x520] sm:$0xff] %v1356_v35  ;;  %v1358_v37 = vpop.f32.mrb[105].mxu0  ;;  %1774 = vst [vmem:[%s3217_s4 + $0x530] sm:$0xff] %v1549_v36  ;;  %v1551_v38 = vpop.f32.mrb[105].mxu1  ;;  %v1921_v35 = vld [vmem:[%s3217_s4 + $0x80] sm:$0xff] (%p2832_p9)  ;;  %v1923_v36 = vld [vmem:[%s3217_s4 + $0x88] sm:$0xff] (%p2832_p9) }
 0x20b   : > { %1773 = vst [vmem:[%s3217_s4 + $0x528] sm:$0xff] %v1358_v37  ;;  %v1360_v39 = vpop.f32.mrb[106].mxu0  ;;  %1775 = vst [vmem:[%s3217_s4 + $0x538] sm:$0xff] %v1551_v38  ;;  %v1553_v40 = vpop.f32.mrb[106].mxu1  ;;  %v1925_v37 = vld [vmem:[%s3217_s4 + $0x90] sm:$0xff] (%p2832_p9)  ;;  %v1927_v38 = vld [vmem:[%s3217_s4 + $0x98] sm:$0xff] (%p2832_p9) }
 0x20c   : > { %1780 = vst [vmem:[%s3217_s4 + $0x560] sm:$0xff] %v1360_v39  ;;  %v1362_v41 = vpop.f32.mrb[107].mxu0  ;;  %1782 = vst [vmem:[%s3217_s4 + $0x570] sm:$0xff] %v1553_v40  ;;  %v1555_v42 = vpop.f32.mrb[107].mxu1  ;;  %v1929_v39 = vld [vmem:[%s3217_s4 + $0xa0] sm:$0xff] (%p2832_p9)  ;;  %v1931_v40 = vld [vmem:[%s3217_s4 + $0xa8] sm:$0xff] (%p2832_p9) }
 0x20d   : > { %1781 = vst [vmem:[%s3217_s4 + $0x568] sm:$0xff] %v1362_v41  ;;  %1783 = vst [vmem:[%s3217_s4 + $0x578] sm:$0xff] %v1555_v42  ;;  %v1933_v41 = vld [vmem:[%s3217_s4 + $0xb0] sm:$0xff] (%p2832_p9)  ;;  %v1935_v42 = vld [vmem:[%s3217_s4 + $0xb8] sm:$0xff] (%p2832_p9) }
 0x20e   : > { %1922 = vst [vmem:[%s3509_s18 + $0x200] sm:$0xff] (%p2832_p9), %v1921_v35  ;;  %1924 = vst [vmem:[%s3509_s18 + $0x208] sm:$0xff] (%p2832_p9), %v1923_v36  ;;  %v2049_v35 = vld [vmem:[%s3217_s4 + $0x280] sm:$0xff] (%p2832_p9)  ;;  %v2051_v36 = vld [vmem:[%s3217_s4 + $0x288] sm:$0xff] (%p2832_p9) }
 0x20f   : > { %1926 = vst [vmem:[%s3509_s18 + $0x210] sm:$0xff] (%p2832_p9), %v1925_v37  ;;  %1928 = vst [vmem:[%s3509_s18 + $0x218] sm:$0xff] (%p2832_p9), %v1927_v38  ;;  %v2053_v37 = vld [vmem:[%s3217_s4 + $0x290] sm:$0xff] (%p2832_p9)  ;;  %v2055_v38 = vld [vmem:[%s3217_s4 + $0x298] sm:$0xff] (%p2832_p9) }
 0x210   : > { %1930 = vst [vmem:[%s3509_s18 + $0x220] sm:$0xff] (%p2832_p9), %v1929_v39  ;;  %1932 = vst [vmem:[%s3509_s18 + $0x228] sm:$0xff] (%p2832_p9), %v1931_v40  ;;  %v2057_v39 = vld [vmem:[%s3217_s4 + $0x2a0] sm:$0xff] (%p2832_p9)  ;;  %v2059_v40 = vld [vmem:[%s3217_s4 + $0x2a8] sm:$0xff] (%p2832_p9) }
 0x211   : > { %v1366_v43 = vpop.f32.mrb[108].mxu0  ;;  %v1559_v44 = vpop.f32.mrb[108].mxu1  ;;  %1934 = vst [vmem:[%s3509_s18 + $0x230] sm:$0xff] (%p2832_p9), %v1933_v41  ;;  %1936 = vst [vmem:[%s3509_s18 + $0x238] sm:$0xff] (%p2832_p9), %v1935_v42  ;;  %v2061_v41 = vld [vmem:[%s3217_s4 + $0x2b0] sm:$0xff] (%p2832_p9)  ;;  %v2063_v42 = vld [vmem:[%s3217_s4 + $0x2b8] sm:$0xff] (%p2832_p9) }
 0x212   : > { %1788 = vst [vmem:[%s3217_s4 + $0x5a0] sm:$0xff] %v1366_v43  ;;  %v1368_v45 = vpop.f32.mrb[109].mxu0  ;;  %1790 = vst [vmem:[%s3217_s4 + $0x5b0] sm:$0xff] %v1559_v44  ;;  %v1561_v46 = vpop.f32.mrb[109].mxu1  ;;  %v1937_v43 = vld [vmem:[%s3217_s4 + $0xc0] sm:$0xff] (%p2832_p9)  ;;  %v1939_v44 = vld [vmem:[%s3217_s4 + $0xc8] sm:$0xff] (%p2832_p9) }
 0x213   : > { %1789 = vst [vmem:[%s3217_s4 + $0x5a8] sm:$0xff] %v1368_v45  ;;  %v1370_v47 = vpop.f32.mrb[110].mxu0  ;;  %1791 = vst [vmem:[%s3217_s4 + $0x5b8] sm:$0xff] %v1561_v46  ;;  %v1563_v48 = vpop.f32.mrb[110].mxu1  ;;  %v1941_v45 = vld [vmem:[%s3217_s4 + $0xd0] sm:$0xff] (%p2832_p9)  ;;  %v1943_v46 = vld [vmem:[%s3217_s4 + $0xd8] sm:$0xff] (%p2832_p9) }
 0x214   : > { %1796 = vst [vmem:[%s3217_s4 + $0x5e0] sm:$0xff] %v1370_v47  ;;  %v1372_v49 = vpop.f32.mrb[111].mxu0  ;;  %1798 = vst [vmem:[%s3217_s4 + $0x5f0] sm:$0xff] %v1563_v48  ;;  %v1565_v50 = vpop.f32.mrb[111].mxu1  ;;  %v1945_v47 = vld [vmem:[%s3217_s4 + $0xe0] sm:$0xff] (%p2832_p9)  ;;  %v1947_v48 = vld [vmem:[%s3217_s4 + $0xe8] sm:$0xff] (%p2832_p9) }
 0x215   : > { %1797 = vst [vmem:[%s3217_s4 + $0x5e8] sm:$0xff] %v1372_v49  ;;  %1799 = vst [vmem:[%s3217_s4 + $0x5f8] sm:$0xff] %v1565_v50  ;;  %v1949_v49 = vld [vmem:[%s3217_s4 + $0xf0] sm:$0xff] (%p2832_p9)  ;;  %v1951_v50 = vld [vmem:[%s3217_s4 + $0xf8] sm:$0xff] (%p2832_p9) }
 0x216   : > { %1938 = vst [vmem:[%s3509_s18 + $0x300] sm:$0xff] (%p2832_p9), %v1937_v43  ;;  %1940 = vst [vmem:[%s3509_s18 + $0x308] sm:$0xff] (%p2832_p9), %v1939_v44  ;;  %v2065_v43 = vld [vmem:[%s3217_s4 + $0x2c0] sm:$0xff] (%p2832_p9)  ;;  %v2067_v44 = vld [vmem:[%s3217_s4 + $0x2c8] sm:$0xff] (%p2832_p9) }
 0x217   : > { %1942 = vst [vmem:[%s3509_s18 + $0x310] sm:$0xff] (%p2832_p9), %v1941_v45  ;;  %1944 = vst [vmem:[%s3509_s18 + $0x318] sm:$0xff] (%p2832_p9), %v1943_v46  ;;  %v2069_v45 = vld [vmem:[%s3217_s4 + $0x2d0] sm:$0xff] (%p2832_p9)  ;;  %v2071_v46 = vld [vmem:[%s3217_s4 + $0x2d8] sm:$0xff] (%p2832_p9) }
 0x218   : > { %1946 = vst [vmem:[%s3509_s18 + $0x320] sm:$0xff] (%p2832_p9), %v1945_v47  ;;  %1948 = vst [vmem:[%s3509_s18 + $0x328] sm:$0xff] (%p2832_p9), %v1947_v48  ;;  %v2073_v47 = vld [vmem:[%s3217_s4 + $0x2e0] sm:$0xff] (%p2832_p9)  ;;  %v2075_v48 = vld [vmem:[%s3217_s4 + $0x2e8] sm:$0xff] (%p2832_p9) }
 0x219   : > { %v1376_v51 = vpop.f32.mrb[112].mxu0  ;;  %v1569_v52 = vpop.f32.mrb[112].mxu1  ;;  %1950 = vst [vmem:[%s3509_s18 + $0x330] sm:$0xff] (%p2832_p9), %v1949_v49  ;;  %1952 = vst [vmem:[%s3509_s18 + $0x338] sm:$0xff] (%p2832_p9), %v1951_v50  ;;  %v2077_v49 = vld [vmem:[%s3217_s4 + $0x2f0] sm:$0xff] (%p2832_p9)  ;;  %v2079_v50 = vld [vmem:[%s3217_s4 + $0x2f8] sm:$0xff] (%p2832_p9) }
 0x21a   : > { %1804 = vst [vmem:[%s3217_s4 + $0x620] sm:$0xff] %v1376_v51  ;;  %v1378_v53 = vpop.f32.mrb[113].mxu0  ;;  %1806 = vst [vmem:[%s3217_s4 + $0x630] sm:$0xff] %v1569_v52  ;;  %v1571_v54 = vpop.f32.mrb[113].mxu1  ;;  %v1953_v51 = vld [vmem:[%s3217_s4 + $0x100] sm:$0xff] (%p2832_p9)  ;;  %v1955_v52 = vld [vmem:[%s3217_s4 + $0x108] sm:$0xff] (%p2832_p9) }
 0x21b   : > { %1805 = vst [vmem:[%s3217_s4 + $0x628] sm:$0xff] %v1378_v53  ;;  %v1380_v55 = vpop.f32.mrb[114].mxu0  ;;  %1807 = vst [vmem:[%s3217_s4 + $0x638] sm:$0xff] %v1571_v54  ;;  %v1573_v56 = vpop.f32.mrb[114].mxu1  ;;  %v1957_v53 = vld [vmem:[%s3217_s4 + $0x110] sm:$0xff] (%p2832_p9)  ;;  %v1959_v54 = vld [vmem:[%s3217_s4 + $0x118] sm:$0xff] (%p2832_p9) }
 0x21c   : > { %1812 = vst [vmem:[%s3217_s4 + $0x660] sm:$0xff] %v1380_v55  ;;  %v1382_v57 = vpop.f32.mrb[115].mxu0  ;;  %1814 = vst [vmem:[%s3217_s4 + $0x670] sm:$0xff] %v1573_v56  ;;  %v1575_v0 = vpop.f32.mrb[115].mxu1  ;;  %v1961_v55 = vld [vmem:[%s3217_s4 + $0x120] sm:$0xff] (%p2832_p9)  ;;  %v1963_v56 = vld [vmem:[%s3217_s4 + $0x128] sm:$0xff] (%p2832_p9) }
 0x21d   : > { %1813 = vst [vmem:[%s3217_s4 + $0x668] sm:$0xff] %v1382_v57  ;;  %1815 = vst [vmem:[%s3217_s4 + $0x678] sm:$0xff] %v1575_v0  ;;  %v1965_v57 = vld [vmem:[%s3217_s4 + $0x130] sm:$0xff] (%p2832_p9)  ;;  %v1967_v0 = vld [vmem:[%s3217_s4 + $0x138] sm:$0xff] (%p2832_p9) }
 0x21e   : > { %1954 = vst [vmem:[%s3509_s18 + $0x400] sm:$0xff] (%p2832_p9), %v1953_v51  ;;  %1956 = vst [vmem:[%s3509_s18 + $0x408] sm:$0xff] (%p2832_p9), %v1955_v52  ;;  %v2081_v51 = vld [vmem:[%s3217_s4 + $0x300] sm:$0xff] (%p2832_p9)  ;;  %v2083_v52 = vld [vmem:[%s3217_s4 + $0x308] sm:$0xff] (%p2832_p9) }
 0x21f   : > { %1958 = vst [vmem:[%s3509_s18 + $0x410] sm:$0xff] (%p2832_p9), %v1957_v53  ;;  %1960 = vst [vmem:[%s3509_s18 + $0x418] sm:$0xff] (%p2832_p9), %v1959_v54  ;;  %v2085_v53 = vld [vmem:[%s3217_s4 + $0x310] sm:$0xff] (%p2832_p9)  ;;  %v2087_v54 = vld [vmem:[%s3217_s4 + $0x318] sm:$0xff] (%p2832_p9) }
 0x220   : > { %1962 = vst [vmem:[%s3509_s18 + $0x420] sm:$0xff] (%p2832_p9), %v1961_v55  ;;  %1964 = vst [vmem:[%s3509_s18 + $0x428] sm:$0xff] (%p2832_p9), %v1963_v56  ;;  %v2089_v55 = vld [vmem:[%s3217_s4 + $0x320] sm:$0xff] (%p2832_p9)  ;;  %v2091_v56 = vld [vmem:[%s3217_s4 + $0x328] sm:$0xff] (%p2832_p9) }
 0x221   : > { %v1386_v58 = vpop.f32.mrb[116].mxu0  ;;  %v1579_v59 = vpop.f32.mrb[116].mxu1  ;;  %1966 = vst [vmem:[%s3509_s18 + $0x430] sm:$0xff] (%p2832_p9), %v1965_v57  ;;  %1968 = vst [vmem:[%s3509_s18 + $0x438] sm:$0xff] (%p2832_p9), %v1967_v0  ;;  %v2093_v57 = vld [vmem:[%s3217_s4 + $0x330] sm:$0xff] (%p2832_p9)  ;;  %v2095_v0 = vld [vmem:[%s3217_s4 + $0x338] sm:$0xff] (%p2832_p9) }
 0x222   : > { %1820 = vst [vmem:[%s3217_s4 + $0x6a0] sm:$0xff] %v1386_v58  ;;  %v1388_v60 = vpop.f32.mrb[117].mxu0  ;;  %1822 = vst [vmem:[%s3217_s4 + $0x6b0] sm:$0xff] %v1579_v59  ;;  %v1581_v61 = vpop.f32.mrb[117].mxu1  ;;  %v1969_v58 = vld [vmem:[%s3217_s4 + $0x140] sm:$0xff] (%p2832_p9)  ;;  %v1971_v59 = vld [vmem:[%s3217_s4 + $0x148] sm:$0xff] (%p2832_p9) }
 0x223   : > { %1821 = vst [vmem:[%s3217_s4 + $0x6a8] sm:$0xff] %v1388_v60  ;;  %v1390_v62 = vpop.f32.mrb[118].mxu0  ;;  %1823 = vst [vmem:[%s3217_s4 + $0x6b8] sm:$0xff] %v1581_v61  ;;  %v1583_v63 = vpop.f32.mrb[118].mxu1  ;;  %v1973_v60 = vld [vmem:[%s3217_s4 + $0x150] sm:$0xff] (%p2832_p9)  ;;  %v1975_v61 = vld [vmem:[%s3217_s4 + $0x158] sm:$0xff] (%p2832_p9) }
 0x224   : > { %1828 = vst [vmem:[%s3217_s4 + $0x6e0] sm:$0xff] %v1390_v62  ;;  %v1392_v1 = vpop.f32.mrb[119].mxu0  ;;  %1830 = vst [vmem:[%s3217_s4 + $0x6f0] sm:$0xff] %v1583_v63  ;;  %v1585_v2 = vpop.f32.mrb[119].mxu1  ;;  %v1977_v62 = vld [vmem:[%s3217_s4 + $0x160] sm:$0xff] (%p2832_p9)  ;;  %v1979_v63 = vld [vmem:[%s3217_s4 + $0x168] sm:$0xff] (%p2832_p9) }
 0x225   : > { %1829 = vst [vmem:[%s3217_s4 + $0x6e8] sm:$0xff] %v1392_v1  ;;  %1831 = vst [vmem:[%s3217_s4 + $0x6f8] sm:$0xff] %v1585_v2  ;;  %v1981_v1 = vld [vmem:[%s3217_s4 + $0x170] sm:$0xff] (%p2832_p9)  ;;  %v1983_v2 = vld [vmem:[%s3217_s4 + $0x178] sm:$0xff] (%p2832_p9) }
 0x226   : > { %1970 = vst [vmem:[%s3509_s18 + $0x500] sm:$0xff] (%p2832_p9), %v1969_v58  ;;  %1972 = vst [vmem:[%s3509_s18 + $0x508] sm:$0xff] (%p2832_p9), %v1971_v59  ;;  %v2097_v58 = vld [vmem:[%s3217_s4 + $0x340] sm:$0xff] (%p2832_p9)  ;;  %v2099_v59 = vld [vmem:[%s3217_s4 + $0x348] sm:$0xff] (%p2832_p9) }
 0x227   : > { %1974 = vst [vmem:[%s3509_s18 + $0x510] sm:$0xff] (%p2832_p9), %v1973_v60  ;;  %1976 = vst [vmem:[%s3509_s18 + $0x518] sm:$0xff] (%p2832_p9), %v1975_v61  ;;  %v2101_v60 = vld [vmem:[%s3217_s4 + $0x350] sm:$0xff] (%p2832_p9)  ;;  %v2103_v61 = vld [vmem:[%s3217_s4 + $0x358] sm:$0xff] (%p2832_p9) }
 0x228   : > { %1978 = vst [vmem:[%s3509_s18 + $0x520] sm:$0xff] (%p2832_p9), %v1977_v62  ;;  %1980 = vst [vmem:[%s3509_s18 + $0x528] sm:$0xff] (%p2832_p9), %v1979_v63  ;;  %v2105_v62 = vld [vmem:[%s3217_s4 + $0x360] sm:$0xff] (%p2832_p9)  ;;  %v2107_v63 = vld [vmem:[%s3217_s4 + $0x368] sm:$0xff] (%p2832_p9) }
 0x229   : > { %v1396_v3 = vpop.f32.mrb[120].mxu0  ;;  %v1589_v4 = vpop.f32.mrb[120].mxu1  ;;  %1982 = vst [vmem:[%s3509_s18 + $0x530] sm:$0xff] (%p2832_p9), %v1981_v1  ;;  %1984 = vst [vmem:[%s3509_s18 + $0x538] sm:$0xff] (%p2832_p9), %v1983_v2  ;;  %v2109_v1 = vld [vmem:[%s3217_s4 + $0x370] sm:$0xff] (%p2832_p9)  ;;  %v2111_v2 = vld [vmem:[%s3217_s4 + $0x378] sm:$0xff] (%p2832_p9) }
 0x22a   : > { %1836 = vst [vmem:[%s3217_s4 + $0x720] sm:$0xff] %v1396_v3  ;;  %v1398_v5 = vpop.f32.mrb[121].mxu0  ;;  %1838 = vst [vmem:[%s3217_s4 + $0x730] sm:$0xff] %v1589_v4  ;;  %v1591_v6 = vpop.f32.mrb[121].mxu1  ;;  %v1985_v3 = vld [vmem:[%s3217_s4 + $0x180] sm:$0xff] (%p2832_p9)  ;;  %v1987_v4 = vld [vmem:[%s3217_s4 + $0x188] sm:$0xff] (%p2832_p9) }
 0x22b   : > { %1837 = vst [vmem:[%s3217_s4 + $0x728] sm:$0xff] %v1398_v5  ;;  %v1400_v8 = vpop.f32.mrb[122].mxu0  ;;  %1839 = vst [vmem:[%s3217_s4 + $0x738] sm:$0xff] %v1591_v6  ;;  %v1593_v9 = vpop.f32.mrb[122].mxu1  ;;  %v1989_v5 = vld [vmem:[%s3217_s4 + $0x190] sm:$0xff] (%p2832_p9)  ;;  %v1991_v6 = vld [vmem:[%s3217_s4 + $0x198] sm:$0xff] (%p2832_p9) }
 0x22c   : > { %1844 = vst [vmem:[%s3217_s4 + $0x760] sm:$0xff] %v1400_v8  ;;  %v1402_v10 = vpop.f32.mrb[123].mxu0  ;;  %1846 = vst [vmem:[%s3217_s4 + $0x770] sm:$0xff] %v1593_v9  ;;  %v1595_v11 = vpop.f32.mrb[123].mxu1  ;;  %v1993_v8 = vld [vmem:[%s3217_s4 + $0x1a0] sm:$0xff] (%p2832_p9)  ;;  %v1995_v9 = vld [vmem:[%s3217_s4 + $0x1a8] sm:$0xff] (%p2832_p9) }
 0x22d   : > { %1845 = vst [vmem:[%s3217_s4 + $0x768] sm:$0xff] %v1402_v10  ;;  %1847 = vst [vmem:[%s3217_s4 + $0x778] sm:$0xff] %v1595_v11  ;;  %v1997_v10 = vld [vmem:[%s3217_s4 + $0x1b0] sm:$0xff] (%p2832_p9)  ;;  %v1999_v11 = vld [vmem:[%s3217_s4 + $0x1b8] sm:$0xff] (%p2832_p9) }
 0x22e   : > { %1986 = vst [vmem:[%s3509_s18 + $0x600] sm:$0xff] (%p2832_p9), %v1985_v3  ;;  %1988 = vst [vmem:[%s3509_s18 + $0x608] sm:$0xff] (%p2832_p9), %v1987_v4  ;;  %v2113_v3 = vld [vmem:[%s3217_s4 + $0x380] sm:$0xff] (%p2832_p9)  ;;  %v2115_v4 = vld [vmem:[%s3217_s4 + $0x388] sm:$0xff] (%p2832_p9) }
 0x22f   : > { %1870 = sbr.rel (!%p2832_p9) target bundleno = 666 (0x29a), region = 55  ;;  %1990 = vst [vmem:[%s3509_s18 + $0x610] sm:$0xff] (%p2832_p9), %v1989_v5  ;;  %1992 = vst [vmem:[%s3509_s18 + $0x618] sm:$0xff] (%p2832_p9), %v1991_v6  ;;  %v2117_v5 = vld [vmem:[%s3217_s4 + $0x390] sm:$0xff] (%p2832_p9)  ;;  %v2119_v6 = vld [vmem:[%s3217_s4 + $0x398] sm:$0xff] (%p2832_p9) }
 0x230   : > { %1994 = vst [vmem:[%s3509_s18 + $0x620] sm:$0xff] (%p2832_p9), %v1993_v8  ;;  %1996 = vst [vmem:[%s3509_s18 + $0x628] sm:$0xff] (%p2832_p9), %v1995_v9  ;;  %v2121_v8 = vld [vmem:[%s3217_s4 + $0x3a0] sm:$0xff] (%p2832_p9)  ;;  %v2123_v9 = vld [vmem:[%s3217_s4 + $0x3a8] sm:$0xff] (%p2832_p9) }
 0x231   : > { %v1406_v12 = vpop.f32.mrb[124].mxu0  ;;  %v1599_v13 = vpop.f32.mrb[124].mxu1  ;;  %1998 = vst [vmem:[%s3509_s18 + $0x630] sm:$0xff] (%p2832_p9), %v1997_v10  ;;  %2000 = vst [vmem:[%s3509_s18 + $0x638] sm:$0xff] (%p2832_p9), %v1999_v11  ;;  %v2125_v10 = vld [vmem:[%s3217_s4 + $0x3b0] sm:$0xff] (%p2832_p9)  ;;  %v2127_v11 = vld [vmem:[%s3217_s4 + $0x3b8] sm:$0xff] (%p2832_p9) }
 0x232   : > { %1852 = vst [vmem:[%s3217_s4 + $0x7a0] sm:$0xff] %v1406_v12  ;;  %v1408_v14 = vpop.f32.mrb[125].mxu0  ;;  %1854 = vst [vmem:[%s3217_s4 + $0x7b0] sm:$0xff] %v1599_v13  ;;  %v1601_v15 = vpop.f32.mrb[125].mxu1  ;;  %v2001_v12 = vld [vmem:[%s3217_s4 + $0x1c0] sm:$0xff] (%p2832_p9)  ;;  %v2003_v13 = vld [vmem:[%s3217_s4 + $0x1c8] sm:$0xff] (%p2832_p9) }
 0x233   : > { %1853 = vst [vmem:[%s3217_s4 + $0x7a8] sm:$0xff] %v1408_v14  ;;  %v1410_v16 = vpop.f32.mrb[126].mxu0  ;;  %1855 = vst [vmem:[%s3217_s4 + $0x7b8] sm:$0xff] %v1601_v15  ;;  %v1603_v17 = vpop.f32.mrb[126].mxu1  ;;  %v2005_v14 = vld [vmem:[%s3217_s4 + $0x1d0] sm:$0xff] (%p2832_p9)  ;;  %v2007_v15 = vld [vmem:[%s3217_s4 + $0x1d8] sm:$0xff] (%p2832_p9) }
 0x234   : > { %1860 = vst [vmem:[%s3217_s4 + $0x7e0] sm:$0xff] %v1410_v16  ;;  %v1412_v18 = vpop.f32.mrb[127].mxu0  ;;  %1862 = vst [vmem:[%s3217_s4 + $0x7f0] sm:$0xff] %v1603_v17  ;;  %v1605_v19 = vpop.f32.mrb[127].mxu1  ;;  %v2009_v16 = vld [vmem:[%s3217_s4 + $0x1e0] sm:$0xff] (%p2832_p9)  ;;  %v2011_v17 = vld [vmem:[%s3217_s4 + $0x1e8] sm:$0xff] (%p2832_p9) }
 0x235   : > { %1861 = vst [vmem:[%s3217_s4 + $0x7e8] sm:$0xff] %v1412_v18  ;;  %1863 = vst [vmem:[%s3217_s4 + $0x7f8] sm:$0xff] %v1605_v19  ;;  %v2013_v18 = vld [vmem:[%s3217_s4 + $0x1f0] sm:$0xff] (%p2832_p9)  ;;  %v2015_v19 = vld [vmem:[%s3217_s4 + $0x1f8] sm:$0xff] (%p2832_p9) }
 0x236   : > { %2002 = vst [vmem:[%s3509_s18 + $0x700] sm:$0xff] %v2001_v12  ;;  %2004 = vst [vmem:[%s3509_s18 + $0x708] sm:$0xff] %v2003_v13  ;;  %v2129_v12 = vld [vmem:[%s3217_s4 + $0x3c0] sm:$0xff]  ;;  %v2131_v13 = vld [vmem:[%s3217_s4 + $0x3c8] sm:$0xff] }
 0x237   : > { %2006 = vst [vmem:[%s3509_s18 + $0x710] sm:$0xff] %v2005_v14  ;;  %2008 = vst [vmem:[%s3509_s18 + $0x718] sm:$0xff] %v2007_v15  ;;  %v2133_v14 = vld [vmem:[%s3217_s4 + $0x3d0] sm:$0xff]  ;;  %v2135_v15 = vld [vmem:[%s3217_s4 + $0x3d8] sm:$0xff] }
 0x238   : > { %2010 = vst [vmem:[%s3509_s18 + $0x720] sm:$0xff] %v2009_v16  ;;  %2012 = vst [vmem:[%s3509_s18 + $0x728] sm:$0xff] %v2011_v17  ;;  %v2137_v16 = vld [vmem:[%s3217_s4 + $0x3e0] sm:$0xff]  ;;  %v2139_v17 = vld [vmem:[%s3217_s4 + $0x3e8] sm:$0xff] }
 0x239   : > { %2014 = vst [vmem:[%s3509_s18 + $0x730] sm:$0xff] %v2013_v18  ;;  %2016 = vst [vmem:[%s3509_s18 + $0x738] sm:$0xff] %v2015_v19  ;;  %v2141_v18 = vld [vmem:[%s3217_s4 + $0x3f0] sm:$0xff]  ;;  %v2143_v19 = vld [vmem:[%s3217_s4 + $0x3f8] sm:$0xff] }
 0x23a   : > { %2018 = vst [vmem:[%s3509_s18 + $0x800] sm:$0xff] %v2017_v7  ;;  %2020 = vst [vmem:[%s3509_s18 + $0x808] sm:$0xff] %v2019_v20  ;;  %v2145_v7 = vld [vmem:[%s3217_s4 + $0x400] sm:$0xff]  ;;  %v2147_v20 = vld [vmem:[%s3217_s4 + $0x408] sm:$0xff] }
 0x23b   : > { %2022 = vst [vmem:[%s3509_s18 + $0x810] sm:$0xff] %v2021_v21  ;;  %2024 = vst [vmem:[%s3509_s18 + $0x818] sm:$0xff] %v2023_v22  ;;  %v2149_v21 = vld [vmem:[%s3217_s4 + $0x410] sm:$0xff]  ;;  %v2151_v22 = vld [vmem:[%s3217_s4 + $0x418] sm:$0xff] }
 0x23c   : > { %2026 = vst [vmem:[%s3509_s18 + $0x820] sm:$0xff] %v2025_v23  ;;  %2028 = vst [vmem:[%s3509_s18 + $0x828] sm:$0xff] %v2027_v24  ;;  %v2153_v23 = vld [vmem:[%s3217_s4 + $0x420] sm:$0xff]  ;;  %v2155_v24 = vld [vmem:[%s3217_s4 + $0x428] sm:$0xff] }
 0x23d   : > { %2030 = vst [vmem:[%s3509_s18 + $0x830] sm:$0xff] %v2029_v25  ;;  %2032 = vst [vmem:[%s3509_s18 + $0x838] sm:$0xff] %v2031_v26  ;;  %v2157_v25 = vld [vmem:[%s3217_s4 + $0x430] sm:$0xff]  ;;  %v2159_v26 = vld [vmem:[%s3217_s4 + $0x438] sm:$0xff] }
 0x23e   : > { %2034 = vst [vmem:[%s3509_s18 + $0x900] sm:$0xff] %v2033_v27  ;;  %2036 = vst [vmem:[%s3509_s18 + $0x908] sm:$0xff] %v2035_v28  ;;  %v2161_v27 = vld [vmem:[%s3217_s4 + $0x440] sm:$0xff]  ;;  %v2163_v28 = vld [vmem:[%s3217_s4 + $0x448] sm:$0xff] }
 0x23f   : > { %2038 = vst [vmem:[%s3509_s18 + $0x910] sm:$0xff] %v2037_v29  ;;  %2040 = vst [vmem:[%s3509_s18 + $0x918] sm:$0xff] %v2039_v30  ;;  %v2165_v29 = vld [vmem:[%s3217_s4 + $0x450] sm:$0xff]  ;;  %v2167_v30 = vld [vmem:[%s3217_s4 + $0x458] sm:$0xff] }
 0x240   : > { %2042 = vst [vmem:[%s3509_s18 + $0x920] sm:$0xff] %v2041_v31  ;;  %2044 = vst [vmem:[%s3509_s18 + $0x928] sm:$0xff] %v2043_v32  ;;  %v2169_v31 = vld [vmem:[%s3217_s4 + $0x460] sm:$0xff]  ;;  %v2171_v32 = vld [vmem:[%s3217_s4 + $0x468] sm:$0xff] }
 0x241   : > { %2046 = vst [vmem:[%s3509_s18 + $0x930] sm:$0xff] %v2045_v33  ;;  %2048 = vst [vmem:[%s3509_s18 + $0x938] sm:$0xff] %v2047_v34  ;;  %v2173_v33 = vld [vmem:[%s3217_s4 + $0x470] sm:$0xff]  ;;  %v2175_v34 = vld [vmem:[%s3217_s4 + $0x478] sm:$0xff] }
 0x242   : > { %2050 = vst [vmem:[%s3509_s18 + $0xa00] sm:$0xff] %v2049_v35  ;;  %2052 = vst [vmem:[%s3509_s18 + $0xa08] sm:$0xff] %v2051_v36  ;;  %v2177_v35 = vld [vmem:[%s3217_s4 + $0x480] sm:$0xff]  ;;  %v2179_v36 = vld [vmem:[%s3217_s4 + $0x488] sm:$0xff] }
 0x243   : > { %2054 = vst [vmem:[%s3509_s18 + $0xa10] sm:$0xff] %v2053_v37  ;;  %2056 = vst [vmem:[%s3509_s18 + $0xa18] sm:$0xff] %v2055_v38  ;;  %v2181_v37 = vld [vmem:[%s3217_s4 + $0x490] sm:$0xff]  ;;  %v2183_v38 = vld [vmem:[%s3217_s4 + $0x498] sm:$0xff] }
 0x244   : > { %2058 = vst [vmem:[%s3509_s18 + $0xa20] sm:$0xff] %v2057_v39  ;;  %2060 = vst [vmem:[%s3509_s18 + $0xa28] sm:$0xff] %v2059_v40  ;;  %v2185_v39 = vld [vmem:[%s3217_s4 + $0x4a0] sm:$0xff]  ;;  %v2187_v40 = vld [vmem:[%s3217_s4 + $0x4a8] sm:$0xff] }
 0x245   : > { %2062 = vst [vmem:[%s3509_s18 + $0xa30] sm:$0xff] %v2061_v41  ;;  %2064 = vst [vmem:[%s3509_s18 + $0xa38] sm:$0xff] %v2063_v42  ;;  %v2189_v41 = vld [vmem:[%s3217_s4 + $0x4b0] sm:$0xff]  ;;  %v2191_v42 = vld [vmem:[%s3217_s4 + $0x4b8] sm:$0xff] }
 0x246   : > { %2066 = vst [vmem:[%s3509_s18 + $0xb00] sm:$0xff] %v2065_v43  ;;  %2068 = vst [vmem:[%s3509_s18 + $0xb08] sm:$0xff] %v2067_v44  ;;  %v2193_v43 = vld [vmem:[%s3217_s4 + $0x4c0] sm:$0xff]  ;;  %v2195_v44 = vld [vmem:[%s3217_s4 + $0x4c8] sm:$0xff] }
 0x247   : > { %2070 = vst [vmem:[%s3509_s18 + $0xb10] sm:$0xff] %v2069_v45  ;;  %2072 = vst [vmem:[%s3509_s18 + $0xb18] sm:$0xff] %v2071_v46  ;;  %v2197_v45 = vld [vmem:[%s3217_s4 + $0x4d0] sm:$0xff]  ;;  %v2199_v46 = vld [vmem:[%s3217_s4 + $0x4d8] sm:$0xff] }
 0x248   : > { %2074 = vst [vmem:[%s3509_s18 + $0xb20] sm:$0xff] %v2073_v47  ;;  %2076 = vst [vmem:[%s3509_s18 + $0xb28] sm:$0xff] %v2075_v48  ;;  %v2201_v47 = vld [vmem:[%s3217_s4 + $0x4e0] sm:$0xff]  ;;  %v2203_v48 = vld [vmem:[%s3217_s4 + $0x4e8] sm:$0xff] }
 0x249   : > { %2078 = vst [vmem:[%s3509_s18 + $0xb30] sm:$0xff] %v2077_v49  ;;  %2080 = vst [vmem:[%s3509_s18 + $0xb38] sm:$0xff] %v2079_v50  ;;  %v2205_v49 = vld [vmem:[%s3217_s4 + $0x4f0] sm:$0xff]  ;;  %v2207_v50 = vld [vmem:[%s3217_s4 + $0x4f8] sm:$0xff] }
 0x24a   : > { %2082 = vst [vmem:[%s3509_s18 + $0xc00] sm:$0xff] %v2081_v51  ;;  %2084 = vst [vmem:[%s3509_s18 + $0xc08] sm:$0xff] %v2083_v52  ;;  %v2209_v51 = vld [vmem:[%s3217_s4 + $0x500] sm:$0xff]  ;;  %v2211_v52 = vld [vmem:[%s3217_s4 + $0x508] sm:$0xff] }
 0x24b   : > { %2086 = vst [vmem:[%s3509_s18 + $0xc10] sm:$0xff] %v2085_v53  ;;  %2088 = vst [vmem:[%s3509_s18 + $0xc18] sm:$0xff] %v2087_v54  ;;  %v2213_v53 = vld [vmem:[%s3217_s4 + $0x510] sm:$0xff]  ;;  %v2215_v54 = vld [vmem:[%s3217_s4 + $0x518] sm:$0xff] }
 0x24c   : > { %2090 = vst [vmem:[%s3509_s18 + $0xc20] sm:$0xff] %v2089_v55  ;;  %2092 = vst [vmem:[%s3509_s18 + $0xc28] sm:$0xff] %v2091_v56  ;;  %v2217_v55 = vld [vmem:[%s3217_s4 + $0x520] sm:$0xff]  ;;  %v2219_v56 = vld [vmem:[%s3217_s4 + $0x528] sm:$0xff] }
 0x24d   : > { %2094 = vst [vmem:[%s3509_s18 + $0xc30] sm:$0xff] %v2093_v57  ;;  %2096 = vst [vmem:[%s3509_s18 + $0xc38] sm:$0xff] %v2095_v0  ;;  %v2221_v57 = vld [vmem:[%s3217_s4 + $0x530] sm:$0xff]  ;;  %v2223_v0 = vld [vmem:[%s3217_s4 + $0x538] sm:$0xff] }
 0x24e   : > { %2098 = vst [vmem:[%s3509_s18 + $0xd00] sm:$0xff] %v2097_v58  ;;  %2100 = vst [vmem:[%s3509_s18 + $0xd08] sm:$0xff] %v2099_v59  ;;  %v2225_v58 = vld [vmem:[%s3217_s4 + $0x540] sm:$0xff]  ;;  %v2227_v59 = vld [vmem:[%s3217_s4 + $0x548] sm:$0xff] }
 0x24f   : > { %2102 = vst [vmem:[%s3509_s18 + $0xd10] sm:$0xff] %v2101_v60  ;;  %2104 = vst [vmem:[%s3509_s18 + $0xd18] sm:$0xff] %v2103_v61  ;;  %v2229_v60 = vld [vmem:[%s3217_s4 + $0x550] sm:$0xff]  ;;  %v2231_v61 = vld [vmem:[%s3217_s4 + $0x558] sm:$0xff] }
 0x250   : > { %2106 = vst [vmem:[%s3509_s18 + $0xd20] sm:$0xff] %v2105_v62  ;;  %2108 = vst [vmem:[%s3509_s18 + $0xd28] sm:$0xff] %v2107_v63  ;;  %v2233_v62 = vld [vmem:[%s3217_s4 + $0x560] sm:$0xff]  ;;  %v2235_v63 = vld [vmem:[%s3217_s4 + $0x568] sm:$0xff] }
 0x251   : > { %2110 = vst [vmem:[%s3509_s18 + $0xd30] sm:$0xff] %v2109_v1  ;;  %2112 = vst [vmem:[%s3509_s18 + $0xd38] sm:$0xff] %v2111_v2  ;;  %v2237_v1 = vld [vmem:[%s3217_s4 + $0x570] sm:$0xff]  ;;  %v2239_v2 = vld [vmem:[%s3217_s4 + $0x578] sm:$0xff] }
 0x252   : > { %2114 = vst [vmem:[%s3509_s18 + $0xe00] sm:$0xff] %v2113_v3  ;;  %2116 = vst [vmem:[%s3509_s18 + $0xe08] sm:$0xff] %v2115_v4  ;;  %v2241_v3 = vld [vmem:[%s3217_s4 + $0x580] sm:$0xff]  ;;  %v2243_v4 = vld [vmem:[%s3217_s4 + $0x588] sm:$0xff] }
 0x253   : > { %2118 = vst [vmem:[%s3509_s18 + $0xe10] sm:$0xff] %v2117_v5  ;;  %2120 = vst [vmem:[%s3509_s18 + $0xe18] sm:$0xff] %v2119_v6  ;;  %v2245_v5 = vld [vmem:[%s3217_s4 + $0x590] sm:$0xff]  ;;  %v2247_v6 = vld [vmem:[%s3217_s4 + $0x598] sm:$0xff] }
 0x254   : > { %2122 = vst [vmem:[%s3509_s18 + $0xe20] sm:$0xff] %v2121_v8  ;;  %2124 = vst [vmem:[%s3509_s18 + $0xe28] sm:$0xff] %v2123_v9  ;;  %v2249_v8 = vld [vmem:[%s3217_s4 + $0x5a0] sm:$0xff]  ;;  %v2251_v9 = vld [vmem:[%s3217_s4 + $0x5a8] sm:$0xff] }
 0x255   : > { %2126 = vst [vmem:[%s3509_s18 + $0xe30] sm:$0xff] %v2125_v10  ;;  %2128 = vst [vmem:[%s3509_s18 + $0xe38] sm:$0xff] %v2127_v11  ;;  %v2253_v10 = vld [vmem:[%s3217_s4 + $0x5b0] sm:$0xff]  ;;  %v2255_v11 = vld [vmem:[%s3217_s4 + $0x5b8] sm:$0xff] }
 0x256   : > { %2130 = vst [vmem:[%s3509_s18 + $0xf00] sm:$0xff] %v2129_v12  ;;  %2132 = vst [vmem:[%s3509_s18 + $0xf08] sm:$0xff] %v2131_v13  ;;  %v2257_v12 = vld [vmem:[%s3217_s4 + $0x5c0] sm:$0xff]  ;;  %v2259_v13 = vld [vmem:[%s3217_s4 + $0x5c8] sm:$0xff] }
 0x257   : > { %2134 = vst [vmem:[%s3509_s18 + $0xf10] sm:$0xff] %v2133_v14  ;;  %2136 = vst [vmem:[%s3509_s18 + $0xf18] sm:$0xff] %v2135_v15  ;;  %v2261_v14 = vld [vmem:[%s3217_s4 + $0x5d0] sm:$0xff]  ;;  %v2263_v15 = vld [vmem:[%s3217_s4 + $0x5d8] sm:$0xff] }
 0x258   : > { %2138 = vst [vmem:[%s3509_s18 + $0xf20] sm:$0xff] %v2137_v16  ;;  %2140 = vst [vmem:[%s3509_s18 + $0xf28] sm:$0xff] %v2139_v17  ;;  %v2265_v16 = vld [vmem:[%s3217_s4 + $0x5e0] sm:$0xff]  ;;  %v2267_v17 = vld [vmem:[%s3217_s4 + $0x5e8] sm:$0xff] }
 0x259   : > { %2142 = vst [vmem:[%s3509_s18 + $0xf30] sm:$0xff] %v2141_v18  ;;  %2144 = vst [vmem:[%s3509_s18 + $0xf38] sm:$0xff] %v2143_v19  ;;  %v2269_v18 = vld [vmem:[%s3217_s4 + $0x5f0] sm:$0xff]  ;;  %v2271_v19 = vld [vmem:[%s3217_s4 + $0x5f8] sm:$0xff] }
 0x25a   : > { %2146 = vst [vmem:[%s3509_s18 + $0x1000] sm:$0xff] %v2145_v7  ;;  %2148 = vst [vmem:[%s3509_s18 + $0x1008] sm:$0xff] %v2147_v20  ;;  %v2273_v7 = vld [vmem:[%s3217_s4 + $0x600] sm:$0xff]  ;;  %v2275_v20 = vld [vmem:[%s3217_s4 + $0x608] sm:$0xff] }
 0x25b   : > { %2150 = vst [vmem:[%s3509_s18 + $0x1010] sm:$0xff] %v2149_v21  ;;  %2152 = vst [vmem:[%s3509_s18 + $0x1018] sm:$0xff] %v2151_v22  ;;  %v2277_v21 = vld [vmem:[%s3217_s4 + $0x610] sm:$0xff]  ;;  %v2279_v22 = vld [vmem:[%s3217_s4 + $0x618] sm:$0xff] }
 0x25c   : > { %2154 = vst [vmem:[%s3509_s18 + $0x1020] sm:$0xff] %v2153_v23  ;;  %2156 = vst [vmem:[%s3509_s18 + $0x1028] sm:$0xff] %v2155_v24  ;;  %v2281_v23 = vld [vmem:[%s3217_s4 + $0x620] sm:$0xff]  ;;  %v2283_v24 = vld [vmem:[%s3217_s4 + $0x628] sm:$0xff] }
 0x25d   : > { %2158 = vst [vmem:[%s3509_s18 + $0x1030] sm:$0xff] %v2157_v25  ;;  %2160 = vst [vmem:[%s3509_s18 + $0x1038] sm:$0xff] %v2159_v26  ;;  %v2285_v25 = vld [vmem:[%s3217_s4 + $0x630] sm:$0xff]  ;;  %v2287_v26 = vld [vmem:[%s3217_s4 + $0x638] sm:$0xff] }
 0x25e   : > { %2162 = vst [vmem:[%s3509_s18 + $0x1100] sm:$0xff] %v2161_v27  ;;  %2164 = vst [vmem:[%s3509_s18 + $0x1108] sm:$0xff] %v2163_v28  ;;  %v2289_v27 = vld [vmem:[%s3217_s4 + $0x640] sm:$0xff]  ;;  %v2291_v28 = vld [vmem:[%s3217_s4 + $0x648] sm:$0xff] }
 0x25f   : > { %2166 = vst [vmem:[%s3509_s18 + $0x1110] sm:$0xff] %v2165_v29  ;;  %2168 = vst [vmem:[%s3509_s18 + $0x1118] sm:$0xff] %v2167_v30  ;;  %v2293_v29 = vld [vmem:[%s3217_s4 + $0x650] sm:$0xff]  ;;  %v2295_v30 = vld [vmem:[%s3217_s4 + $0x658] sm:$0xff] }
 0x260   : > { %2170 = vst [vmem:[%s3509_s18 + $0x1120] sm:$0xff] %v2169_v31  ;;  %2172 = vst [vmem:[%s3509_s18 + $0x1128] sm:$0xff] %v2171_v32  ;;  %v2297_v31 = vld [vmem:[%s3217_s4 + $0x660] sm:$0xff]  ;;  %v2299_v32 = vld [vmem:[%s3217_s4 + $0x668] sm:$0xff] }
 0x261   : > { %2174 = vst [vmem:[%s3509_s18 + $0x1130] sm:$0xff] %v2173_v33  ;;  %2176 = vst [vmem:[%s3509_s18 + $0x1138] sm:$0xff] %v2175_v34  ;;  %v2301_v33 = vld [vmem:[%s3217_s4 + $0x670] sm:$0xff]  ;;  %v2303_v34 = vld [vmem:[%s3217_s4 + $0x678] sm:$0xff] }
 0x262   : > { %2178 = vst [vmem:[%s3509_s18 + $0x1200] sm:$0xff] %v2177_v35  ;;  %2180 = vst [vmem:[%s3509_s18 + $0x1208] sm:$0xff] %v2179_v36  ;;  %v2305_v35 = vld [vmem:[%s3217_s4 + $0x680] sm:$0xff]  ;;  %v2307_v36 = vld [vmem:[%s3217_s4 + $0x688] sm:$0xff] }
 0x263   : > { %2182 = vst [vmem:[%s3509_s18 + $0x1210] sm:$0xff] %v2181_v37  ;;  %2184 = vst [vmem:[%s3509_s18 + $0x1218] sm:$0xff] %v2183_v38  ;;  %v2309_v37 = vld [vmem:[%s3217_s4 + $0x690] sm:$0xff]  ;;  %v2311_v38 = vld [vmem:[%s3217_s4 + $0x698] sm:$0xff] }
 0x264   : > { %2186 = vst [vmem:[%s3509_s18 + $0x1220] sm:$0xff] %v2185_v39  ;;  %2188 = vst [vmem:[%s3509_s18 + $0x1228] sm:$0xff] %v2187_v40  ;;  %v2313_v39 = vld [vmem:[%s3217_s4 + $0x6a0] sm:$0xff]  ;;  %v2315_v40 = vld [vmem:[%s3217_s4 + $0x6a8] sm:$0xff] }
 0x265   : > { %2190 = vst [vmem:[%s3509_s18 + $0x1230] sm:$0xff] %v2189_v41  ;;  %2192 = vst [vmem:[%s3509_s18 + $0x1238] sm:$0xff] %v2191_v42  ;;  %v2317_v41 = vld [vmem:[%s3217_s4 + $0x6b0] sm:$0xff]  ;;  %v2319_v42 = vld [vmem:[%s3217_s4 + $0x6b8] sm:$0xff] }
 0x266   : > { %2194 = vst [vmem:[%s3509_s18 + $0x1300] sm:$0xff] %v2193_v43  ;;  %2196 = vst [vmem:[%s3509_s18 + $0x1308] sm:$0xff] %v2195_v44  ;;  %v2321_v43 = vld [vmem:[%s3217_s4 + $0x6c0] sm:$0xff]  ;;  %v2323_v44 = vld [vmem:[%s3217_s4 + $0x6c8] sm:$0xff] }
 0x267   : > { %2198 = vst [vmem:[%s3509_s18 + $0x1310] sm:$0xff] %v2197_v45  ;;  %2200 = vst [vmem:[%s3509_s18 + $0x1318] sm:$0xff] %v2199_v46  ;;  %v2325_v45 = vld [vmem:[%s3217_s4 + $0x6d0] sm:$0xff]  ;;  %v2327_v46 = vld [vmem:[%s3217_s4 + $0x6d8] sm:$0xff] }
 0x268   : > { %2202 = vst [vmem:[%s3509_s18 + $0x1320] sm:$0xff] %v2201_v47  ;;  %2204 = vst [vmem:[%s3509_s18 + $0x1328] sm:$0xff] %v2203_v48  ;;  %v2329_v47 = vld [vmem:[%s3217_s4 + $0x6e0] sm:$0xff]  ;;  %v2331_v48 = vld [vmem:[%s3217_s4 + $0x6e8] sm:$0xff] }
 0x269   : > { %2206 = vst [vmem:[%s3509_s18 + $0x1330] sm:$0xff] %v2205_v49  ;;  %2208 = vst [vmem:[%s3509_s18 + $0x1338] sm:$0xff] %v2207_v50  ;;  %v2333_v49 = vld [vmem:[%s3217_s4 + $0x6f0] sm:$0xff]  ;;  %v2335_v50 = vld [vmem:[%s3217_s4 + $0x6f8] sm:$0xff] }
 0x26a   : > { %2210 = vst [vmem:[%s3509_s18 + $0x1400] sm:$0xff] %v2209_v51  ;;  %2212 = vst [vmem:[%s3509_s18 + $0x1408] sm:$0xff] %v2211_v52  ;;  %v2337_v51 = vld [vmem:[%s3217_s4 + $0x700] sm:$0xff]  ;;  %v2339_v52 = vld [vmem:[%s3217_s4 + $0x708] sm:$0xff] }
 0x26b   : > { %2214 = vst [vmem:[%s3509_s18 + $0x1410] sm:$0xff] %v2213_v53  ;;  %2216 = vst [vmem:[%s3509_s18 + $0x1418] sm:$0xff] %v2215_v54  ;;  %v2341_v53 = vld [vmem:[%s3217_s4 + $0x710] sm:$0xff]  ;;  %v2343_v54 = vld [vmem:[%s3217_s4 + $0x718] sm:$0xff] }
 0x26c   : > { %2218 = vst [vmem:[%s3509_s18 + $0x1420] sm:$0xff] %v2217_v55  ;;  %2220 = vst [vmem:[%s3509_s18 + $0x1428] sm:$0xff] %v2219_v56  ;;  %v2345_v55 = vld [vmem:[%s3217_s4 + $0x720] sm:$0xff]  ;;  %v2347_v56 = vld [vmem:[%s3217_s4 + $0x728] sm:$0xff] }
 0x26d   : > { %2222 = vst [vmem:[%s3509_s18 + $0x1430] sm:$0xff] %v2221_v57  ;;  %2224 = vst [vmem:[%s3509_s18 + $0x1438] sm:$0xff] %v2223_v0  ;;  %v2349_v57 = vld [vmem:[%s3217_s4 + $0x730] sm:$0xff]  ;;  %v2351_v0 = vld [vmem:[%s3217_s4 + $0x738] sm:$0xff] }
 0x26e   : > { %2226 = vst [vmem:[%s3509_s18 + $0x1500] sm:$0xff] %v2225_v58  ;;  %2228 = vst [vmem:[%s3509_s18 + $0x1508] sm:$0xff] %v2227_v59  ;;  %v2353_v58 = vld [vmem:[%s3217_s4 + $0x740] sm:$0xff]  ;;  %v2355_v59 = vld [vmem:[%s3217_s4 + $0x748] sm:$0xff] }
 0x26f   : > { %2230 = vst [vmem:[%s3509_s18 + $0x1510] sm:$0xff] %v2229_v60  ;;  %2232 = vst [vmem:[%s3509_s18 + $0x1518] sm:$0xff] %v2231_v61  ;;  %v2357_v60 = vld [vmem:[%s3217_s4 + $0x750] sm:$0xff]  ;;  %v2359_v61 = vld [vmem:[%s3217_s4 + $0x758] sm:$0xff] }
 0x270   : > { %2234 = vst [vmem:[%s3509_s18 + $0x1520] sm:$0xff] %v2233_v62  ;;  %2236 = vst [vmem:[%s3509_s18 + $0x1528] sm:$0xff] %v2235_v63  ;;  %v2361_v62 = vld [vmem:[%s3217_s4 + $0x760] sm:$0xff]  ;;  %v2363_v63 = vld [vmem:[%s3217_s4 + $0x768] sm:$0xff] }
 0x271   : > { %2238 = vst [vmem:[%s3509_s18 + $0x1530] sm:$0xff] %v2237_v1  ;;  %2240 = vst [vmem:[%s3509_s18 + $0x1538] sm:$0xff] %v2239_v2  ;;  %v2365_v1 = vld [vmem:[%s3217_s4 + $0x770] sm:$0xff]  ;;  %v2367_v2 = vld [vmem:[%s3217_s4 + $0x778] sm:$0xff] }
 0x272   : > { %2242 = vst [vmem:[%s3509_s18 + $0x1600] sm:$0xff] %v2241_v3  ;;  %2244 = vst [vmem:[%s3509_s18 + $0x1608] sm:$0xff] %v2243_v4  ;;  %v2369_v3 = vld [vmem:[%s3217_s4 + $0x780] sm:$0xff]  ;;  %v2371_v4 = vld [vmem:[%s3217_s4 + $0x788] sm:$0xff] }
 0x273   : > { %2246 = vst [vmem:[%s3509_s18 + $0x1610] sm:$0xff] %v2245_v5  ;;  %2248 = vst [vmem:[%s3509_s18 + $0x1618] sm:$0xff] %v2247_v6  ;;  %v2373_v5 = vld [vmem:[%s3217_s4 + $0x790] sm:$0xff]  ;;  %v2375_v6 = vld [vmem:[%s3217_s4 + $0x798] sm:$0xff] }
 0x274   : > { %2250 = vst [vmem:[%s3509_s18 + $0x1620] sm:$0xff] %v2249_v8  ;;  %2252 = vst [vmem:[%s3509_s18 + $0x1628] sm:$0xff] %v2251_v9  ;;  %v2377_v8 = vld [vmem:[%s3217_s4 + $0x7a0] sm:$0xff]  ;;  %v2379_v9 = vld [vmem:[%s3217_s4 + $0x7a8] sm:$0xff] }
 0x275   : > { %2254 = vst [vmem:[%s3509_s18 + $0x1630] sm:$0xff] %v2253_v10  ;;  %2256 = vst [vmem:[%s3509_s18 + $0x1638] sm:$0xff] %v2255_v11  ;;  %v2381_v10 = vld [vmem:[%s3217_s4 + $0x7b0] sm:$0xff]  ;;  %v2383_v11 = vld [vmem:[%s3217_s4 + $0x7b8] sm:$0xff] }
 0x276   : > { %2258 = vst [vmem:[%s3509_s18 + $0x1700] sm:$0xff] %v2257_v12  ;;  %2260 = vst [vmem:[%s3509_s18 + $0x1708] sm:$0xff] %v2259_v13  ;;  %v2385_v12 = vld [vmem:[%s3217_s4 + $0x7c0] sm:$0xff]  ;;  %v2387_v13 = vld [vmem:[%s3217_s4 + $0x7c8] sm:$0xff] }
 0x277   : > { %2262 = vst [vmem:[%s3509_s18 + $0x1710] sm:$0xff] %v2261_v14  ;;  %2264 = vst [vmem:[%s3509_s18 + $0x1718] sm:$0xff] %v2263_v15  ;;  %v2389_v14 = vld [vmem:[%s3217_s4 + $0x7d0] sm:$0xff]  ;;  %v2391_v15 = vld [vmem:[%s3217_s4 + $0x7d8] sm:$0xff] }
 0x278   : > { %2266 = vst [vmem:[%s3509_s18 + $0x1720] sm:$0xff] %v2265_v16  ;;  %2268 = vst [vmem:[%s3509_s18 + $0x1728] sm:$0xff] %v2267_v17  ;;  %v2393_v16 = vld [vmem:[%s3217_s4 + $0x7e0] sm:$0xff]  ;;  %v2395_v17 = vld [vmem:[%s3217_s4 + $0x7e8] sm:$0xff] }
 0x279   : > { %2270 = vst [vmem:[%s3509_s18 + $0x1730] sm:$0xff] %v2269_v18  ;;  %2272 = vst [vmem:[%s3509_s18 + $0x1738] sm:$0xff] %v2271_v19  ;;  %v2397_v18 = vld [vmem:[%s3217_s4 + $0x7f0] sm:$0xff]  ;;  %v2399_v19 = vld [vmem:[%s3217_s4 + $0x7f8] sm:$0xff] }
 0x27a   : > { %2274 = vst [vmem:[%s3509_s18 + $0x1800] sm:$0xff] %v2273_v7  ;;  %2276 = vst [vmem:[%s3509_s18 + $0x1808] sm:$0xff] %v2275_v20 }
 0x27b   : > { %2278 = vst [vmem:[%s3509_s18 + $0x1810] sm:$0xff] %v2277_v21  ;;  %2280 = vst [vmem:[%s3509_s18 + $0x1818] sm:$0xff] %v2279_v22 }
 0x27c   : > { %2282 = vst [vmem:[%s3509_s18 + $0x1820] sm:$0xff] %v2281_v23  ;;  %2284 = vst [vmem:[%s3509_s18 + $0x1828] sm:$0xff] %v2283_v24 }
 0x27d   : > { %2286 = vst [vmem:[%s3509_s18 + $0x1830] sm:$0xff] %v2285_v25  ;;  %2288 = vst [vmem:[%s3509_s18 + $0x1838] sm:$0xff] %v2287_v26 }
 0x27e   : > { %2290 = vst [vmem:[%s3509_s18 + $0x1900] sm:$0xff] %v2289_v27  ;;  %2292 = vst [vmem:[%s3509_s18 + $0x1908] sm:$0xff] %v2291_v28 }
 0x27f   : > { %2294 = vst [vmem:[%s3509_s18 + $0x1910] sm:$0xff] %v2293_v29  ;;  %2296 = vst [vmem:[%s3509_s18 + $0x1918] sm:$0xff] %v2295_v30 }
 0x280   : > { %2298 = vst [vmem:[%s3509_s18 + $0x1920] sm:$0xff] %v2297_v31  ;;  %2300 = vst [vmem:[%s3509_s18 + $0x1928] sm:$0xff] %v2299_v32 }
 0x281   : > { %2302 = vst [vmem:[%s3509_s18 + $0x1930] sm:$0xff] %v2301_v33  ;;  %2304 = vst [vmem:[%s3509_s18 + $0x1938] sm:$0xff] %v2303_v34 }
 0x282   : > { %2306 = vst [vmem:[%s3509_s18 + $0x1a00] sm:$0xff] %v2305_v35  ;;  %2308 = vst [vmem:[%s3509_s18 + $0x1a08] sm:$0xff] %v2307_v36 }
 0x283   : > { %2310 = vst [vmem:[%s3509_s18 + $0x1a10] sm:$0xff] %v2309_v37  ;;  %2312 = vst [vmem:[%s3509_s18 + $0x1a18] sm:$0xff] %v2311_v38 }
 0x284   : > { %2314 = vst [vmem:[%s3509_s18 + $0x1a20] sm:$0xff] %v2313_v39  ;;  %2316 = vst [vmem:[%s3509_s18 + $0x1a28] sm:$0xff] %v2315_v40 }
 0x285   : > { %2318 = vst [vmem:[%s3509_s18 + $0x1a30] sm:$0xff] %v2317_v41  ;;  %2320 = vst [vmem:[%s3509_s18 + $0x1a38] sm:$0xff] %v2319_v42 }
 0x286   : > { %2322 = vst [vmem:[%s3509_s18 + $0x1b00] sm:$0xff] %v2321_v43  ;;  %2324 = vst [vmem:[%s3509_s18 + $0x1b08] sm:$0xff] %v2323_v44 }
 0x287   : > { %2326 = vst [vmem:[%s3509_s18 + $0x1b10] sm:$0xff] %v2325_v45  ;;  %2328 = vst [vmem:[%s3509_s18 + $0x1b18] sm:$0xff] %v2327_v46 }
 0x288   : > { %2330 = vst [vmem:[%s3509_s18 + $0x1b20] sm:$0xff] %v2329_v47  ;;  %2332 = vst [vmem:[%s3509_s18 + $0x1b28] sm:$0xff] %v2331_v48 }
 0x289   : > { %2334 = vst [vmem:[%s3509_s18 + $0x1b30] sm:$0xff] %v2333_v49  ;;  %2336 = vst [vmem:[%s3509_s18 + $0x1b38] sm:$0xff] %v2335_v50 }
 0x28a   : > { %2338 = vst [vmem:[%s3509_s18 + $0x1c00] sm:$0xff] %v2337_v51  ;;  %2340 = vst [vmem:[%s3509_s18 + $0x1c08] sm:$0xff] %v2339_v52 }
 0x28b   : > { %2342 = vst [vmem:[%s3509_s18 + $0x1c10] sm:$0xff] %v2341_v53  ;;  %2344 = vst [vmem:[%s3509_s18 + $0x1c18] sm:$0xff] %v2343_v54 }
 0x28c   : > { %2346 = vst [vmem:[%s3509_s18 + $0x1c20] sm:$0xff] %v2345_v55  ;;  %2348 = vst [vmem:[%s3509_s18 + $0x1c28] sm:$0xff] %v2347_v56 }
 0x28d   : > { %2350 = vst [vmem:[%s3509_s18 + $0x1c30] sm:$0xff] %v2349_v57  ;;  %2352 = vst [vmem:[%s3509_s18 + $0x1c38] sm:$0xff] %v2351_v0 }
 0x28e   : > { %2354 = vst [vmem:[%s3509_s18 + $0x1d00] sm:$0xff] %v2353_v58  ;;  %2356 = vst [vmem:[%s3509_s18 + $0x1d08] sm:$0xff] %v2355_v59 }
 0x28f   : > { %2358 = vst [vmem:[%s3509_s18 + $0x1d10] sm:$0xff] %v2357_v60  ;;  %2360 = vst [vmem:[%s3509_s18 + $0x1d18] sm:$0xff] %v2359_v61 }
 0x290   : > { %2362 = vst [vmem:[%s3509_s18 + $0x1d20] sm:$0xff] %v2361_v62  ;;  %2364 = vst [vmem:[%s3509_s18 + $0x1d28] sm:$0xff] %v2363_v63 }
 0x291   : > { %2366 = vst [vmem:[%s3509_s18 + $0x1d30] sm:$0xff] %v2365_v1  ;;  %2368 = vst [vmem:[%s3509_s18 + $0x1d38] sm:$0xff] %v2367_v2 }
 0x292   : > { %2370 = vst [vmem:[%s3509_s18 + $0x1e00] sm:$0xff] %v2369_v3  ;;  %2372 = vst [vmem:[%s3509_s18 + $0x1e08] sm:$0xff] %v2371_v4 }
 0x293   : > { %2374 = vst [vmem:[%s3509_s18 + $0x1e10] sm:$0xff] %v2373_v5  ;;  %2376 = vst [vmem:[%s3509_s18 + $0x1e18] sm:$0xff] %v2375_v6 }
 0x294   : > { %2378 = vst [vmem:[%s3509_s18 + $0x1e20] sm:$0xff] %v2377_v8  ;;  %2380 = vst [vmem:[%s3509_s18 + $0x1e28] sm:$0xff] %v2379_v9 }
 0x295   : > { %2382 = vst [vmem:[%s3509_s18 + $0x1e30] sm:$0xff] %v2381_v10  ;;  %2384 = vst [vmem:[%s3509_s18 + $0x1e38] sm:$0xff] %v2383_v11 }
 0x296   : > { %2386 = vst [vmem:[%s3509_s18 + $0x1f00] sm:$0xff] %v2385_v12  ;;  %2388 = vst [vmem:[%s3509_s18 + $0x1f08] sm:$0xff] %v2387_v13 }
 0x297   : > { %2390 = vst [vmem:[%s3509_s18 + $0x1f10] sm:$0xff] %v2389_v14  ;;  %2392 = vst [vmem:[%s3509_s18 + $0x1f18] sm:$0xff] %v2391_v15 }
 0x298   : > { %2394 = vst [vmem:[%s3509_s18 + $0x1f20] sm:$0xff] %v2393_v16  ;;  %2396 = vst [vmem:[%s3509_s18 + $0x1f28] sm:$0xff] %v2395_v17 }
 0x299   : > { %2398 = vst [vmem:[%s3509_s18 + $0x1f30] sm:$0xff] %v2397_v18  ;;  %2400 = vst [vmem:[%s3509_s18 + $0x1f38] sm:$0xff] %v2399_v19 }
 0x29a PF: > { %s12_s17 = sadd.s32 1, %s2747_s17   ;;  %s4046_s9 = smov %s2719_s10 }
 0x29b   : > { %p9_p1 = scmp.ge.s32.totalorder %s12_s17, 10   ;;  %s4047_s10 = smov %s2837_s28 }
 0x29c   : > { %s4048_s11 = smov %s2727_s12  ;;  %s4049_s12 = smov %s2826_s24 }
 0x29d   : > { %s4050_s13 = smov %s2739_s15  ;;  %s4051_s14 = smov %s2743_s16 }
 0x29e   : > { %s4052_s15 = smov %s4055_s19  ;;  %s4053_s16 = smov %s4059_s20 }
 0x29f   :  { %11 = sbr.rel (!%p9_p1) target bundleno = 5 (0x5), region = 112 }

// kernel: small_deconvnet_forward.7
= control target key start
LH: loop header
LB: loop body
LE: loop exit
PB: predicated region body
PF: predicated region fallthrough
CT: control target
= control target key end

     0   :  { %s942_s9 = smov 0   ;;  %s944_s10 = smov 0   ;;  %s1127_s0 = inlined_call_operand.vmem [shape: bf16[2048,128], index: 0, kind: input, shape index: {}]   ;;  %s1128_s1 = inlined_call_operand.vmem [shape: bf16[128,256], index: 1, kind: input, shape index: {}]   ;;  %s1129_s2 = inlined_call_operand.vmem [shape: f32[2048,256], index: 2, kind: output, shape index: {}]  }
   0x1   :  { %s946_s11 = smov 0  }
   0x2 LB: > { %s24_s12 = sadd.s32 1, %s920_s10  ;;  %p780_p0 = scmp.ge.s32.totalorder %s924_s11, 1  ;;  %s924_s11 = sphi %s946_s11, %s12_s11   ;;  %s920_s10 = sphi %s944_s10, %s1131_s10   ;;  %s916_s9 = sphi %s942_s9, %s1130_s9  }
   0x3   : > { %p26_p1 = scmp.ge.s32.totalorder %s24_s12, 8  ;;  %p138_p2 = scmp.lt.s32.totalorder %s924_s11, 9 }
   0x5   : > { %s1133_s12 = smov (%p26_p1, %s24_s12), 0  ;;  %p139_p3 = pnand %p780_p0, %p138_p2 }
   0x6   : > { %v862_v0 = vld [vmem:[%s1128_s1 + $0x4] ss:$8 sps:$4 sm:$0xff] (!%p139_p3)   ;;  %s781_s15 = sshll.u32 (!%p139_p3), %s916_s9, 5  ;;  %v864_v1 = vld [vmem:[%s1128_s1] ss:$8 sps:$4 sm:$0xff] (!%p139_p3)   ;;  %v926_v2 = vmov (!%p139_p3), 0  }
   0x7   : > { %142 = sbr.rel (%p139_p3) target bundleno = 312 (0x138), region = 28  ;;  %451 = vmatprep.mubr.bf16.mxu0 (!%p139_p3), %v926_v2  ;;  %531 = vmatprep.mubr.bf16.mxu1 (!%p139_p3), %v926_v2  ;;  %p171_p4 = scmp.lt.s32.totalorder (!%p139_p3), %s781_s15, 255  ;;  %v865_v3 = vld [vmem:[%s1128_s1 + $0x14] ss:$8 sps:$4 sm:$0xff] (!%p139_p3)   ;;  %v867_v4 = vld [vmem:[%s1128_s1 + $0x10] ss:$8 sps:$4 sm:$0xff] (!%p139_p3)  }
   0x8   : > { %419 = vmatprep.subr.bf16.mxu0 (!%p139_p3), %v862_v0  ;;  %821 = vmatprep.subr.bf16.mxu1 (!%p139_p3), %v862_v0  ;;  %v868_v5 = vld [vmem:[%s1128_s1 + $0x24] ss:$8 sps:$4 sm:$0xff] (!%p139_p3)   ;;  %v870_v6 = vld [vmem:[%s1128_s1 + $0x20] ss:$8 sps:$4 sm:$0xff] (!%p139_p3)   ;;  %v871_v7 = vld [vmem:[%s1128_s1 + $0x34] ss:$8 sps:$4 sm:$0xff] (!%p139_p3)  }
   0x9   : > { %420 = vmatpush1.bf16.msra.mxu0 (!%p139_p3), %v864_v1  ;;  %829 = vmatpush1.bf16.msra.mxu1 (!%p139_p3), %v864_v1  ;;  %v873_v8 = vld [vmem:[%s1128_s1 + $0x30] ss:$8 sps:$4 sm:$0xff] (!%p139_p3)   ;;  %v874_v9 = vld [vmem:[%s1128_s1 + $0x44] ss:$8 sps:$4 sm:$0xff] (!%p139_p3)   ;;  %v876_v10 = vld [vmem:[%s1128_s1 + $0x40] ss:$8 sps:$4 sm:$0xff] (!%p139_p3)  }
   0xa   : > { %421 = vmatprep.subr.bf16.mxu0 (!%p139_p3), %v865_v3  ;;  %822 = vmatprep.subr.bf16.mxu1 (!%p139_p3), %v865_v3  ;;  %v877_v11 = vld [vmem:[%s1128_s1 + $0x54] ss:$8 sps:$4 sm:$0xff] (!%p139_p3)   ;;  %v879_v12 = vld [vmem:[%s1128_s1 + $0x50] ss:$8 sps:$4 sm:$0xff] (!%p139_p3)   ;;  %v880_v13 = vld [vmem:[%s1128_s1 + $0x64] ss:$8 sps:$4 sm:$0xff] (!%p139_p3)  }
   0xb   : > { %v882_v14 = vld [vmem:[%s1128_s1 + $0x60] ss:$8 sps:$4 sm:$0xff] (!%p139_p3)   ;;  %v883_v15 = vld [vmem:[%s1128_s1 + $0x74] ss:$8 sps:$4 sm:$0xff] (!%p139_p3)   ;;  %v885_v16 = vld [vmem:[%s1128_s1 + $0x70] ss:$8 sps:$4 sm:$0xff] (!%p139_p3)  }
   0xd   : > { %422 = vmatpush1.bf16.msra.mxu0 (!%p139_p3), %v867_v4  ;;  %830 = vmatpush1.bf16.msra.mxu1 (!%p139_p3), %v867_v4 }
   0xe   : > { %s1135_s15 = smov (!%p171_p4, %s781_s15), 255  ;;  %423 = vmatprep.subr.bf16.mxu0 %v868_v5  ;;  %823 = vmatprep.subr.bf16.mxu1 %v868_v5 }
   0xf   : > { %s782_s24 = sshll.u32 %s1135_s15, 2  ;;  %s820_s26 = sshll.u32 %s1135_s15, 4 }
  0x10   : > { %s989_s3 = scalar_lea.vmem %s1127_s0, %s782_s24  ;;  %s1052_s29 = scalar_lea.vmem %s1129_s2, %s820_s26 }
  0x11   : > { %424 = vmatpush1.bf16.msra.mxu0 %v870_v6  ;;  %831 = vmatpush1.bf16.msra.mxu1 %v870_v6  ;;  %v886_v17 = vld [vmem:[%s989_s3] sm:$0xff]   ;;  %v888_v19 = vld [vmem:[%s989_s3 + $0x8] sm:$0xff]   ;;  %v890_v21 = vld [vmem:[%s989_s3 + $0x10] sm:$0xff]  }
  0x12   : > { %425 = vmatprep.subr.bf16.mxu0 %v871_v7  ;;  %824 = vmatprep.subr.bf16.mxu1 %v871_v7  ;;  %v887_v18 = vld [vmem:[%s989_s3 + $0x40] sm:$0xff]   ;;  %v889_v20 = vld [vmem:[%s989_s3 + $0x48] sm:$0xff]   ;;  %v891_v22 = vld [vmem:[%s989_s3 + $0x50] sm:$0xff]  }
  0x13   : > { %v892_v23 = vld [vmem:[%s989_s3 + $0x18] sm:$0xff]   ;;  %v894_v25 = vld [vmem:[%s989_s3 + $0x20] sm:$0xff]   ;;  %v896_v27 = vld [vmem:[%s989_s3 + $0x28] sm:$0xff]  }
  0x14   : > { %v893_v24 = vld [vmem:[%s989_s3 + $0x58] sm:$0xff]   ;;  %v895_v26 = vld [vmem:[%s989_s3 + $0x60] sm:$0xff]   ;;  %v897_v28 = vld [vmem:[%s989_s3 + $0x68] sm:$0xff]  }
  0x15   : > { %426 = vmatpush1.bf16.msra.mxu0 %v873_v8  ;;  %832 = vmatpush1.bf16.msra.mxu1 %v873_v8  ;;  %v898_v29 = vld [vmem:[%s989_s3 + $0x30] sm:$0xff]   ;;  %v900_v31 = vld [vmem:[%s989_s3 + $0x38] sm:$0xff]  }
  0x16   : > { %427 = vmatprep.subr.bf16.mxu0 %v874_v9  ;;  %825 = vmatprep.subr.bf16.mxu1 %v874_v9  ;;  %v899_v30 = vld [vmem:[%s989_s3 + $0x70] sm:$0xff]   ;;  %v901_v32 = vld [vmem:[%s989_s3 + $0x78] sm:$0xff]  }
  0x19   : > { %428 = vmatpush1.bf16.msra.mxu0 %v876_v10  ;;  %833 = vmatpush1.bf16.msra.mxu1 %v876_v10 }
  0x1a   : > { %429 = vmatprep.subr.bf16.mxu0 %v877_v11  ;;  %826 = vmatprep.subr.bf16.mxu1 %v877_v11 }
  0x1d   : > { %430 = vmatpush1.bf16.msra.mxu0 %v879_v12  ;;  %834 = vmatpush1.bf16.msra.mxu1 %v879_v12 }
  0x1e   : > { %431 = vmatprep.subr.bf16.mxu0 %v880_v13  ;;  %827 = vmatprep.subr.bf16.mxu1 %v880_v13 }
  0x21   : > { %432 = vmatpush1.bf16.msra.mxu0 %v882_v14  ;;  %835 = vmatpush1.bf16.msra.mxu1 %v882_v14 }
  0x22   : > { %433 = vmatprep.subr.bf16.mxu0 %v883_v15  ;;  %828 = vmatprep.subr.bf16.mxu1 %v883_v15 }
  0x25   : > { %434 = vmatpush1.bf16.msra.mxu0 %v885_v16  ;;  %836 = vmatpush1.bf16.msra.mxu1 %v885_v16 }
  0x28   : > { %452 = vmatmul.mubr.bf16.vlgmr.msra.gmra.mrb[0].mxu0 %v886_v17  ;;  %532 = vmatmul.mubr.bf16.vlgmr.msra.gmra.mrb[0].mxu1 %v887_v18 }
  0x29   : > { %461 = vmatprep.mubr.bf16.mxu0 %v926_v2  ;;  %541 = vmatprep.mubr.bf16.mxu1 %v926_v2 }
  0x30   : > { %462 = vmatmul.mubr.bf16.gmra.mrb[4].mxu0 %v888_v19  ;;  %542 = vmatmul.mubr.bf16.gmra.mrb[4].mxu1 %v889_v20 }
  0x31   : > { %471 = vmatprep.mubr.bf16.mxu0 %v926_v2  ;;  %551 = vmatprep.mubr.bf16.mxu1 %v926_v2 }
  0x38   : > { %472 = vmatmul.mubr.bf16.gmra.mrb[8].mxu0 %v890_v21  ;;  %552 = vmatmul.mubr.bf16.gmra.mrb[8].mxu1 %v891_v22 }
  0x39   : > { %481 = vmatprep.mubr.bf16.mxu0 %v926_v2  ;;  %561 = vmatprep.mubr.bf16.mxu1 %v926_v2 }
  0x40   : > { %482 = vmatmul.mubr.bf16.gmra.mrb[12].mxu0 %v892_v23  ;;  %562 = vmatmul.mubr.bf16.gmra.mrb[12].mxu1 %v893_v24 }
  0x41   : > { %491 = vmatprep.mubr.bf16.mxu0 %v926_v2  ;;  %571 = vmatprep.mubr.bf16.mxu1 %v926_v2 }
  0x48   : > { %492 = vmatmul.mubr.bf16.gmra.mrb[16].mxu0 %v894_v25  ;;  %572 = vmatmul.mubr.bf16.gmra.mrb[16].mxu1 %v895_v26 }
  0x49   : > { %501 = vmatprep.mubr.bf16.mxu0 %v926_v2  ;;  %581 = vmatprep.mubr.bf16.mxu1 %v926_v2 }
  0x50   : > { %502 = vmatmul.mubr.bf16.gmra.mrb[20].mxu0 %v896_v27  ;;  %582 = vmatmul.mubr.bf16.gmra.mrb[20].mxu1 %v897_v28 }
  0x51   : > { %511 = vmatprep.mubr.bf16.mxu0 %v926_v2  ;;  %591 = vmatprep.mubr.bf16.mxu1 %v926_v2 }
  0x58   : > { %512 = vmatmul.mubr.bf16.gmra.mrb[24].mxu0 %v898_v29  ;;  %592 = vmatmul.mubr.bf16.gmra.mrb[24].mxu1 %v899_v30 }
  0x59   : > { %521 = vmatprep.mubr.bf16.mxu0 %v926_v2  ;;  %601 = vmatprep.mubr.bf16.mxu1 %v926_v2 }
  0x60   : > { %522 = vmatmul.mubr.bf16.gmra.mrb[28].mxu0 %v900_v31  ;;  %602 = vmatmul.mubr.bf16.gmra.mrb[28].mxu1 %v901_v32 }
  0xfb   : > { %v453_v33 = vpop.f32.mrb[0].mxu0  ;;  %v533_v34 = vpop.f32.mrb[0].mxu1 }
  0xfc   : > { %612 = vst [vmem:[%s1052_s29] sm:$0xff] %v453_v33  ;;  %644 = vst [vmem:[%s1052_s29 + $0x100] sm:$0xff] %v533_v34  ;;  %v455_v35 = vpop.f32.mrb[1].mxu0  ;;  %v535_v36 = vpop.f32.mrb[1].mxu1 }
  0xfd   : > { %613 = vst [vmem:[%s1052_s29 + $0x8] sm:$0xff] %v455_v35  ;;  %645 = vst [vmem:[%s1052_s29 + $0x108] sm:$0xff] %v535_v36  ;;  %v457_v37 = vpop.f32.mrb[2].mxu0  ;;  %v537_v38 = vpop.f32.mrb[2].mxu1 }
  0xfe   : > { %614 = vst [vmem:[%s1052_s29 + $0x10] sm:$0xff] %v457_v37  ;;  %646 = vst [vmem:[%s1052_s29 + $0x110] sm:$0xff] %v537_v38  ;;  %v459_v39 = vpop.f32.mrb[3].mxu0  ;;  %v539_v40 = vpop.f32.mrb[3].mxu1 }
  0xff   : > { %615 = vst [vmem:[%s1052_s29 + $0x18] sm:$0xff] %v459_v39  ;;  %647 = vst [vmem:[%s1052_s29 + $0x118] sm:$0xff] %v539_v40 }
 0x103   : > { %v463_v41 = vpop.f32.mrb[4].mxu0  ;;  %v543_v42 = vpop.f32.mrb[4].mxu1 }
 0x104   : > { %616 = vst [vmem:[%s1052_s29 + $0x20] sm:$0xff] %v463_v41  ;;  %648 = vst [vmem:[%s1052_s29 + $0x120] sm:$0xff] %v543_v42  ;;  %v465_v43 = vpop.f32.mrb[5].mxu0  ;;  %v545_v44 = vpop.f32.mrb[5].mxu1 }
 0x105   : > { %617 = vst [vmem:[%s1052_s29 + $0x28] sm:$0xff] %v465_v43  ;;  %649 = vst [vmem:[%s1052_s29 + $0x128] sm:$0xff] %v545_v44  ;;  %v467_v45 = vpop.f32.mrb[6].mxu0  ;;  %v547_v46 = vpop.f32.mrb[6].mxu1 }
 0x106   : > { %618 = vst [vmem:[%s1052_s29 + $0x30] sm:$0xff] %v467_v45  ;;  %650 = vst [vmem:[%s1052_s29 + $0x130] sm:$0xff] %v547_v46  ;;  %v469_v47 = vpop.f32.mrb[7].mxu0  ;;  %v549_v48 = vpop.f32.mrb[7].mxu1 }
 0x107   : > { %619 = vst [vmem:[%s1052_s29 + $0x38] sm:$0xff] %v469_v47  ;;  %651 = vst [vmem:[%s1052_s29 + $0x138] sm:$0xff] %v549_v48 }
 0x10b   : > { %v473_v49 = vpop.f32.mrb[8].mxu0  ;;  %v553_v50 = vpop.f32.mrb[8].mxu1 }
 0x10c   : > { %620 = vst [vmem:[%s1052_s29 + $0x40] sm:$0xff] %v473_v49  ;;  %652 = vst [vmem:[%s1052_s29 + $0x140] sm:$0xff] %v553_v50  ;;  %v475_v51 = vpop.f32.mrb[9].mxu0  ;;  %v555_v52 = vpop.f32.mrb[9].mxu1 }
 0x10d   : > { %621 = vst [vmem:[%s1052_s29 + $0x48] sm:$0xff] %v475_v51  ;;  %653 = vst [vmem:[%s1052_s29 + $0x148] sm:$0xff] %v555_v52  ;;  %v477_v53 = vpop.f32.mrb[10].mxu0  ;;  %v557_v54 = vpop.f32.mrb[10].mxu1 }
 0x10e   : > { %622 = vst [vmem:[%s1052_s29 + $0x50] sm:$0xff] %v477_v53  ;;  %654 = vst [vmem:[%s1052_s29 + $0x150] sm:$0xff] %v557_v54  ;;  %v479_v55 = vpop.f32.mrb[11].mxu0  ;;  %v559_v56 = vpop.f32.mrb[11].mxu1 }
 0x10f   : > { %623 = vst [vmem:[%s1052_s29 + $0x58] sm:$0xff] %v479_v55  ;;  %655 = vst [vmem:[%s1052_s29 + $0x158] sm:$0xff] %v559_v56 }
 0x113   : > { %v483_v57 = vpop.f32.mrb[12].mxu0  ;;  %v563_v58 = vpop.f32.mrb[12].mxu1 }
 0x114   : > { %624 = vst [vmem:[%s1052_s29 + $0x60] sm:$0xff] %v483_v57  ;;  %656 = vst [vmem:[%s1052_s29 + $0x160] sm:$0xff] %v563_v58  ;;  %v485_v59 = vpop.f32.mrb[13].mxu0  ;;  %v565_v60 = vpop.f32.mrb[13].mxu1 }
 0x115   : > { %625 = vst [vmem:[%s1052_s29 + $0x68] sm:$0xff] %v485_v59  ;;  %657 = vst [vmem:[%s1052_s29 + $0x168] sm:$0xff] %v565_v60  ;;  %v487_v61 = vpop.f32.mrb[14].mxu0  ;;  %v567_v62 = vpop.f32.mrb[14].mxu1 }
 0x116   : > { %626 = vst [vmem:[%s1052_s29 + $0x70] sm:$0xff] %v487_v61  ;;  %658 = vst [vmem:[%s1052_s29 + $0x170] sm:$0xff] %v567_v62  ;;  %v489_v63 = vpop.f32.mrb[15].mxu0  ;;  %v569_v0 = vpop.f32.mrb[15].mxu1 }
 0x117   : > { %627 = vst [vmem:[%s1052_s29 + $0x78] sm:$0xff] %v489_v63  ;;  %659 = vst [vmem:[%s1052_s29 + $0x178] sm:$0xff] %v569_v0 }
 0x11b   : > { %v493_v1 = vpop.f32.mrb[16].mxu0  ;;  %v573_v2 = vpop.f32.mrb[16].mxu1 }
 0x11c   : > { %628 = vst [vmem:[%s1052_s29 + $0x80] sm:$0xff] %v493_v1  ;;  %660 = vst [vmem:[%s1052_s29 + $0x180] sm:$0xff] %v573_v2  ;;  %v495_v3 = vpop.f32.mrb[17].mxu0  ;;  %v575_v4 = vpop.f32.mrb[17].mxu1 }
 0x11d   : > { %629 = vst [vmem:[%s1052_s29 + $0x88] sm:$0xff] %v495_v3  ;;  %661 = vst [vmem:[%s1052_s29 + $0x188] sm:$0xff] %v575_v4  ;;  %v497_v5 = vpop.f32.mrb[18].mxu0  ;;  %v577_v6 = vpop.f32.mrb[18].mxu1 }
 0x11e   : > { %630 = vst [vmem:[%s1052_s29 + $0x90] sm:$0xff] %v497_v5  ;;  %662 = vst [vmem:[%s1052_s29 + $0x190] sm:$0xff] %v577_v6  ;;  %v499_v7 = vpop.f32.mrb[19].mxu0  ;;  %v579_v8 = vpop.f32.mrb[19].mxu1 }
 0x11f   : > { %631 = vst [vmem:[%s1052_s29 + $0x98] sm:$0xff] %v499_v7  ;;  %663 = vst [vmem:[%s1052_s29 + $0x198] sm:$0xff] %v579_v8 }
 0x123   : > { %v503_v9 = vpop.f32.mrb[20].mxu0  ;;  %v583_v10 = vpop.f32.mrb[20].mxu1 }
 0x124   : > { %632 = vst [vmem:[%s1052_s29 + $0xa0] sm:$0xff] %v503_v9  ;;  %664 = vst [vmem:[%s1052_s29 + $0x1a0] sm:$0xff] %v583_v10  ;;  %v505_v11 = vpop.f32.mrb[21].mxu0  ;;  %v585_v12 = vpop.f32.mrb[21].mxu1 }
 0x125   : > { %633 = vst [vmem:[%s1052_s29 + $0xa8] sm:$0xff] %v505_v11  ;;  %665 = vst [vmem:[%s1052_s29 + $0x1a8] sm:$0xff] %v585_v12  ;;  %v507_v13 = vpop.f32.mrb[22].mxu0  ;;  %v587_v14 = vpop.f32.mrb[22].mxu1 }
 0x126   : > { %634 = vst [vmem:[%s1052_s29 + $0xb0] sm:$0xff] %v507_v13  ;;  %666 = vst [vmem:[%s1052_s29 + $0x1b0] sm:$0xff] %v587_v14  ;;  %v509_v15 = vpop.f32.mrb[23].mxu0  ;;  %v589_v16 = vpop.f32.mrb[23].mxu1 }
 0x127   : > { %635 = vst [vmem:[%s1052_s29 + $0xb8] sm:$0xff] %v509_v15  ;;  %667 = vst [vmem:[%s1052_s29 + $0x1b8] sm:$0xff] %v589_v16 }
 0x12b   : > { %v513_v17 = vpop.f32.mrb[24].mxu0  ;;  %v593_v18 = vpop.f32.mrb[24].mxu1 }
 0x12c   : > { %636 = vst [vmem:[%s1052_s29 + $0xc0] sm:$0xff] %v513_v17  ;;  %668 = vst [vmem:[%s1052_s29 + $0x1c0] sm:$0xff] %v593_v18  ;;  %v515_v19 = vpop.f32.mrb[25].mxu0  ;;  %v595_v20 = vpop.f32.mrb[25].mxu1 }
 0x12d   : > { %637 = vst [vmem:[%s1052_s29 + $0xc8] sm:$0xff] %v515_v19  ;;  %669 = vst [vmem:[%s1052_s29 + $0x1c8] sm:$0xff] %v595_v20  ;;  %v517_v21 = vpop.f32.mrb[26].mxu0  ;;  %v597_v22 = vpop.f32.mrb[26].mxu1 }
 0x12e   : > { %638 = vst [vmem:[%s1052_s29 + $0xd0] sm:$0xff] %v517_v21  ;;  %670 = vst [vmem:[%s1052_s29 + $0x1d0] sm:$0xff] %v597_v22  ;;  %v519_v23 = vpop.f32.mrb[27].mxu0  ;;  %v599_v24 = vpop.f32.mrb[27].mxu1 }
 0x12f   : > { %639 = vst [vmem:[%s1052_s29 + $0xd8] sm:$0xff] %v519_v23  ;;  %671 = vst [vmem:[%s1052_s29 + $0x1d8] sm:$0xff] %v599_v24 }
 0x133   : > { %v523_v25 = vpop.f32.mrb[28].mxu0  ;;  %v603_v26 = vpop.f32.mrb[28].mxu1 }
 0x134   : > { %640 = vst [vmem:[%s1052_s29 + $0xe0] sm:$0xff] %v523_v25  ;;  %672 = vst [vmem:[%s1052_s29 + $0x1e0] sm:$0xff] %v603_v26  ;;  %v525_v27 = vpop.f32.mrb[29].mxu0  ;;  %v605_v28 = vpop.f32.mrb[29].mxu1 }
 0x135   : > { %641 = vst [vmem:[%s1052_s29 + $0xe8] sm:$0xff] %v525_v27  ;;  %673 = vst [vmem:[%s1052_s29 + $0x1e8] sm:$0xff] %v605_v28  ;;  %v527_v29 = vpop.f32.mrb[30].mxu0  ;;  %v607_v30 = vpop.f32.mrb[30].mxu1 }
 0x136   : > { %642 = vst [vmem:[%s1052_s29 + $0xf0] sm:$0xff] %v527_v29  ;;  %674 = vst [vmem:[%s1052_s29 + $0x1f0] sm:$0xff] %v607_v30  ;;  %v529_v31 = vpop.f32.mrb[31].mxu0  ;;  %v609_v32 = vpop.f32.mrb[31].mxu1 }
 0x137   : > { %643 = vst [vmem:[%s1052_s29 + $0xf8] sm:$0xff] %v529_v31  ;;  %675 = vst [vmem:[%s1052_s29 + $0x1f8] sm:$0xff] %v609_v32 }
 0x138 PF: > { %s12_s11 = sadd.s32 1, %s924_s11   ;;  %s1130_s9 = smov %s920_s10 }
 0x139   : > { %p9_p5 = scmp.ge.s32.totalorder %s12_s11, 10   ;;  %s1131_s10 = smov %s1133_s12 }
 0x13b   :  { %11 = sbr.rel (!%p9_p5) target bundleno = 2 (0x2), region = 61 }

</bundles_post_ra>
